<compile_context>
chip_gen: v7x
topology: tpu7x:2x2x1
jax: 0.10.0
libtpu: 0.0.40
codegen_flags: <defaults>
</compile_context>

<pallas_src>
import functools

import jax
import jax.numpy as jnp
from jax.experimental import pallas as pl
from jax.experimental.pallas import tpu as pltpu


def _round_up(x, m):
    return ((x + m - 1) // m) * m


K1, K1P = 75, 80      # conv1 patch features (3*5*5), padded to a bf16 sublane multiple
K2, K2P = 150, 160    # conv2 patch features (6*5*5)
C1P = 8               # conv1 channels as stored between the two calls (6 real + 2 zero)


# ----------------------------- Pallas kernels -----------------------------

def _conv1_pool_kernel(p_ref, w_ref, b_ref, o_ref, *, bt):
    """conv1 matmul over 4 pool taps (unrolled) + max + bias + ReLU, one batch tile.

    p_ref: (bt, 4, 196, K1P) bf16 tap-grouped im2col patches
    w_ref: (K1P, 128) bf16, b_ref: (1, 128) f32, o_ref: (bt, 196, C1P) bf16
    """
    w = w_ref[...]
    b = b_ref[...]
    for i in range(bt):
        m = jnp.dot(p_ref[i, 0], w, preferred_element_type=jnp.float32)
        for t in range(1, 4):
            m = jnp.maximum(m, jnp.dot(p_ref[i, t], w, preferred_element_type=jnp.float32))
        # relu(max(.) + b) == max over taps of relu(. + b)  (monotonic), so bias/ReLU once.
        y = jnp.maximum(m + b, 0.0)
        o_ref[i] = y[:, :C1P].astype(o_ref.dtype)


def _conv2_fc_kernel(p_ref, w2_ref, b2_ref, w1s_ref, b1_ref, wf2_ref, bf2_ref,
                     wf3_ref, bf3_ref, o_ref, *, bt2):
    """conv2 (+bias+ReLU+pool) + fc1 + fc2 + fc3 fused; intermediates never leave VMEM.

    p_ref: (1, 4, 25*bt2, K2P) bf16, rows ordered (pixel-major, image-minor)
    w1s_ref: (25, 128, 128) bf16 per-pixel fc1 weight blocks
    o_ref: (1, bt2, 128) f32 logits (first 10 lanes real)
    """
    w2 = w2_ref[...]
    m = jnp.dot(p_ref[0, 0], w2, preferred_element_type=jnp.float32)
    for t in range(1, 4):
        m = jnp.maximum(m, jnp.dot(p_ref[0, t], w2, preferred_element_type=jnp.float32))
    a2 = jnp.maximum(m + b2_ref[...], 0.0)            # (25*bt2, 128) f32; lanes >=16 are 0

    # fc1 over the NCHW-flattened 400 features, expressed as 25 per-pixel matmuls so the
    # lane-packed conv2 output is consumed directly (no flatten / relayout / HBM round-trip).
    h1 = jnp.zeros((bt2, 128), jnp.float32)
    for p in range(25):
        blk = a2[p * bt2:(p + 1) * bt2, :].astype(jnp.bfloat16)
        h1 = h1 + jnp.dot(blk, w1s_ref[p], preferred_element_type=jnp.float32)
    h1 = jnp.maximum(h1 + b1_ref[...], 0.0).astype(jnp.bfloat16)

    h2 = jnp.dot(h1, wf2_ref[...], preferred_element_type=jnp.float32) + bf2_ref[...]
    h2 = jnp.maximum(h2, 0.0).astype(jnp.bfloat16)
    h3 = jnp.dot(h2, wf3_ref[...], preferred_element_type=jnp.float32) + bf3_ref[...]
    o_ref[0] = h3


# ----------------------------- XLA-side glue (single gather per conv) -----------------------------

def _conv1_patches(xh, bt):
    """Tap-grouped im2col patches for conv1, built directly from the NHWC input (no
    intermediate im2col tensor and no separate tap-stack pass)."""
    B = xh.shape[0]
    taps = []
    for dh in (0, 1):
        for dw in (0, 1):
            cols = [xh[:, dh + kh:dh + kh + 28:2, dw + kw:dw + kw + 28:2, :]
                    for kh in range(5) for kw in range(5)]
            taps.append(jnp.stack(cols, axis=-1).reshape(B, 196, K1))
    p1 = jnp.stack(taps, axis=1)                                        # (B, 4, 196, 75)
    bpad = _round_up(B, bt)
    p1 = jnp.pad(p1, ((0, bpad - B), (0, 0), (0, 0), (0, K1P - K1)))
    return p1.astype(jnp.bfloat16)


def _conv2_patches(a1, B, bt2, nt):
    """Tap-grouped im2col patches for conv2 from the packed bf16 conv1 output, rearranged so
    each batch tile's rows are (pixel-major, image-minor) for the in-kernel fc1 slabs."""
    a = a1[:B].reshape(B, 14, 14, C1P)[..., :6]
    taps = []
    for dh in (0, 1):
        for dw in (0, 1):
            cols = [a[:, dh + kh:dh + kh + 10:2, dw + kw:dw + kw + 10:2, :]
                    for kh in range(5) for kw in range(5)]
            taps.append(jnp.stack(cols, axis=-1).reshape(B, 25, K2))
    p2 = jnp.stack(taps, axis=1)                                        # (B, 4, 25, 150) bf16
    p2 = jnp.pad(p2, ((0, nt * bt2 - B), (0, 0), (0, 0), (0, K2P - K2)))
    p2 = p2.reshape(nt, bt2, 4, 25, K2P).transpose(0, 2, 3, 1, 4)
    return p2.reshape(nt, 4, 25 * bt2, K2P)


# ----------------------------- Net forward -----------------------------

def net_forward(x, pp):
    B = x.shape[0]
    assert x.shape[1:] == (3, 32, 32), "Net expects (B, 3, 32, 32) inputs"
    xh = x.transpose(0, 2, 3, 1)                                        # NHWC

    # ---- call 1: conv1 + bias + ReLU + 2x2 max-pool ----
    bt = 8 if B >= 16 else 1
    p1 = _conv1_patches(xh, bt)
    bpad = p1.shape[0]
    a1 = pl.pallas_call(
        functools.partial(_conv1_pool_kernel, bt=bt),
        grid=(bpad // bt,),
        in_specs=[
            pl.BlockSpec((bt, 4, 196, K1P), lambda i: (i, 0, 0, 0)),
            pl.BlockSpec((K1P, 128), lambda i: (0, 0)),
            pl.BlockSpec((1, 128), lambda i: (0, 0)),
        ],
        out_specs=pl.BlockSpec((bt, 196, C1P), lambda i: (i, 0, 0)),
        out_shape=jax.ShapeDtypeStruct((bpad, 196, C1P), jnp.bfloat16),
        compiler_params=pltpu.CompilerParams(dimension_semantics=("parallel",)),
    )(p1, pp["conv1_w"], pp["conv1_b"])

    # ---- call 2: conv2 + bias + ReLU + pool + fc1 + fc2 + fc3 ----
    bt2 = 8 if B >= 16 else max(1, B // 2)
    nt = (B + bt2 - 1) // bt2
    p2 = _conv2_patches(a1, B, bt2, nt)
    out = pl.pallas_call(
        functools.partial(_conv2_fc_kernel, bt2=bt2),
        grid=(nt,),
        in_specs=[
            pl.BlockSpec((1, 4, 25 * bt2, K2P), lambda i: (i, 0, 0, 0)),
            pl.BlockSpec((K2P, 128), lambda i: (0, 0)),
            pl.BlockSpec((1, 128), lambda i: (0, 0)),
            pl.BlockSpec((25, 128, 128), lambda i: (0, 0, 0)),
            pl.BlockSpec((1, 128), lambda i: (0, 0)),
            pl.BlockSpec((128, 128), lambda i: (0, 0)),
            pl.BlockSpec((1, 128), lambda i: (0, 0)),
            pl.BlockSpec((128, 128), lambda i: (0, 0)),
            pl.BlockSpec((1, 128), lambda i: (0, 0)),
        ],
        out_specs=pl.BlockSpec((1, bt2, 128), lambda i: (i, 0, 0)),
        out_shape=jax.ShapeDtypeStruct((nt, bt2, 128), jnp.float32),
        compiler_params=pltpu.CompilerParams(dimension_semantics=("parallel",)),
    )(p2, pp["conv2_w"], pp["conv2_b"], pp["fc1_w"], pp["fc1_b"],
      pp["fc2_w"], pp["fc2_b"], pp["fc3_w"], pp["fc3_b"])

    return out.reshape(nt * bt2, 128)[:B, :10]


# ----------------------------- params -----------------------------

def init_params(key):
    """Deterministic PyTorch-like uniform(-1/sqrt(fan_in), 1/sqrt(fan_in)) init (raw shapes)."""
    ks = jax.random.split(key, 10)

    def u(k, shape, fan_in):
        bound = 1.0 / float(fan_in) ** 0.5
        return jax.random.uniform(k, shape, jnp.float32, -bound, bound)

    return {
        "conv1_w": u(ks[0], (6, 3, 5, 5), 3 * 25),
        "conv1_b": u(ks[1], (6,), 3 * 25),
        "conv2_w": u(ks[2], (16, 6, 5, 5), 6 * 25),
        "conv2_b": u(ks[3], (16,), 6 * 25),
        "fc1_w": u(ks[4], (120, 400), 400),
        "fc1_b": u(ks[5], (120,), 400),
        "fc2_w": u(ks[6], (84, 120), 120),
        "fc2_b": u(ks[7], (84,), 120),
        "fc3_w": u(ks[8], (10, 84), 84),
        "fc3_b": u(ks[9], (10,), 84),
    }


def pack_params(p):
    """One-time weight packing: transpose/scatter/pad/cast so the forward pass never relayouts."""

    def pad_bias(b):
        return jnp.pad(b, (0, 128 - b.shape[0])).reshape(1, 128).astype(jnp.float32)

    def conv_pack(w, kp):
        o, c, k, _ = w.shape
        wm = w.reshape(o, c * k * k).T                     # (C*k*k, O); rows ordered (c, kh, kw)
        wm = jnp.pad(wm, ((0, kp - wm.shape[0]), (0, 128 - o)))
        return wm.astype(jnp.bfloat16)

    def fc_pack(w):
        wt = w.T
        wt = jnp.pad(wt, ((0, 128 - wt.shape[0]), (0, 128 - wt.shape[1])))
        return wt.astype(jnp.bfloat16)

    # fc1: torch flattens NCHW, i.e. feature index = c*25 + h*5 + w.  Scatter the (120,400)
    # weight into 25 per-pixel (128,128) blocks (block p = h*5+w, row = channel c) so the
    # fused kernel consumes the lane-packed conv2 output directly.
    w1s = p["fc1_w"].reshape(120, 16, 25).transpose(2, 1, 0)   # (25, 16, 120) -> [p, c, d]
    w1s = jnp.pad(w1s, ((0, 0), (0, 112), (0, 8))).astype(jnp.bfloat16)

    return {
        "conv1_w": conv_pack(p["conv1_w"], K1P),   # K: 75  -> 80
        "conv1_b": pad_bias(p["conv1_b"]),
        "conv2_w": conv_pack(p["conv2_w"], K2P),   # K: 150 -> 160
        "conv2_b": pad_bias(p["conv2_b"]),
        "fc1_w": w1s,
        "fc1_b": pad_bias(p["fc1_b"]),
        "fc2_w": fc_pack(p["fc2_w"]),
        "fc2_b": pad_bias(p["fc2_b"]),
        "fc3_w": fc_pack(p["fc3_w"]),
        "fc3_b": pad_bias(p["fc3_b"]),
    }


# ----------------- pure-JAX reference (built-in correctness check) -----------------

def net_reference(x, params):
    def conv(x, w, b):
        y = jax.lax.conv_general_dilated(
            x, w, (1, 1), "VALID", dimension_numbers=("NCHW", "OIHW", "NCHW"))
        return jax.nn.relu(y + b[None, :, None, None])

    def pool(y):
        return jax.lax.reduce_window(
            y, -jnp.inf, jax.lax.max, (1, 1, 2, 2), (1, 1, 2, 2), "VALID")

    x = pool(conv(x, params["conv1_w"], params["conv1_b"]))
    x = pool(conv(x, params["conv2_w"], params["conv2_b"]))
    x = x.reshape(x.shape[0], 16 * 5 * 5)
    x = jax.nn.relu(x @ params["fc1_w"].T + params["fc1_b"])
    x = jax.nn.relu(x @ params["fc2_w"].T + params["fc2_b"])
    return x @ params["fc3_w"].T + params["fc3_b"]


if __name__ == "__main__":
    key = jax.random.PRNGKey(0)
    pkey, xkey = jax.random.split(key)
    params = init_params(pkey)
    packed = pack_params(params)
    # Input must be 32x32 so the flatten to 16*5*5 matches the PyTorch module.
    x = jax.random.normal(xkey, (2, 3, 32, 32), jnp.float32)

    out = jax.jit(net_forward)(x, packed)
    out = jax.block_until_ready(out)
    assert out.shape == (2, 10) and out.dtype == jnp.float32

    ref = net_reference(x, params)
    err = float(jnp.max(jnp.abs(out - jnp.asarray(ref))))
    assert err < 0.1, f"mismatch vs reference: {err}"
    print("KERNEL_OK")
</pallas_src>

<mosaic_0001>
module attributes {stable_mosaic.version = 11 : i64} {
  func.func @_conv1_pool_kernel(%arg0: i32, %arg1: memref<1x4x196x80xbf16, #tpu.memory_space<vmem>>, %arg2: memref<80x128xbf16, #tpu.memory_space<vmem>>, %arg3: memref<1x128xf32, #tpu.memory_space<vmem>>, %arg4: memref<1x196x8xbf16, #tpu.memory_space<vmem>>) attributes {dimension_semantics = [#tpu.dimension_semantics<parallel>], iteration_bounds = array<i64: 2>, scalar_prefetch = 0 : i64, scratch_operands = 0 : i64, tpu.core_type = #tpu.core_type<tc>, window_params = [{transform_indices = @transform_0, window_bounds = array<i64: 1, 4, 196, 80>}, {pipeline_mode = #tpu.pipeline_mode<synchronous>, transform_indices = @transform_1, window_bounds = array<i64: 80, 128>}, {pipeline_mode = #tpu.pipeline_mode<synchronous>, transform_indices = @transform_2, window_bounds = array<i64: 1, 128>}, {transform_indices = @transform_3, window_bounds = array<i64: 1, 196, 8>}]} {
    %c0 = arith.constant 0 : index
    %c0_0 = arith.constant 0 : index
    %0 = vector.load %arg2[%c0, %c0_0] : memref<80x128xbf16, #tpu.memory_space<vmem>>, vector<80x128xbf16>
    %c0_1 = arith.constant 0 : index
    %c0_2 = arith.constant 0 : index
    %1 = vector.load %arg3[%c0_1, %c0_2] : memref<1x128xf32, #tpu.memory_space<vmem>>, vector<1x128xf32>
    %c0_3 = arith.constant 0 : index
    %c0_4 = arith.constant 0 : index
    %c0_5 = arith.constant 0 : index
    %c0_6 = arith.constant 0 : index
    %2 = vector.load %arg1[%c0_3, %c0_4, %c0_5, %c0_6] : memref<1x4x196x80xbf16, #tpu.memory_space<vmem>>, vector<1x1x196x80xbf16>
    %3 = vector.shape_cast %2 : vector<1x1x196x80xbf16> to vector<196x80xbf16>
    %cst = arith.constant dense<0.000000e+00> : vector<196x128xf32>
    %4 = tpu.matmul %3, %0, %cst {dimension_numbers = #tpu.dot_dimension_numbers<[1], [0], [0], [1], [0, 0, 1, 1], [], []>} : vector<196x80xbf16>, vector<80x128xbf16>, vector<196x128xf32> -> vector<196x128xf32>
    %c0_7 = arith.constant 0 : index
    %c1 = arith.constant 1 : index
    %c0_8 = arith.constant 0 : index
    %c0_9 = arith.constant 0 : index
    %5 = vector.load %arg1[%c0_7, %c1, %c0_8, %c0_9] : memref<1x4x196x80xbf16, #tpu.memory_space<vmem>>, vector<1x1x196x80xbf16>
    %6 = vector.shape_cast %5 : vector<1x1x196x80xbf16> to vector<196x80xbf16>
    %cst_10 = arith.constant dense<0.000000e+00> : vector<196x128xf32>
    %7 = tpu.matmul %6, %0, %cst_10 {dimension_numbers = #tpu.dot_dimension_numbers<[1], [0], [0], [1], [0, 0, 1, 1], [], []>} : vector<196x80xbf16>, vector<80x128xbf16>, vector<196x128xf32> -> vector<196x128xf32>
    %8 = arith.maximumf %4, %7 : vector<196x128xf32>
    %c0_11 = arith.constant 0 : index
    %c2 = arith.constant 2 : index
    %c0_12 = arith.constant 0 : index
    %c0_13 = arith.constant 0 : index
    %9 = vector.load %arg1[%c0_11, %c2, %c0_12, %c0_13] : memref<1x4x196x80xbf16, #tpu.memory_space<vmem>>, vector<1x1x196x80xbf16>
    %10 = vector.shape_cast %9 : vector<1x1x196x80xbf16> to vector<196x80xbf16>
    %cst_14 = arith.constant dense<0.000000e+00> : vector<196x128xf32>
    %11 = tpu.matmul %10, %0, %cst_14 {dimension_numbers = #tpu.dot_dimension_numbers<[1], [0], [0], [1], [0, 0, 1, 1], [], []>} : vector<196x80xbf16>, vector<80x128xbf16>, vector<196x128xf32> -> vector<196x128xf32>
    %12 = arith.maximumf %8, %11 : vector<196x128xf32>
    %c0_15 = arith.constant 0 : index
    %c3 = arith.constant 3 : index
    %c0_16 = arith.constant 0 : index
    %c0_17 = arith.constant 0 : index
    %13 = vector.load %arg1[%c0_15, %c3, %c0_16, %c0_17] : memref<1x4x196x80xbf16, #tpu.memory_space<vmem>>, vector<1x1x196x80xbf16>
    %14 = vector.shape_cast %13 : vector<1x1x196x80xbf16> to vector<196x80xbf16>
    %cst_18 = arith.constant dense<0.000000e+00> : vector<196x128xf32>
    %15 = tpu.matmul %14, %0, %cst_18 {dimension_numbers = #tpu.dot_dimension_numbers<[1], [0], [0], [1], [0, 0, 1, 1], [], []>} : vector<196x80xbf16>, vector<80x128xbf16>, vector<196x128xf32> -> vector<196x128xf32>
    %16 = arith.maximumf %12, %15 : vector<196x128xf32>
    %17 = vector.broadcast %1 : vector<1x128xf32> to vector<196x128xf32>
    %18 = arith.addf %16, %17 : vector<196x128xf32>
    %cst_19 = arith.constant 0.000000e+00 : f32
    %19 = vector.broadcast %cst_19 : f32 to vector<196x128xf32>
    %20 = arith.maximumf %18, %19 : vector<196x128xf32>
    %21 = vector.extract_strided_slice %20 {offsets = [0, 0], sizes = [196, 8], strides = [1, 1]} : vector<196x128xf32> to vector<196x8xf32>
    %22 = arith.truncf %21 : vector<196x8xf32> to vector<196x8xbf16>
    %c0_20 = arith.constant 0 : index
    %c0_21 = arith.constant 0 : index
    %c0_22 = arith.constant 0 : index
    %23 = vector.load %arg4[%c0_20, %c0_21, %c0_22] : memref<1x196x8xbf16, #tpu.memory_space<vmem>>, vector<1x196x8xbf16>
    %24 = vector.shape_cast %23 : vector<1x196x8xbf16> to vector<196x8xbf16>
    %25 = vector.shape_cast %22 : vector<196x8xbf16> to vector<1x196x8xbf16>
    tpu.vector_store %arg4[%c0_20, %c0_21, %c0_22], %25 {strides = array<i32>} : memref<1x196x8xbf16, #tpu.memory_space<vmem>>, vector<1x196x8xbf16>,
    return
  }
  func.func @transform_0(%arg0: i32) -> (i32, i32, i32, i32) {
    %c0_i32 = arith.constant 0 : i32
    %c0_i32_0 = arith.constant 0 : i32
    %c0_i32_1 = arith.constant 0 : i32
    %c0_i32_2 = arith.constant 0 : i32
    return %arg0, %c0_i32, %c0_i32_0, %c0_i32_1 : i32, i32, i32, i32
  }
  func.func @transform_1(%arg0: i32) -> (i32, i32) {
    %c0_i32 = arith.constant 0 : i32
    %c0_i32_0 = arith.constant 0 : i32
    %c0_i32_1 = arith.constant 0 : i32
    return %c0_i32, %c0_i32_0 : i32, i32
  }
  func.func @transform_2(%arg0: i32) -> (i32, i32) {
    %c0_i32 = arith.constant 0 : i32
    %c0_i32_0 = arith.constant 0 : i32
    %c0_i32_1 = arith.constant 0 : i32
    return %c0_i32, %c0_i32_0 : i32, i32
  }
  func.func @transform_3(%arg0: i32) -> (i32, i32, i32) {
    %c0_i32 = arith.constant 0 : i32
    %c0_i32_0 = arith.constant 0 : i32
    %c0_i32_1 = arith.constant 0 : i32
    return %arg0, %c0_i32, %c0_i32_0 : i32, i32, i32
  }
}

module attributes {stable_mosaic.version = 11 : i64} {
  func.func @_conv2_fc_kernel(%arg0: i32, %arg1: memref<1x4x25x160xbf16, #tpu.memory_space<vmem>>, %arg2: memref<160x128xbf16, #tpu.memory_space<vmem>>, %arg3: memref<1x128xf32, #tpu.memory_space<vmem>>, %arg4: memref<25x128x128xbf16, #tpu.memory_space<vmem>>, %arg5: memref<1x128xf32, #tpu.memory_space<vmem>>, %arg6: memref<128x128xbf16, #tpu.memory_space<vmem>>, %arg7: memref<1x128xf32, #tpu.memory_space<vmem>>, %arg8: memref<128x128xbf16, #tpu.memory_space<vmem>>, %arg9: memref<1x128xf32, #tpu.memory_space<vmem>>, %arg10: memref<1x1x128xf32, #tpu.memory_space<vmem>>) attributes {dimension_semantics = [#tpu.dimension_semantics<parallel>], iteration_bounds = array<i64: 2>, scalar_prefetch = 0 : i64, scratch_operands = 0 : i64, tpu.core_type = #tpu.core_type<tc>, window_params = [{transform_indices = @transform_0, window_bounds = array<i64: 1, 4, 25, 160>}, {pipeline_mode = #tpu.pipeline_mode<synchronous>, transform_indices = @transform_1, window_bounds = array<i64: 160, 128>}, {pipeline_mode = #tpu.pipeline_mode<synchronous>, transform_indices = @transform_2, window_bounds = array<i64: 1, 128>}, {pipeline_mode = #tpu.pipeline_mode<synchronous>, transform_indices = @transform_3, window_bounds = array<i64: 25, 128, 128>}, {pipeline_mode = #tpu.pipeline_mode<synchronous>, transform_indices = @transform_4, window_bounds = array<i64: 1, 128>}, {pipeline_mode = #tpu.pipeline_mode<synchronous>, transform_indices = @transform_5, window_bounds = array<i64: 128, 128>}, {pipeline_mode = #tpu.pipeline_mode<synchronous>, transform_indices = @transform_6, window_bounds = array<i64: 1, 128>}, {pipeline_mode = #tpu.pipeline_mode<synchronous>, transform_indices = @transform_7, window_bounds = array<i64: 128, 128>}, {pipeline_mode = #tpu.pipeline_mode<synchronous>, transform_indices = @transform_8, window_bounds = array<i64: 1, 128>}, {transform_indices = @transform_9, window_bounds = array<i64: 1, 1, 128>}]} {
    %c0 = arith.constant 0 : index
    %c0_0 = arith.constant 0 : index
    %0 = vector.load %arg2[%c0, %c0_0] : memref<160x128xbf16, #tpu.memory_space<vmem>>, vector<160x128xbf16>
    %c0_1 = arith.constant 0 : index
    %c0_2 = arith.constant 0 : index
    %c0_3 = arith.constant 0 : index
    %c0_4 = arith.constant 0 : index
    %1 = vector.load %arg1[%c0_1, %c0_2, %c0_3, %c0_4] : memref<1x4x25x160xbf16, #tpu.memory_space<vmem>>, vector<1x1x25x160xbf16>
    %2 = vector.shape_cast %1 : vector<1x1x25x160xbf16> to vector<25x160xbf16>
    %cst = arith.constant dense<0.000000e+00> : vector<25x128xf32>
    %3 = tpu.matmul %2, %0, %cst {dimension_numbers = #tpu.dot_dimension_numbers<[1], [0], [0], [1], [0, 0, 1, 1], [], []>} : vector<25x160xbf16>, vector<160x128xbf16>, vector<25x128xf32> -> vector<25x128xf32>
    %c0_5 = arith.constant 0 : index
    %c1 = arith.constant 1 : index
    %c0_6 = arith.constant 0 : index
    %c0_7 = arith.constant 0 : index
    %4 = vector.load %arg1[%c0_5, %c1, %c0_6, %c0_7] : memref<1x4x25x160xbf16, #tpu.memory_space<vmem>>, vector<1x1x25x160xbf16>
    %5 = vector.shape_cast %4 : vector<1x1x25x160xbf16> to vector<25x160xbf16>
    %cst_8 = arith.constant dense<0.000000e+00> : vector<25x128xf32>
    %6 = tpu.matmul %5, %0, %cst_8 {dimension_numbers = #tpu.dot_dimension_numbers<[1], [0], [0], [1], [0, 0, 1, 1], [], []>} : vector<25x160xbf16>, vector<160x128xbf16>, vector<25x128xf32> -> vector<25x128xf32>
    %7 = arith.maximumf %3, %6 : vector<25x128xf32>
    %c0_9 = arith.constant 0 : index
    %c2 = arith.constant 2 : index
    %c0_10 = arith.constant 0 : index
    %c0_11 = arith.constant 0 : index
    %8 = vector.load %arg1[%c0_9, %c2, %c0_10, %c0_11] : memref<1x4x25x160xbf16, #tpu.memory_space<vmem>>, vector<1x1x25x160xbf16>
    %9 = vector.shape_cast %8 : vector<1x1x25x160xbf16> to vector<25x160xbf16>
    %cst_12 = arith.constant dense<0.000000e+00> : vector<25x128xf32>
    %10 = tpu.matmul %9, %0, %cst_12 {dimension_numbers = #tpu.dot_dimension_numbers<[1], [0], [0], [1], [0, 0, 1, 1], [], []>} : vector<25x160xbf16>, vector<160x128xbf16>, vector<25x128xf32> -> vector<25x128xf32>
    %11 = arith.maximumf %7, %10 : vector<25x128xf32>
    %c0_13 = arith.constant 0 : index
    %c3 = arith.constant 3 : index
    %c0_14 = arith.constant 0 : index
    %c0_15 = arith.constant 0 : index
    %12 = vector.load %arg1[%c0_13, %c3, %c0_14, %c0_15] : memref<1x4x25x160xbf16, #tpu.memory_space<vmem>>, vector<1x1x25x160xbf16>
    %13 = vector.shape_cast %12 : vector<1x1x25x160xbf16> to vector<25x160xbf16>
    %cst_16 = arith.constant dense<0.000000e+00> : vector<25x128xf32>
    %14 = tpu.matmul %13, %0, %cst_16 {dimension_numbers = #tpu.dot_dimension_numbers<[1], [0], [0], [1], [0, 0, 1, 1], [], []>} : vector<25x160xbf16>, vector<160x128xbf16>, vector<25x128xf32> -> vector<25x128xf32>
    %15 = arith.maximumf %11, %14 : vector<25x128xf32>
    %c0_17 = arith.constant 0 : index
    %c0_18 = arith.constant 0 : index
    %16 = vector.load %arg3[%c0_17, %c0_18] : memref<1x128xf32, #tpu.memory_space<vmem>>, vector<1x128xf32>
    %17 = vector.broadcast %16 : vector<1x128xf32> to vector<25x128xf32>
    %18 = arith.addf %15, %17 : vector<25x128xf32>
    %cst_19 = arith.constant 0.000000e+00 : f32
    %19 = vector.broadcast %cst_19 : f32 to vector<25x128xf32>
    %20 = arith.maximumf %18, %19 : vector<25x128xf32>
    %cst_20 = arith.constant 0.000000e+00 : f32
    %21 = vector.broadcast %cst_20 : f32 to vector<1x128xf32>
    %22 = vector.extract_strided_slice %20 {offsets = [0, 0], sizes = [1, 128], strides = [1, 1]} : vector<25x128xf32> to vector<1x128xf32>
    %23 = arith.truncf %22 : vector<1x128xf32> to vector<1x128xbf16>
    %c0_21 = arith.constant 0 : index
    %c0_22 = arith.constant 0 : index
    %c0_23 = arith.constant 0 : index
    %24 = vector.load %arg4[%c0_21, %c0_22, %c0_23] : memref<25x128x128xbf16, #tpu.memory_space<vmem>>, vector<1x128x128xbf16>
    %25 = vector.shape_cast %24 : vector<1x128x128xbf16> to vector<128x128xbf16>
    %cst_24 = arith.constant dense<0.000000e+00> : vector<1x128xf32>
    %26 = tpu.matmul %23, %25, %cst_24 {dimension_numbers = #tpu.dot_dimension_numbers<[1], [0], [0], [1], [0, 0, 1, 1], [], []>} : vector<1x128xbf16>, vector<128x128xbf16>, vector<1x128xf32> -> vector<1x128xf32>
    %27 = arith.addf %21, %26 : vector<1x128xf32>
    %28 = vector.extract_strided_slice %20 {offsets = [1, 0], sizes = [1, 128], strides = [1, 1]} : vector<25x128xf32> to vector<1x128xf32>
    %29 = arith.truncf %28 : vector<1x128xf32> to vector<1x128xbf16>
    %c1_25 = arith.constant 1 : index
    %c0_26 = arith.constant 0 : index
    %c0_27 = arith.constant 0 : index
    %30 = vector.load %arg4[%c1_25, %c0_26, %c0_27] : memref<25x128x128xbf16, #tpu.memory_space<vmem>>, vector<1x128x128xbf16>
    %31 = vector.shape_cast %30 : vector<1x128x128xbf16> to vector<128x128xbf16>
    %cst_28 = arith.constant dense<0.000000e+00> : vector<1x128xf32>
    %32 = tpu.matmul %29, %31, %cst_28 {dimension_numbers = #tpu.dot_dimension_numbers<[1], [0], [0], [1], [0, 0, 1, 1], [], []>} : vector<1x128xbf16>, vector<128x128xbf16>, vector<1x128xf32> -> vector<1x128xf32>
    %33 = arith.addf %27, %32 : vector<1x128xf32>
    %34 = vector.extract_strided_slice %20 {offsets = [2, 0], sizes = [1, 128], strides = [1, 1]} : vector<25x128xf32> to vector<1x128xf32>
    %35 = arith.truncf %34 : vector<1x128xf32> to vector<1x128xbf16>
    %c2_29 = arith.constant 2 : index
    %c0_30 = arith.constant 0 : index
    %c0_31 = arith.constant 0 : index
    %36 = vector.load %arg4[%c2_29, %c0_30, %c0_31] : memref<25x128x128xbf16, #tpu.memory_space<vmem>>, vector<1x128x128xbf16>
    %37 = vector.shape_cast %36 : vector<1x128x128xbf16> to vector<128x128xbf16>
    %cst_32 = arith.constant dense<0.000000e+00> : vector<1x128xf32>
    %38 = tpu.matmul %35, %37, %cst_32 {dimension_numbers = #tpu.dot_dimension_numbers<[1], [0], [0], [1], [0, 0, 1, 1], [], []>} : vector<1x128xbf16>, vector<128x128xbf16>, vector<1x128xf32> -> vector<1x128xf32>
    %39 = arith.addf %33, %38 : vector<1x128xf32>
    %40 = vector.extract_strided_slice %20 {offsets = [3, 0], sizes = [1, 128], strides = [1, 1]} : vector<25x128xf32> to vector<1x128xf32>
    %41 = arith.truncf %40 : vector<1x128xf32> to vector<1x128xbf16>
    %c3_33 = arith.constant 3 : index
    %c0_34 = arith.constant 0 : index
    %c0_35 = arith.constant 0 : index
    %42 = vector.load %arg4[%c3_33, %c0_34, %c0_35] : memref<25x128x128xbf16, #tpu.memory_space<vmem>>, vector<1x128x128xbf16>
    %43 = vector.shape_cast %42 : vector<1x128x128xbf16> to vector<128x128xbf16>
    %cst_36 = arith.constant dense<0.000000e+00> : vector<1x128xf32>
    %44 = tpu.matmul %41, %43, %cst_36 {dimension_numbers = #tpu.dot_dimension_numbers<[1], [0], [0], [1], [0, 0, 1, 1], [], []>} : vector<1x128xbf16>, vector<128x128xbf16>, vector<1x128xf32> -> vector<1x128xf32>
    %45 = arith.addf %39, %44 : vector<1x128xf32>
    %46 = vector.extract_strided_slice %20 {offsets = [4, 0], sizes = [1, 128], strides = [1, 1]} : vector<25x128xf32> to vector<1x128xf32>
    %47 = arith.truncf %46 : vector<1x128xf32> to vector<1x128xbf16>
    %c4 = arith.constant 4 : index
    %c0_37 = arith.constant 0 : index
    %c0_38 = arith.constant 0 : index
    %48 = vector.load %arg4[%c4, %c0_37, %c0_38] : memref<25x128x128xbf16, #tpu.memory_space<vmem>>, vector<1x128x128xbf16>
    %49 = vector.shape_cast %48 : vector<1x128x128xbf16> to vector<128x128xbf16>
    %cst_39 = arith.constant dense<0.000000e+00> : vector<1x128xf32>
    %50 = tpu.matmul %47, %49, %cst_39 {dimension_numbers = #tpu.dot_dimension_numbers<[1], [0], [0], [1], [0, 0, 1, 1], [], []>} : vector<1x128xbf16>, vector<128x128xbf16>, vector<1x128xf32> -> vector<1x128xf32>
    %51 = arith.addf %45, %50 : vector<1x128xf32>
    %52 = vector.extract_strided_slice %20 {offsets = [5, 0], sizes = [1, 128], strides = [1, 1]} : vector<25x128xf32> to vector<1x128xf32>
    %53 = arith.truncf %52 : vector<1x128xf32> to vector<1x128xbf16>
    %c5 = arith.constant 5 : index
    %c0_40 = arith.constant 0 : index
    %c0_41 = arith.constant 0 : index
    %54 = vector.load %arg4[%c5, %c0_40, %c0_41] : memref<25x128x128xbf16, #tpu.memory_space<vmem>>, vector<1x128x128xbf16>
    %55 = vector.shape_cast %54 : vector<1x128x128xbf16> to vector<128x128xbf16>
    %cst_42 = arith.constant dense<0.000000e+00> : vector<1x128xf32>
    %56 = tpu.matmul %53, %55, %cst_42 {dimension_numbers = #tpu.dot_dimension_numbers<[1], [0], [0], [1], [0, 0, 1, 1], [], []>} : vector<1x128xbf16>, vector<128x128xbf16>, vector<1x128xf32> -> vector<1x128xf32>
    %57 = arith.addf %51, %56 : vector<1x128xf32>
    %58 = vector.extract_strided_slice %20 {offsets = [6, 0], sizes = [1, 128], strides = [1, 1]} : vector<25x128xf32> to vector<1x128xf32>
    %59 = arith.truncf %58 : vector<1x128xf32> to vector<1x128xbf16>
    %c6 = arith.constant 6 : index
    %c0_43 = arith.constant 0 : index
    %c0_44 = arith.constant 0 : index
    %60 = vector.load %arg4[%c6, %c0_43, %c0_44] : memref<25x128x128xbf16, #tpu.memory_space<vmem>>, vector<1x128x128xbf16>
    %61 = vector.shape_cast %60 : vector<1x128x128xbf16> to vector<128x128xbf16>
    %cst_45 = arith.constant dense<0.000000e+00> : vector<1x128xf32>
    %62 = tpu.matmul %59, %61, %cst_45 {dimension_numbers = #tpu.dot_dimension_numbers<[1], [0], [0], [1], [0, 0, 1, 1], [], []>} : vector<1x128xbf16>, vector<128x128xbf16>, vector<1x128xf32> -> vector<1x128xf32>
    %63 = arith.addf %57, %62 : vector<1x128xf32>
    %64 = vector.extract_strided_slice %20 {offsets = [7, 0], sizes = [1, 128], strides = [1, 1]} : vector<25x128xf32> to vector<1x128xf32>
    %65 = arith.truncf %64 : vector<1x128xf32> to vector<1x128xbf16>
    %c7 = arith.constant 7 : index
    %c0_46 = arith.constant 0 : index
    %c0_47 = arith.constant 0 : index
    %66 = vector.load %arg4[%c7, %c0_46, %c0_47] : memref<25x128x128xbf16, #tpu.memory_space<vmem>>, vector<1x128x128xbf16>
    %67 = vector.shape_cast %66 : vector<1x128x128xbf16> to vector<128x128xbf16>
    %cst_48 = arith.constant dense<0.000000e+00> : vector<1x128xf32>
    %68 = tpu.matmul %65, %67, %cst_48 {dimension_numbers = #tpu.dot_dimension_numbers<[1], [0], [0], [1], [0, 0, 1, 1], [], []>} : vector<1x128xbf16>, vector<128x128xbf16>, vector<1x128xf32> -> vector<1x128xf32>
    %69 = arith.addf %63, %68 : vector<1x128xf32>
    %70 = vector.extract_strided_slice %20 {offsets = [8, 0], sizes = [1, 128], strides = [1, 1]} : vector<25x128xf32> to vector<1x128xf32>
    %71 = arith.truncf %70 : vector<1x128xf32> to vector<1x128xbf16>
    %c8 = arith.constant 8 : index
    %c0_49 = arith.constant 0 : index
    %c0_50 = arith.constant 0 : index
    %72 = vector.load %arg4[%c8, %c0_49, %c0_50] : memref<25x128x128xbf16, #tpu.memory_space<vmem>>, vector<1x128x128xbf16>
    %73 = vector.shape_cast %72 : vector<1x128x128xbf16> to vector<128x128xbf16>
    %cst_51 = arith.constant dense<0.000000e+00> : vector<1x128xf32>
    %74 = tpu.matmul %71, %73, %cst_51 {dimension_numbers = #tpu.dot_dimension_numbers<[1], [0], [0], [1], [0, 0, 1, 1], [], []>} : vector<1x128xbf16>, vector<128x128xbf16>, vector<1x128xf32> -> vector<1x128xf32>
    %75 = arith.addf %69, %74 : vector<1x128xf32>
    %76 = vector.extract_strided_slice %20 {offsets = [9, 0], sizes = [1, 128], strides = [1, 1]} : vector<25x128xf32> to vector<1x128xf32>
    %77 = arith.truncf %76 : vector<1x128xf32> to vector<1x128xbf16>
    %c9 = arith.constant 9 : index
    %c0_52 = arith.constant 0 : index
    %c0_53 = arith.constant 0 : index
    %78 = vector.load %arg4[%c9, %c0_52, %c0_53] : memref<25x128x128xbf16, #tpu.memory_space<vmem>>, vector<1x128x128xbf16>
    %79 = vector.shape_cast %78 : vector<1x128x128xbf16> to vector<128x128xbf16>
    %cst_54 = arith.constant dense<0.000000e+00> : vector<1x128xf32>
    %80 = tpu.matmul %77, %79, %cst_54 {dimension_numbers = #tpu.dot_dimension_numbers<[1], [0], [0], [1], [0, 0, 1, 1], [], []>} : vector<1x128xbf16>, vector<128x128xbf16>, vector<1x128xf32> -> vector<1x128xf32>
    %81 = arith.addf %75, %80 : vector<1x128xf32>
    %82 = vector.extract_strided_slice %20 {offsets = [10, 0], sizes = [1, 128], strides = [1, 1]} : vector<25x128xf32> to vector<1x128xf32>
    %83 = arith.truncf %82 : vector<1x128xf32> to vector<1x128xbf16>
    %c10 = arith.constant 10 : index
    %c0_55 = arith.constant 0 : index
    %c0_56 = arith.constant 0 : index
    %84 = vector.load %arg4[%c10, %c0_55, %c0_56] : memref<25x128x128xbf16, #tpu.memory_space<vmem>>, vector<1x128x128xbf16>
    %85 = vector.shape_cast %84 : vector<1x128x128xbf16> to vector<128x128xbf16>
    %cst_57 = arith.constant dense<0.000000e+00> : vector<1x128xf32>
    %86 = tpu.matmul %83, %85, %cst_57 {dimension_numbers = #tpu.dot_dimension_numbers<[1], [0], [0], [1], [0, 0, 1, 1], [], []>} : vector<1x128xbf16>, vector<128x128xbf16>, vector<1x128xf32> -> vector<1x128xf32>
    %87 = arith.addf %81, %86 : vector<1x128xf32>
    %88 = vector.extract_strided_slice %20 {offsets = [11, 0], sizes = [1, 128], strides = [1, 1]} : vector<25x128xf32> to vector<1x128xf32>
    %89 = arith.truncf %88 : vector<1x128xf32> to vector<1x128xbf16>
    %c11 = arith.constant 11 : index
    %c0_58 = arith.constant 0 : index
    %c0_59 = arith.constant 0 : index
    %90 = vector.load %arg4[%c11, %c0_58, %c0_59] : memref<25x128x128xbf16, #tpu.memory_space<vmem>>, vector<1x128x128xbf16>
    %91 = vector.shape_cast %90 : vector<1x128x128xbf16> to vector<128x128xbf16>
    %cst_60 = arith.constant dense<0.000000e+00> : vector<1x128xf32>
    %92 = tpu.matmul %89, %91, %cst_60 {dimension_numbers = #tpu.dot_dimension_numbers<[1], [0], [0], [1], [0, 0, 1, 1], [], []>} : vector<1x128xbf16>, vector<128x128xbf16>, vector<1x128xf32> -> vector<1x128xf32>
    %93 = arith.addf %87, %92 : vector<1x128xf32>
    %94 = vector.extract_strided_slice %20 {offsets = [12, 0], sizes = [1, 128], strides = [1, 1]} : vector<25x128xf32> to vector<1x128xf32>
    %95 = arith.truncf %94 : vector<1x128xf32> to vector<1x128xbf16>
    %c12 = arith.constant 12 : index
    %c0_61 = arith.constant 0 : index
    %c0_62 = arith.constant 0 : index
    %96 = vector.load %arg4[%c12, %c0_61, %c0_62] : memref<25x128x128xbf16, #tpu.memory_space<vmem>>, vector<1x128x128xbf16>
    %97 = vector.shape_cast %96 : vector<1x128x128xbf16> to vector<128x128xbf16>
    %cst_63 = arith.constant dense<0.000000e+00> : vector<1x128xf32>
    %98 = tpu.matmul %95, %97, %cst_63 {dimension_numbers = #tpu.dot_dimension_numbers<[1], [0], [0], [1], [0, 0, 1, 1], [], []>} : vector<1x128xbf16>, vector<128x128xbf16>, vector<1x128xf32> -> vector<1x128xf32>
    %99 = arith.addf %93, %98 : vector<1x128xf32>
    %100 = vector.extract_strided_slice %20 {offsets = [13, 0], sizes = [1, 128], strides = [1, 1]} : vector<25x128xf32> to vector<1x128xf32>
    %101 = arith.truncf %100 : vector<1x128xf32> to vector<1x128xbf16>
    %c13 = arith.constant 13 : index
    %c0_64 = arith.constant 0 : index
    %c0_65 = arith.constant 0 : index
    %102 = vector.load %arg4[%c13, %c0_64, %c0_65] : memref<25x128x128xbf16, #tpu.memory_space<vmem>>, vector<1x128x128xbf16>
    %103 = vector.shape_cast %102 : vector<1x128x128xbf16> to vector<128x128xbf16>
    %cst_66 = arith.constant dense<0.000000e+00> : vector<1x128xf32>
    %104 = tpu.matmul %101, %103, %cst_66 {dimension_numbers = #tpu.dot_dimension_numbers<[1], [0], [0], [1], [0, 0, 1, 1], [], []>} : vector<1x128xbf16>, vector<128x128xbf16>, vector<1x128xf32> -> vector<1x128xf32>
    %105 = arith.addf %99, %104 : vector<1x128xf32>
    %106 = vector.extract_strided_slice %20 {offsets = [14, 0], sizes = [1, 128], strides = [1, 1]} : vector<25x128xf32> to vector<1x128xf32>
    %107 = arith.truncf %106 : vector<1x128xf32> to vector<1x128xbf16>
    %c14 = arith.constant 14 : index
    %c0_67 = arith.constant 0 : index
    %c0_68 = arith.constant 0 : index
    %108 = vector.load %arg4[%c14, %c0_67, %c0_68] : memref<25x128x128xbf16, #tpu.memory_space<vmem>>, vector<1x128x128xbf16>
    %109 = vector.shape_cast %108 : vector<1x128x128xbf16> to vector<128x128xbf16>
    %cst_69 = arith.constant dense<0.000000e+00> : vector<1x128xf32>
    %110 = tpu.matmul %107, %109, %cst_69 {dimension_numbers = #tpu.dot_dimension_numbers<[1], [0], [0], [1], [0, 0, 1, 1], [], []>} : vector<1x128xbf16>, vector<128x128xbf16>, vector<1x128xf32> -> vector<1x128xf32>
    %111 = arith.addf %105, %110 : vector<1x128xf32>
    %112 = vector.extract_strided_slice %20 {offsets = [15, 0], sizes = [1, 128], strides = [1, 1]} : vector<25x128xf32> to vector<1x128xf32>
    %113 = arith.truncf %112 : vector<1x128xf32> to vector<1x128xbf16>
    %c15 = arith.constant 15 : index
    %c0_70 = arith.constant 0 : index
    %c0_71 = arith.constant 0 : index
    %114 = vector.load %arg4[%c15, %c0_70, %c0_71] : memref<25x128x128xbf16, #tpu.memory_space<vmem>>, vector<1x128x128xbf16>
    %115 = vector.shape_cast %114 : vector<1x128x128xbf16> to vector<128x128xbf16>
    %cst_72 = arith.constant dense<0.000000e+00> : vector<1x128xf32>
    %116 = tpu.matmul %113, %115, %cst_72 {dimension_numbers = #tpu.dot_dimension_numbers<[1], [0], [0], [1], [0, 0, 1, 1], [], []>} : vector<1x128xbf16>, vector<128x128xbf16>, vector<1x128xf32> -> vector<1x128xf32>
    %117 = arith.addf %111, %116 : vector<1x128xf32>
    %118 = vector.extract_strided_slice %20 {offsets = [16, 0], sizes = [1, 128], strides = [1, 1]} : vector<25x128xf32> to vector<1x128xf32>
    %119 = arith.truncf %118 : vector<1x128xf32> to vector<1x128xbf16>
    %c16 = arith.constant 16 : index
    %c0_73 = arith.constant 0 : index
    %c0_74 = arith.constant 0 : index
    %120 = vector.load %arg4[%c16, %c0_73, %c0_74] : memref<25x128x128xbf16, #tpu.memory_space<vmem>>, vector<1x128x128xbf16>
    %121 = vector.shape_cast %120 : vector<1x128x128xbf16> to vector<128x128xbf16>
    %cst_75 = arith.constant dense<0.000000e+00> : vector<1x128xf32>
    %122 = tpu.matmul %119, %121, %cst_75 {dimension_numbers = #tpu.dot_dimension_numbers<[1], [0], [0], [1], [0, 0, 1, 1], [], []>} : vector<1x128xbf16>, vector<128x128xbf16>, vector<1x128xf32> -> vector<1x128xf32>
    %123 = arith.addf %117, %122 : vector<1x128xf32>
    %124 = vector.extract_strided_slice %20 {offsets = [17, 0], sizes = [1, 128], strides = [1, 1]} : vector<25x128xf32> to vector<1x128xf32>
    %125 = arith.truncf %124 : vector<1x128xf32> to vector<1x128xbf16>
    %c17 = arith.constant 17 : index
    %c0_76 = arith.constant 0 : index
    %c0_77 = arith.constant 0 : index
    %126 = vector.load %arg4[%c17, %c0_76, %c0_77] : memref<25x128x128xbf16, #tpu.memory_space<vmem>>, vector<1x128x128xbf16>
    %127 = vector.shape_cast %126 : vector<1x128x128xbf16> to vector<128x128xbf16>
    %cst_78 = arith.constant dense<0.000000e+00> : vector<1x128xf32>
    %128 = tpu.matmul %125, %127, %cst_78 {dimension_numbers = #tpu.dot_dimension_numbers<[1], [0], [0], [1], [0, 0, 1, 1], [], []>} : vector<1x128xbf16>, vector<128x128xbf16>, vector<1x128xf32> -> vector<1x128xf32>
    %129 = arith.addf %123, %128 : vector<1x128xf32>
    %130 = vector.extract_strided_slice %20 {offsets = [18, 0], sizes = [1, 128], strides = [1, 1]} : vector<25x128xf32> to vector<1x128xf32>
    %131 = arith.truncf %130 : vector<1x128xf32> to vector<1x128xbf16>
    %c18 = arith.constant 18 : index
    %c0_79 = arith.constant 0 : index
    %c0_80 = arith.constant 0 : index
    %132 = vector.load %arg4[%c18, %c0_79, %c0_80] : memref<25x128x128xbf16, #tpu.memory_space<vmem>>, vector<1x128x128xbf16>
    %133 = vector.shape_cast %132 : vector<1x128x128xbf16> to vector<128x128xbf16>
    %cst_81 = arith.constant dense<0.000000e+00> : vector<1x128xf32>
    %134 = tpu.matmul %131, %133, %cst_81 {dimension_numbers = #tpu.dot_dimension_numbers<[1], [0], [0], [1], [0, 0, 1, 1], [], []>} : vector<1x128xbf16>, vector<128x128xbf16>, vector<1x128xf32> -> vector<1x128xf32>
    %135 = arith.addf %129, %134 : vector<1x128xf32>
    %136 = vector.extract_strided_slice %20 {offsets = [19, 0], sizes = [1, 128], strides = [1, 1]} : vector<25x128xf32> to vector<1x128xf32>
    %137 = arith.truncf %136 : vector<1x128xf32> to vector<1x128xbf16>
    %c19 = arith.constant 19 : index
    %c0_82 = arith.constant 0 : index
    %c0_83 = arith.constant 0 : index
    %138 = vector.load %arg4[%c19, %c0_82, %c0_83] : memref<25x128x128xbf16, #tpu.memory_space<vmem>>, vector<1x128x128xbf16>
    %139 = vector.shape_cast %138 : vector<1x128x128xbf16> to vector<128x128xbf16>
    %cst_84 = arith.constant dense<0.000000e+00> : vector<1x128xf32>
    %140 = tpu.matmul %137, %139, %cst_84 {dimension_numbers = #tpu.dot_dimension_numbers<[1], [0], [0], [1], [0, 0, 1, 1], [], []>} : vector<1x128xbf16>, vector<128x128xbf16>, vector<1x128xf32> -> vector<1x128xf32>
    %141 = arith.addf %135, %140 : vector<1x128xf32>
    %142 = vector.extract_strided_slice %20 {offsets = [20, 0], sizes = [1, 128], strides = [1, 1]} : vector<25x128xf32> to vector<1x128xf32>
    %143 = arith.truncf %142 : vector<1x128xf32> to vector<1x128xbf16>
    %c20 = arith.constant 20 : index
    %c0_85 = arith.constant 0 : index
    %c0_86 = arith.constant 0 : index
    %144 = vector.load %arg4[%c20, %c0_85, %c0_86] : memref<25x128x128xbf16, #tpu.memory_space<vmem>>, vector<1x128x128xbf16>
    %145 = vector.shape_cast %144 : vector<1x128x128xbf16> to vector<128x128xbf16>
    %cst_87 = arith.constant dense<0.000000e+00> : vector<1x128xf32>
    %146 = tpu.matmul %143, %145, %cst_87 {dimension_numbers = #tpu.dot_dimension_numbers<[1], [0], [0], [1], [0, 0, 1, 1], [], []>} : vector<1x128xbf16>, vector<128x128xbf16>, vector<1x128xf32> -> vector<1x128xf32>
    %147 = arith.addf %141, %146 : vector<1x128xf32>
    %148 = vector.extract_strided_slice %20 {offsets = [21, 0], sizes = [1, 128], strides = [1, 1]} : vector<25x128xf32> to vector<1x128xf32>
    %149 = arith.truncf %148 : vector<1x128xf32> to vector<1x128xbf16>
    %c21 = arith.constant 21 : index
    %c0_88 = arith.constant 0 : index
    %c0_89 = arith.constant 0 : index
    %150 = vector.load %arg4[%c21, %c0_88, %c0_89] : memref<25x128x128xbf16, #tpu.memory_space<vmem>>, vector<1x128x128xbf16>
    %151 = vector.shape_cast %150 : vector<1x128x128xbf16> to vector<128x128xbf16>
    %cst_90 = arith.constant dense<0.000000e+00> : vector<1x128xf32>
    %152 = tpu.matmul %149, %151, %cst_90 {dimension_numbers = #tpu.dot_dimension_numbers<[1], [0], [0], [1], [0, 0, 1, 1], [], []>} : vector<1x128xbf16>, vector<128x128xbf16>, vector<1x128xf32> -> vector<1x128xf32>
    %153 = arith.addf %147, %152 : vector<1x128xf32>
    %154 = vector.extract_strided_slice %20 {offsets = [22, 0], sizes = [1, 128], strides = [1, 1]} : vector<25x128xf32> to vector<1x128xf32>
    %155 = arith.truncf %154 : vector<1x128xf32> to vector<1x128xbf16>
    %c22 = arith.constant 22 : index
    %c0_91 = arith.constant 0 : index
    %c0_92 = arith.constant 0 : index
    %156 = vector.load %arg4[%c22, %c0_91, %c0_92] : memref<25x128x128xbf16, #tpu.memory_space<vmem>>, vector<1x128x128xbf16>
    %157 = vector.shape_cast %156 : vector<1x128x128xbf16> to vector<128x128xbf16>
    %cst_93 = arith.constant dense<0.000000e+00> : vector<1x128xf32>
    %158 = tpu.matmul %155, %157, %cst_93 {dimension_numbers = #tpu.dot_dimension_numbers<[1], [0], [0], [1], [0, 0, 1, 1], [], []>} : vector<1x128xbf16>, vector<128x128xbf16>, vector<1x128xf32> -> vector<1x128xf32>
    %159 = arith.addf %153, %158 : vector<1x128xf32>
    %160 = vector.extract_strided_slice %20 {offsets = [23, 0], sizes = [1, 128], strides = [1, 1]} : vector<25x128xf32> to vector<1x128xf32>
    %161 = arith.truncf %160 : vector<1x128xf32> to vector<1x128xbf16>
    %c23 = arith.constant 23 : index
    %c0_94 = arith.constant 0 : index
    %c0_95 = arith.constant 0 : index
    %162 = vector.load %arg4[%c23, %c0_94, %c0_95] : memref<25x128x128xbf16, #tpu.memory_space<vmem>>, vector<1x128x128xbf16>
    %163 = vector.shape_cast %162 : vector<1x128x128xbf16> to vector<128x128xbf16>
    %cst_96 = arith.constant dense<0.000000e+00> : vector<1x128xf32>
    %164 = tpu.matmul %161, %163, %cst_96 {dimension_numbers = #tpu.dot_dimension_numbers<[1], [0], [0], [1], [0, 0, 1, 1], [], []>} : vector<1x128xbf16>, vector<128x128xbf16>, vector<1x128xf32> -> vector<1x128xf32>
    %165 = arith.addf %159, %164 : vector<1x128xf32>
    %166 = vector.extract_strided_slice %20 {offsets = [24, 0], sizes = [1, 128], strides = [1, 1]} : vector<25x128xf32> to vector<1x128xf32>
    %167 = arith.truncf %166 : vector<1x128xf32> to vector<1x128xbf16>
    %c24 = arith.constant 24 : index
    %c0_97 = arith.constant 0 : index
    %c0_98 = arith.constant 0 : index
    %168 = vector.load %arg4[%c24, %c0_97, %c0_98] : memref<25x128x128xbf16, #tpu.memory_space<vmem>>, vector<1x128x128xbf16>
    %169 = vector.shape_cast %168 : vector<1x128x128xbf16> to vector<128x128xbf16>
    %cst_99 = arith.constant dense<0.000000e+00> : vector<1x128xf32>
    %170 = tpu.matmul %167, %169, %cst_99 {dimension_numbers = #tpu.dot_dimension_numbers<[1], [0], [0], [1], [0, 0, 1, 1], [], []>} : vector<1x128xbf16>, vector<128x128xbf16>, vector<1x128xf32> -> vector<1x128xf32>
    %171 = arith.addf %165, %170 : vector<1x128xf32>
    %c0_100 = arith.constant 0 : index
    %c0_101 = arith.constant 0 : index
    %172 = vector.load %arg5[%c0_100, %c0_101] : memref<1x128xf32, #tpu.memory_space<vmem>>, vector<1x128xf32>
    %173 = arith.addf %171, %172 : vector<1x128xf32>
    %cst_102 = arith.constant 0.000000e+00 : f32
    %174 = vector.broadcast %cst_102 : f32 to vector<1x128xf32>
    %175 = arith.maximumf %173, %174 : vector<1x128xf32>
    %176 = arith.truncf %175 : vector<1x128xf32> to vector<1x128xbf16>
    %c0_103 = arith.constant 0 : index
    %c0_104 = arith.constant 0 : index
    %177 = vector.load %arg6[%c0_103, %c0_104] : memref<128x128xbf16, #tpu.memory_space<vmem>>, vector<128x128xbf16>
    %cst_105 = arith.constant dense<0.000000e+00> : vector<1x128xf32>
    %178 = tpu.matmul %176, %177, %cst_105 {dimension_numbers = #tpu.dot_dimension_numbers<[1], [0], [0], [1], [0, 0, 1, 1], [], []>} : vector<1x128xbf16>, vector<128x128xbf16>, vector<1x128xf32> -> vector<1x128xf32>
    %c0_106 = arith.constant 0 : index
    %c0_107 = arith.constant 0 : index
    %179 = vector.load %arg7[%c0_106, %c0_107] : memref<1x128xf32, #tpu.memory_space<vmem>>, vector<1x128xf32>
    %180 = arith.addf %178, %179 : vector<1x128xf32>
    %cst_108 = arith.constant 0.000000e+00 : f32
    %181 = vector.broadcast %cst_108 : f32 to vector<1x128xf32>
    %182 = arith.maximumf %180, %181 : vector<1x128xf32>
    %183 = arith.truncf %182 : vector<1x128xf32> to vector<1x128xbf16>
    %c0_109 = arith.constant 0 : index
    %c0_110 = arith.constant 0 : index
    %184 = vector.load %arg8[%c0_109, %c0_110] : memref<128x128xbf16, #tpu.memory_space<vmem>>, vector<128x128xbf16>
    %cst_111 = arith.constant dense<0.000000e+00> : vector<1x128xf32>
    %185 = tpu.matmul %183, %184, %cst_111 {dimension_numbers = #tpu.dot_dimension_numbers<[1], [0], [0], [1], [0, 0, 1, 1], [], []>} : vector<1x128xbf16>, vector<128x128xbf16>, vector<1x128xf32> -> vector<1x128xf32>
    %c0_112 = arith.constant 0 : index
    %c0_113 = arith.constant 0 : index
    %186 = vector.load %arg9[%c0_112, %c0_113] : memref<1x128xf32, #tpu.memory_space<vmem>>, vector<1x128xf32>
    %187 = arith.addf %185, %186 : vector<1x128xf32>
    %c0_114 = arith.constant 0 : index
    %c0_115 = arith.constant 0 : index
    %c0_116 = arith.constant 0 : index
    %188 = vector.load %arg10[%c0_114, %c0_115, %c0_116] : memref<1x1x128xf32, #tpu.memory_space<vmem>>, vector<1x1x128xf32>
    %189 = vector.shape_cast %188 : vector<1x1x128xf32> to vector<1x128xf32>
    %190 = vector.shape_cast %187 : vector<1x128xf32> to vector<1x1x128xf32>
    tpu.vector_store %arg10[%c0_114, %c0_115, %c0_116], %190 {strides = array<i32>} : memref<1x1x128xf32, #tpu.memory_space<vmem>>, vector<1x1x128xf32>,
    return
  }
  func.func @transform_0(%arg0: i32) -> (i32, i32, i32, i32) {
    %c0_i32 = arith.constant 0 : i32
    %c0_i32_0 = arith.constant 0 : i32
    %c0_i32_1 = arith.constant 0 : i32
    %c0_i32_2 = arith.constant 0 : i32
    return %arg0, %c0_i32, %c0_i32_0, %c0_i32_1 : i32, i32, i32, i32
  }
  func.func @transform_1(%arg0: i32) -> (i32, i32) {
    %c0_i32 = arith.constant 0 : i32
    %c0_i32_0 = arith.constant 0 : i32
    %c0_i32_1 = arith.constant 0 : i32
    return %c0_i32, %c0_i32_0 : i32, i32
  }
  func.func @transform_2(%arg0: i32) -> (i32, i32) {
    %c0_i32 = arith.constant 0 : i32
    %c0_i32_0 = arith.constant 0 : i32
    %c0_i32_1 = arith.constant 0 : i32
    return %c0_i32, %c0_i32_0 : i32, i32
  }
  func.func @transform_3(%arg0: i32) -> (i32, i32, i32) {
    %c0_i32 = arith.constant 0 : i32
    %c0_i32_0 = arith.constant 0 : i32
    %c0_i32_1 = arith.constant 0 : i32
    %c0_i32_2 = arith.constant 0 : i32
    return %c0_i32, %c0_i32_0, %c0_i32_1 : i32, i32, i32
  }
  func.func @transform_4(%arg0: i32) -> (i32, i32) {
    %c0_i32 = arith.constant 0 : i32
    %c0_i32_0 = arith.constant 0 : i32
    %c0_i32_1 = arith.constant 0 : i32
    return %c0_i32, %c0_i32_0 : i32, i32
  }
  func.func @transform_5(%arg0: i32) -> (i32, i32) {
    %c0_i32 = arith.constant 0 : i32
    %c0_i32_0 = arith.constant 0 : i32
    %c0_i32_1 = arith.constant 0 : i32
    return %c0_i32, %c0_i32_0 : i32, i32
  }
  func.func @transform_6(%arg0: i32) -> (i32, i32) {
    %c0_i32 = arith.constant 0 : i32
    %c0_i32_0 = arith.constant 0 : i32
    %c0_i32_1 = arith.constant 0 : i32
    return %c0_i32, %c0_i32_0 : i32, i32
  }
  func.func @transform_7(%arg0: i32) -> (i32, i32) {
    %c0_i32 = arith.constant 0 : i32
    %c0_i32_0 = arith.constant 0 : i32
    %c0_i32_1 = arith.constant 0 : i32
    return %c0_i32, %c0_i32_0 : i32, i32
  }
  func.func @transform_8(%arg0: i32) -> (i32, i32) {
    %c0_i32 = arith.constant 0 : i32
    %c0_i32_0 = arith.constant 0 : i32
    %c0_i32_1 = arith.constant 0 : i32
    return %c0_i32, %c0_i32_0 : i32, i32
  }
  func.func @transform_9(%arg0: i32) -> (i32, i32, i32) {
    %c0_i32 = arith.constant 0 : i32
    %c0_i32_0 = arith.constant 0 : i32
    %c0_i32_1 = arith.constant 0 : i32
    return %arg0, %c0_i32, %c0_i32_0 : i32, i32, i32
  }
}

</mosaic_0001>

<bundles_post_ra>
// kernel: net_forward.2
= control target key start
LH: loop header
LB: loop body
LE: loop exit
PB: predicated region body
PF: predicated region fallthrough
CT: control target
= control target key end

     0   :  { %s2246_s12 = smov 0   ;;  %s2818_s0 = inlined_call_operand.vmem [shape: bf16[2,4,196,80], index: 0, kind: input, shape index: {}]   ;;  %s2819_s1 = inlined_call_operand.vmem [shape: bf16[80,128], index: 1, kind: input, shape index: {}]   ;;  %s2820_s2 = inlined_call_operand.vmem [shape: f32[1,128], index: 2, kind: input, shape index: {}]   ;;  %s2821_s3 = inlined_call_operand.vmem [shape: bf16[2,196,8], index: 3, kind: output, shape index: {}]  }
   0x1 LB: > { %s1583_s13 = sadd.s32 4294967295, %s2222_s12   ;;  %p1587_p0 = scmp.ge.s32.totalorder %s2222_s12, 1  ;;  %s2222_s12 = sphi %s2246_s12, %s13_s12  }
   0x2   : > { %p137_p1 = scmp.lt.s32.totalorder %s2222_s12, 3 }
   0x4   : > { %p138_p2 = pnand %p1587_p0, %p137_p1 }
   0x5   : > { %v2159_v0 = vld [vmem:[%s2819_s1] sm:$0xff] (!%p138_p2)   ;;  %v2224_v1 = vmov (!%p138_p2), 0.0   ;;  %v2160_v2 = vld [vmem:[%s2819_s1 + $0x8] sm:$0xff] (!%p138_p2)   ;;  %p161_p3 = scmp.lt.s32.totalorder (!%p138_p2), %s1583_s13, 1  ;;  %vm2225_vm0 = vmmov (!%p138_p2), 0   ;;  %v2161_v3 = vld [vmem:[%s2819_s1 + $0x10] sm:$0xff] (!%p138_p2)  }
   0x6   : > { %141 = sbr.rel (%p138_p2) target bundleno = 449 (0x1c1), region = 32  ;;  %1899 = vmatprep.subr.bf16.mxu0 (!%p138_p2), %v2224_v1  ;;  %1961 = vmatprep.subr.bf16.mxu1 (!%p138_p2), %v2224_v1  ;;  %v2162_v4 = vld [vmem:[%s2819_s1 + $0x18] sm:$0xff] (!%p138_p2)   ;;  %v2163_v5 = vld [vmem:[%s2819_s1 + $0x20] sm:$0xff] (!%p138_p2)   ;;  %vm301_vm1 = vcmask (!%p138_p2), 654336   ;;  %vm1501_vm2 = vcmask (!%p138_p2), 60416   ;;  %vm1526_vm3 = vcmask (!%p138_p2), 58368  }
   0x7   : > { %1900 = vmatpush3.bf16.msra.mxu0 (!%p138_p2), %v2159_v0  ;;  %1962 = vmatpush3.bf16.msra.mxu1 (!%p138_p2), %v2159_v0 }
   0x8   : > { %1901 = vmatprep.subr.bf16.mxu0 (!%p138_p2), %v2224_v1  ;;  %1963 = vmatprep.subr.bf16.mxu1 (!%p138_p2), %v2224_v1 }
   0x9   : > { %1909 = vmatprep.mubr.msk.bf16.mxu0 (!%p138_p2), %vm2225_vm0, %v2224_v1  ;;  %1971 = vmatprep.mubr.msk.bf16.mxu1 (!%p138_p2), %vm2225_vm0, %v2224_v1 }
   0xb   : > { %1902 = vmatpush3.bf16.msra.mxu0 (!%p138_p2), %v2160_v2  ;;  %1964 = vmatpush3.bf16.msra.mxu1 (!%p138_p2), %v2160_v2 }
   0xc   : > { %1903 = vmatprep.subr.bf16.mxu0 (!%p138_p2), %v2224_v1  ;;  %1965 = vmatprep.subr.bf16.mxu1 (!%p138_p2), %v2224_v1 }
   0xd   : > { %s2847_s13 = smov (!%p161_p3, %s1583_s13), 1 }
   0xe   : > { %s2147_s20 = smul.u32 400, %s2847_s13 }
   0xf   : > { %1904 = vmatpush3.bf16.msra.mxu0 %v2161_v3  ;;  %1966 = vmatpush3.bf16.msra.mxu1 %v2161_v3  ;;  %s2148_s30 = smul.u32 100, %s2847_s13 }
  0x10   : > { %s2279_s23 = scalar_lea.vmem %s2818_s0, %s2147_s20  ;;  %1905 = vmatprep.subr.bf16.mxu0 %v2224_v1  ;;  %1967 = vmatprep.subr.bf16.mxu1 %v2224_v1 }
  0x11   : > { %v2164_v6 = vld [vmem:[%s2279_s23] sm:$0xff]   ;;  %v2166_v8 = vld [vmem:[%s2279_s23 + $0x8] sm:$0xff]   ;;  %v2168_v10 = vld [vmem:[%s2279_s23 + $0x10] sm:$0xff]   ;;  %s2672_s6 = scalar_lea.vmem %s2821_s3, %s2148_s30 }
  0x12   : > { %v2165_v7 = vld [vmem:[%s2279_s23 + $0x64] sm:$0xff]   ;;  %v2167_v9 = vld [vmem:[%s2279_s23 + $0x6c] sm:$0xff]   ;;  %v2169_v11 = vld [vmem:[%s2279_s23 + $0x74] sm:$0xff]  }
  0x13   : > { %1906 = vmatpush3.bf16.msra.mxu0 %v2162_v4  ;;  %1968 = vmatpush3.bf16.msra.mxu1 %v2162_v4  ;;  %v2170_v12 = vld [vmem:[%s2279_s23 + $0x18] sm:$0xff]   ;;  %v2172_v14 = vld [vmem:[%s2279_s23 + $0x20] sm:$0xff]   ;;  %v2174_v16 = vld [vmem:[%s2279_s23 + $0x28] sm:$0xff]  }
  0x14   : > { %1907 = vmatprep.subr.bf16.mxu0 %v2224_v1  ;;  %1969 = vmatprep.subr.bf16.mxu1 %v2224_v1  ;;  %v2171_v13 = vld [vmem:[%s2279_s23 + $0x7c] sm:$0xff]   ;;  %v2173_v15 = vld [vmem:[%s2279_s23 + $0x84] sm:$0xff]   ;;  %v2175_v17 = vld [vmem:[%s2279_s23 + $0x8c] sm:$0xff]  }
  0x15   : > { %v2176_v18 = vld [vmem:[%s2279_s23 + $0x30] sm:$0xff]   ;;  %v2178_v20 = vld [vmem:[%s2279_s23 + $0x38] sm:$0xff]   ;;  %v2180_v22 = vld [vmem:[%s2279_s23 + $0x40] sm:$0xff]  }
  0x16   : > { %v2177_v19 = vld [vmem:[%s2279_s23 + $0x94] sm:$0xff]   ;;  %v2179_v21 = vld [vmem:[%s2279_s23 + $0x9c] sm:$0xff]   ;;  %v2181_v23 = vld [vmem:[%s2279_s23 + $0xa4] sm:$0xff]  }
  0x17   : > { %1908 = vmatpush3.bf16.msra.mxu0 %v2163_v5  ;;  %1970 = vmatpush3.bf16.msra.mxu1 %v2163_v5  ;;  %v2182_v24 = vld [vmem:[%s2279_s23 + $0x48] sm:$0xff]   ;;  %v2184_v26 = vld [vmem:[%s2279_s23 + $0x50] sm:$0xff]   ;;  %v2186_v28 = vld [vmem:[%s2279_s23 + $0x58] sm:$0xff]  }
  0x18   : > { %2023 = vmatprep.subr.bf16.mxu0 %v2224_v1  ;;  %2085 = vmatprep.subr.bf16.mxu1 %v2224_v1  ;;  %v2183_v25 = vld [vmem:[%s2279_s23 + $0xac] sm:$0xff]   ;;  %v2185_v27 = vld [vmem:[%s2279_s23 + $0xb4] sm:$0xff]   ;;  %v2187_v29 = vld [vmem:[%s2279_s23 + $0xbc] sm:$0xff]  }
  0x19   : > { %v2188_v30 = vld [vmem:[%s2279_s23 + $0x60] ss:$0 sps:$4 sm:$0x33]   ;;  %v2189_v31 = vld [vmem:[%s2279_s23 + $0xc4] ss:$0 sps:$4 sm:$0x33]  }
  0x1a   : > { %1910 = vmatmul.mubr.msk.bf16.vlgmr.msra.gmra.mrb[0].mxu0 %vm301_vm1, %v2164_v6  ;;  %1972 = vmatmul.mubr.msk.bf16.vlgmr.msra.gmra.mrb[0].mxu1 %vm301_vm1, %v2165_v7  ;;  %v2190_v32 = vld [vmem:[%s2279_s23 + $0xc8] sm:$0xff]   ;;  %v2192_v34 = vld [vmem:[%s2279_s23 + $0xd0] sm:$0xff]   ;;  %v2194_v36 = vld [vmem:[%s2279_s23 + $0xd8] sm:$0xff]  }
  0x1b   : > { %2024 = vmatpush3.bf16.msra.mxu0 %v2159_v0  ;;  %2086 = vmatpush3.bf16.msra.mxu1 %v2159_v0  ;;  %v2191_v33 = vld [vmem:[%s2279_s23 + $0x12c] sm:$0xff]   ;;  %v2193_v35 = vld [vmem:[%s2279_s23 + $0x134] sm:$0xff]   ;;  %v2195_v37 = vld [vmem:[%s2279_s23 + $0x13c] sm:$0xff]  }
  0x1c   : > { %1913 = vmatprep.mubr.msk.bf16.mxu0 %vm2225_vm0, %v2224_v1  ;;  %1975 = vmatprep.mubr.msk.bf16.mxu1 %vm2225_vm0, %v2224_v1  ;;  %v2196_v38 = vld [vmem:[%s2279_s23 + $0xe0] sm:$0xff]   ;;  %v2198_v40 = vld [vmem:[%s2279_s23 + $0xe8] sm:$0xff]   ;;  %v2200_v42 = vld [vmem:[%s2279_s23 + $0xf0] sm:$0xff]  }
  0x1d   : > { %2025 = vmatprep.subr.bf16.mxu0 %v2224_v1  ;;  %2087 = vmatprep.subr.bf16.mxu1 %v2224_v1  ;;  %v2197_v39 = vld [vmem:[%s2279_s23 + $0x144] sm:$0xff]   ;;  %v2199_v41 = vld [vmem:[%s2279_s23 + $0x14c] sm:$0xff]   ;;  %v2201_v43 = vld [vmem:[%s2279_s23 + $0x154] sm:$0xff]  }
  0x1e   : > { %v2202_v44 = vld [vmem:[%s2279_s23 + $0xf8] sm:$0xff]   ;;  %v2204_v46 = vld [vmem:[%s2279_s23 + $0x100] sm:$0xff]   ;;  %v2206_v48 = vld [vmem:[%s2279_s23 + $0x108] sm:$0xff]  }
  0x1f   : > { %2026 = vmatpush3.bf16.msra.mxu0 %v2160_v2  ;;  %2088 = vmatpush3.bf16.msra.mxu1 %v2160_v2  ;;  %v2203_v45 = vld [vmem:[%s2279_s23 + $0x15c] sm:$0xff]   ;;  %v2205_v47 = vld [vmem:[%s2279_s23 + $0x164] sm:$0xff]   ;;  %v2207_v49 = vld [vmem:[%s2279_s23 + $0x16c] sm:$0xff]  }
  0x20   : > { %2027 = vmatprep.subr.bf16.mxu0 %v2224_v1  ;;  %2089 = vmatprep.subr.bf16.mxu1 %v2224_v1  ;;  %v2208_v50 = vld [vmem:[%s2279_s23 + $0x110] sm:$0xff]   ;;  %v2210_v52 = vld [vmem:[%s2279_s23 + $0x118] sm:$0xff]   ;;  %v2212_v54 = vld [vmem:[%s2279_s23 + $0x120] sm:$0xff]  }
  0x21   : > { %v2209_v51 = vld [vmem:[%s2279_s23 + $0x174] sm:$0xff]   ;;  %v2211_v53 = vld [vmem:[%s2279_s23 + $0x17c] sm:$0xff]   ;;  %v2213_v55 = vld [vmem:[%s2279_s23 + $0x184] sm:$0xff]  }
  0x22   : > { %1914 = vmatmul.mubr.msk.bf16.gmra.mrb[4].mxu0 %vm301_vm1, %v2166_v8  ;;  %1976 = vmatmul.mubr.msk.bf16.gmra.mrb[4].mxu1 %vm301_vm1, %v2167_v9  ;;  %v2214_v56 = vld [vmem:[%s2279_s23 + $0x128] ss:$0 sps:$4 sm:$0x33]   ;;  %v2215_v57 = vld [vmem:[%s2279_s23 + $0x18c] ss:$0 sps:$4 sm:$0x33]  }
  0x23   : > { %1917 = vmatprep.mubr.msk.bf16.mxu0 %vm2225_vm0, %v2224_v1  ;;  %1979 = vmatprep.mubr.msk.bf16.mxu1 %vm2225_vm0, %v2224_v1 }
  0x24   : > { %2028 = vmatpush3.bf16.msra.mxu0 %v2161_v3  ;;  %2090 = vmatpush3.bf16.msra.mxu1 %v2161_v3 }
  0x25   : > { %2029 = vmatprep.subr.bf16.mxu0 %v2224_v1  ;;  %2091 = vmatprep.subr.bf16.mxu1 %v2224_v1 }
  0x28   : > { %2030 = vmatpush3.bf16.msra.mxu0 %v2162_v4  ;;  %2092 = vmatpush3.bf16.msra.mxu1 %v2162_v4 }
  0x29   : > { %2031 = vmatprep.subr.bf16.mxu0 %v2224_v1  ;;  %2093 = vmatprep.subr.bf16.mxu1 %v2224_v1 }
  0x2a   : > { %1918 = vmatmul.mubr.msk.bf16.gmra.mrb[8].mxu0 %vm301_vm1, %v2168_v10  ;;  %1980 = vmatmul.mubr.msk.bf16.gmra.mrb[8].mxu1 %vm301_vm1, %v2169_v11 }
  0x2b   : > { %1921 = vmatprep.mubr.msk.bf16.mxu0 %vm2225_vm0, %v2224_v1  ;;  %1983 = vmatprep.mubr.msk.bf16.mxu1 %vm2225_vm0, %v2224_v1 }
  0x2c   : > { %2032 = vmatpush3.bf16.msra.mxu0 %v2163_v5  ;;  %2094 = vmatpush3.bf16.msra.mxu1 %v2163_v5 }
  0x32   : > { %1922 = vmatmul.mubr.msk.bf16.gmra.mrb[12].mxu0 %vm301_vm1, %v2170_v12  ;;  %1984 = vmatmul.mubr.msk.bf16.gmra.mrb[12].mxu1 %vm301_vm1, %v2171_v13 }
  0x33   : > { %1925 = vmatprep.mubr.msk.bf16.mxu0 %vm2225_vm0, %v2224_v1  ;;  %1987 = vmatprep.mubr.msk.bf16.mxu1 %vm2225_vm0, %v2224_v1 }
  0x3a   : > { %1926 = vmatmul.mubr.msk.bf16.gmra.mrb[16].mxu0 %vm301_vm1, %v2172_v14  ;;  %1988 = vmatmul.mubr.msk.bf16.gmra.mrb[16].mxu1 %vm301_vm1, %v2173_v15 }
  0x3b   : > { %1929 = vmatprep.mubr.msk.bf16.mxu0 %vm2225_vm0, %v2224_v1  ;;  %1991 = vmatprep.mubr.msk.bf16.mxu1 %vm2225_vm0, %v2224_v1 }
  0x42   : > { %1930 = vmatmul.mubr.msk.bf16.gmra.mrb[20].mxu0 %vm301_vm1, %v2174_v16  ;;  %1992 = vmatmul.mubr.msk.bf16.gmra.mrb[20].mxu1 %vm301_vm1, %v2175_v17 }
  0x43   : > { %1933 = vmatprep.mubr.msk.bf16.mxu0 %vm2225_vm0, %v2224_v1  ;;  %1995 = vmatprep.mubr.msk.bf16.mxu1 %vm2225_vm0, %v2224_v1 }
  0x4a   : > { %1934 = vmatmul.mubr.msk.bf16.gmra.mrb[24].mxu0 %vm301_vm1, %v2176_v18  ;;  %1996 = vmatmul.mubr.msk.bf16.gmra.mrb[24].mxu1 %vm301_vm1, %v2177_v19 }
  0x4b   : > { %1937 = vmatprep.mubr.msk.bf16.mxu0 %vm2225_vm0, %v2224_v1  ;;  %1999 = vmatprep.mubr.msk.bf16.mxu1 %vm2225_vm0, %v2224_v1 }
  0x52   : > { %1938 = vmatmul.mubr.msk.bf16.gmra.mrb[28].mxu0 %vm301_vm1, %v2178_v20  ;;  %2000 = vmatmul.mubr.msk.bf16.gmra.mrb[28].mxu1 %vm301_vm1, %v2179_v21 }
  0x53   : > { %1941 = vmatprep.mubr.msk.bf16.mxu0 %vm2225_vm0, %v2224_v1  ;;  %2003 = vmatprep.mubr.msk.bf16.mxu1 %vm2225_vm0, %v2224_v1 }
  0x5a   : > { %1942 = vmatmul.mubr.msk.bf16.gmra.mrb[32].mxu0 %vm301_vm1, %v2180_v22  ;;  %2004 = vmatmul.mubr.msk.bf16.gmra.mrb[32].mxu1 %vm301_vm1, %v2181_v23 }
  0x5b   : > { %1945 = vmatprep.mubr.msk.bf16.mxu0 %vm2225_vm0, %v2224_v1  ;;  %2007 = vmatprep.mubr.msk.bf16.mxu1 %vm2225_vm0, %v2224_v1 }
  0x62   : > { %1946 = vmatmul.mubr.msk.bf16.gmra.mrb[36].mxu0 %vm301_vm1, %v2182_v24  ;;  %2008 = vmatmul.mubr.msk.bf16.gmra.mrb[36].mxu1 %vm301_vm1, %v2183_v25 }
  0x63   : > { %1949 = vmatprep.mubr.msk.bf16.mxu0 %vm2225_vm0, %v2224_v1  ;;  %2011 = vmatprep.mubr.msk.bf16.mxu1 %vm2225_vm0, %v2224_v1 }
  0x6a   : > { %1950 = vmatmul.mubr.msk.bf16.gmra.mrb[40].mxu0 %vm301_vm1, %v2184_v26  ;;  %2012 = vmatmul.mubr.msk.bf16.gmra.mrb[40].mxu1 %vm301_vm1, %v2185_v27 }
  0x6b   : > { %1953 = vmatprep.mubr.msk.bf16.mxu0 %vm2225_vm0, %v2224_v1  ;;  %2015 = vmatprep.mubr.msk.bf16.mxu1 %vm2225_vm0, %v2224_v1 }
  0x72   : > { %1954 = vmatmul.mubr.msk.bf16.gmra.mrb[44].mxu0 %vm301_vm1, %v2186_v28  ;;  %2016 = vmatmul.mubr.msk.bf16.gmra.mrb[44].mxu1 %vm301_vm1, %v2187_v29 }
  0x73   : > { %1957 = vmatprep.mubr.msk.bf16.mxu0 %vm2225_vm0, %v2224_v1  ;;  %2019 = vmatprep.mubr.msk.bf16.mxu1 %vm2225_vm0, %v2224_v1 }
  0x7a   : > { %1958 = vmatmul.mubr.msk.bf16.gmra.mrb[48].mxu0 %vm301_vm1, %v2188_v30  ;;  %2020 = vmatmul.mubr.msk.bf16.gmra.mrb[48].mxu1 %vm301_vm1, %v2189_v31 }
  0x7b   : > { %2033 = vmatprep.mubr.msk.bf16.mxu0 %vm2225_vm0, %v2224_v1  ;;  %2095 = vmatprep.mubr.msk.bf16.mxu1 %vm2225_vm0, %v2224_v1 }
  0x82   : > { %2034 = vmatmul.mubr.msk.bf16.vlgmr.msra.gmra.mrb[52].mxu0 %vm301_vm1, %v2190_v32  ;;  %2096 = vmatmul.mubr.msk.bf16.vlgmr.msra.gmra.mrb[52].mxu1 %vm301_vm1, %v2191_v33 }
  0x83   : > { %2037 = vmatprep.mubr.msk.bf16.mxu0 %vm2225_vm0, %v2224_v1  ;;  %2099 = vmatprep.mubr.msk.bf16.mxu1 %vm2225_vm0, %v2224_v1 }
  0x8a   : > { %2038 = vmatmul.mubr.msk.bf16.gmra.mrb[56].mxu0 %vm301_vm1, %v2192_v34  ;;  %2100 = vmatmul.mubr.msk.bf16.gmra.mrb[56].mxu1 %vm301_vm1, %v2193_v35 }
  0x8b   : > { %2041 = vmatprep.mubr.msk.bf16.mxu0 %vm2225_vm0, %v2224_v1  ;;  %2103 = vmatprep.mubr.msk.bf16.mxu1 %vm2225_vm0, %v2224_v1 }
  0x92   : > { %2042 = vmatmul.mubr.msk.bf16.gmra.mrb[60].mxu0 %vm301_vm1, %v2194_v36  ;;  %2104 = vmatmul.mubr.msk.bf16.gmra.mrb[60].mxu1 %vm301_vm1, %v2195_v37 }
  0x93   : > { %2045 = vmatprep.mubr.msk.bf16.mxu0 %vm2225_vm0, %v2224_v1  ;;  %2107 = vmatprep.mubr.msk.bf16.mxu1 %vm2225_vm0, %v2224_v1 }
  0x9a   : > { %2046 = vmatmul.mubr.msk.bf16.gmra.mrb[64].mxu0 %vm301_vm1, %v2196_v38  ;;  %2108 = vmatmul.mubr.msk.bf16.gmra.mrb[64].mxu1 %vm301_vm1, %v2197_v39 }
  0x9b   : > { %2049 = vmatprep.mubr.msk.bf16.mxu0 %vm2225_vm0, %v2224_v1  ;;  %2111 = vmatprep.mubr.msk.bf16.mxu1 %vm2225_vm0, %v2224_v1 }
  0xa2   : > { %2050 = vmatmul.mubr.msk.bf16.gmra.mrb[68].mxu0 %vm301_vm1, %v2198_v40  ;;  %2112 = vmatmul.mubr.msk.bf16.gmra.mrb[68].mxu1 %vm301_vm1, %v2199_v41 }
  0xa3   : > { %2053 = vmatprep.mubr.msk.bf16.mxu0 %vm2225_vm0, %v2224_v1  ;;  %2115 = vmatprep.mubr.msk.bf16.mxu1 %vm2225_vm0, %v2224_v1 }
  0xaa   : > { %2054 = vmatmul.mubr.msk.bf16.gmra.mrb[72].mxu0 %vm301_vm1, %v2200_v42  ;;  %2116 = vmatmul.mubr.msk.bf16.gmra.mrb[72].mxu1 %vm301_vm1, %v2201_v43 }
  0xab   : > { %2057 = vmatprep.mubr.msk.bf16.mxu0 %vm2225_vm0, %v2224_v1  ;;  %2119 = vmatprep.mubr.msk.bf16.mxu1 %vm2225_vm0, %v2224_v1 }
  0xb2   : > { %2058 = vmatmul.mubr.msk.bf16.gmra.mrb[76].mxu0 %vm301_vm1, %v2202_v44  ;;  %2120 = vmatmul.mubr.msk.bf16.gmra.mrb[76].mxu1 %vm301_vm1, %v2203_v45 }
  0xb3   : > { %2061 = vmatprep.mubr.msk.bf16.mxu0 %vm2225_vm0, %v2224_v1  ;;  %2123 = vmatprep.mubr.msk.bf16.mxu1 %vm2225_vm0, %v2224_v1 }
  0xba   : > { %2062 = vmatmul.mubr.msk.bf16.gmra.mrb[80].mxu0 %vm301_vm1, %v2204_v46  ;;  %2124 = vmatmul.mubr.msk.bf16.gmra.mrb[80].mxu1 %vm301_vm1, %v2205_v47 }
  0xbb   : > { %2065 = vmatprep.mubr.msk.bf16.mxu0 %vm2225_vm0, %v2224_v1  ;;  %2127 = vmatprep.mubr.msk.bf16.mxu1 %vm2225_vm0, %v2224_v1 }
  0xc2   : > { %2066 = vmatmul.mubr.msk.bf16.gmra.mrb[84].mxu0 %vm301_vm1, %v2206_v48  ;;  %2128 = vmatmul.mubr.msk.bf16.gmra.mrb[84].mxu1 %vm301_vm1, %v2207_v49 }
  0xc3   : > { %2069 = vmatprep.mubr.msk.bf16.mxu0 %vm2225_vm0, %v2224_v1  ;;  %2131 = vmatprep.mubr.msk.bf16.mxu1 %vm2225_vm0, %v2224_v1 }
  0xca   : > { %2070 = vmatmul.mubr.msk.bf16.gmra.mrb[88].mxu0 %vm301_vm1, %v2208_v50  ;;  %2132 = vmatmul.mubr.msk.bf16.gmra.mrb[88].mxu1 %vm301_vm1, %v2209_v51 }
  0xcb   : > { %2073 = vmatprep.mubr.msk.bf16.mxu0 %vm2225_vm0, %v2224_v1  ;;  %2135 = vmatprep.mubr.msk.bf16.mxu1 %vm2225_vm0, %v2224_v1 }
  0xd2   : > { %2074 = vmatmul.mubr.msk.bf16.gmra.mrb[92].mxu0 %vm301_vm1, %v2210_v52  ;;  %2136 = vmatmul.mubr.msk.bf16.gmra.mrb[92].mxu1 %vm301_vm1, %v2211_v53 }
  0xd3   : > { %2077 = vmatprep.mubr.msk.bf16.mxu0 %vm2225_vm0, %v2224_v1  ;;  %2139 = vmatprep.mubr.msk.bf16.mxu1 %vm2225_vm0, %v2224_v1 }
  0xda   : > { %2078 = vmatmul.mubr.msk.bf16.gmra.mrb[96].mxu0 %vm301_vm1, %v2212_v54  ;;  %2140 = vmatmul.mubr.msk.bf16.gmra.mrb[96].mxu1 %vm301_vm1, %v2213_v55 }
  0xdb   : > { %2081 = vmatprep.mubr.msk.bf16.mxu0 %vm2225_vm0, %v2224_v1  ;;  %2143 = vmatprep.mubr.msk.bf16.mxu1 %vm2225_vm0, %v2224_v1  ;;  %v2661_v1 = vld [vmem:[%s2820_s2] ss:$0 sm:$0xff] }
  0xe2   : > { %2082 = vmatmul.mubr.msk.bf16.gmra.mrb[100].mxu0 %vm301_vm1, %v2214_v56  ;;  %2144 = vmatmul.mubr.msk.bf16.gmra.mrb[100].mxu1 %vm301_vm1, %v2215_v57 }
  0xed   : > { %v2505_v58 = vpop.f32.mrb[0].mxu0  ;;  %v2507_v59 = vpop.f32.mrb[0].mxu1 }
  0xee   : > { %v741_v60 = vmax.f32 %v2505_v58, %v2507_v59  ;;  %v1911_v61 = vpop.f32.mrb[1].mxu0  ;;  %v1973_v62 = vpop.f32.mrb[1].mxu1 }
  0xef   : > { %v2511_v63 = vpop.f32.mrb[2].mxu0  ;;  %v2513_v0 = vpop.f32.mrb[2].mxu1 }
  0xf0   : > { %v1912_v2 = vpop.f32.mrb[3].mxu0  ;;  %v1974_v3 = vpop.f32.mrb[3].mxu1 }
  0xf5   : > { %v2517_v4 = vpop.f32.mrb[4].mxu0  ;;  %v2519_v5 = vpop.f32.mrb[4].mxu1 }
  0xf6   : > { %v1915_v7 = vpop.f32.mrb[5].mxu0  ;;  %v1977_v8 = vpop.f32.mrb[5].mxu1 }
  0xf7   : > { %v2523_v9 = vpop.f32.mrb[6].mxu0  ;;  %v2525_v10 = vpop.f32.mrb[6].mxu1 }
  0xf8   : > { %v1916_v12 = vpop.f32.mrb[7].mxu0  ;;  %v1978_v13 = vpop.f32.mrb[7].mxu1 }
  0xfd   : > { %v2529_v14 = vpop.f32.mrb[8].mxu0  ;;  %v2531_v15 = vpop.f32.mrb[8].mxu1 }
  0xfe   : > { %v1919_v17 = vpop.f32.mrb[9].mxu0  ;;  %v1981_v18 = vpop.f32.mrb[9].mxu1 }
  0xff   : > { %v2535_v19 = vpop.f32.mrb[10].mxu0  ;;  %v2537_v20 = vpop.f32.mrb[10].mxu1 }
 0x100   : > { %v1920_v22 = vpop.f32.mrb[11].mxu0  ;;  %v1982_v23 = vpop.f32.mrb[11].mxu1 }
 0x105   : > { %v2541_v24 = vpop.f32.mrb[12].mxu0  ;;  %v2543_v25 = vpop.f32.mrb[12].mxu1 }
 0x106   : > { %v1923_v27 = vpop.f32.mrb[13].mxu0  ;;  %v1985_v28 = vpop.f32.mrb[13].mxu1 }
 0x107   : > { %v2547_v29 = vpop.f32.mrb[14].mxu0  ;;  %v2549_v30 = vpop.f32.mrb[14].mxu1 }
 0x108   : > { %v1924_v32 = vpop.f32.mrb[15].mxu0  ;;  %v1986_v33 = vpop.f32.mrb[15].mxu1 }
 0x10d   : > { %v2553_v34 = vpop.f32.mrb[16].mxu0  ;;  %v2555_v35 = vpop.f32.mrb[16].mxu1 }
 0x10e   : > { %v1927_v37 = vpop.f32.mrb[17].mxu0  ;;  %v1989_v38 = vpop.f32.mrb[17].mxu1 }
 0x10f   : > { %v2559_v39 = vpop.f32.mrb[18].mxu0  ;;  %v2561_v40 = vpop.f32.mrb[18].mxu1 }
 0x110   : > { %v1928_v42 = vpop.f32.mrb[19].mxu0  ;;  %v1990_v43 = vpop.f32.mrb[19].mxu1 }
 0x115   : > { %v2565_v44 = vpop.f32.mrb[20].mxu0  ;;  %v2567_v45 = vpop.f32.mrb[20].mxu1 }
 0x116   : > { %v1931_v47 = vpop.f32.mrb[21].mxu0  ;;  %v1993_v48 = vpop.f32.mrb[21].mxu1 }
 0x117   : > { %v2571_v49 = vpop.f32.mrb[22].mxu0  ;;  %v2573_v50 = vpop.f32.mrb[22].mxu1 }
 0x118   : > { %v1932_v52 = vpop.f32.mrb[23].mxu0  ;;  %v1994_v53 = vpop.f32.mrb[23].mxu1 }
 0x11d   : > { %v2577_v54 = vpop.f32.mrb[24].mxu0  ;;  %v2579_v55 = vpop.f32.mrb[24].mxu1 }
 0x11e   : > { %v1935_v57 = vpop.f32.mrb[25].mxu0  ;;  %v1997_v61 = vpop.f32.mrb[25].mxu1 }
 0x11f   : > { %v2583_v62 = vpop.f32.mrb[26].mxu0  ;;  %v2585_v2 = vpop.f32.mrb[26].mxu1 }
 0x120   : > { %v1936_v7 = vpop.f32.mrb[27].mxu0  ;;  %v1998_v8 = vpop.f32.mrb[27].mxu1 }
 0x125   : > { %v2589_v12 = vpop.f32.mrb[28].mxu0  ;;  %v2591_v13 = vpop.f32.mrb[28].mxu1 }
 0x126   : > { %v1939_v18 = vpop.f32.mrb[29].mxu0  ;;  %v2001_v22 = vpop.f32.mrb[29].mxu1 }
 0x127   : > { %v2595_v23 = vpop.f32.mrb[30].mxu0  ;;  %v2597_v27 = vpop.f32.mrb[30].mxu1 }
 0x128   : > { %v1940_v32 = vpop.f32.mrb[31].mxu0  ;;  %v2002_v33 = vpop.f32.mrb[31].mxu1 }
 0x12d   : > { %v2601_v37 = vpop.f32.mrb[32].mxu0  ;;  %v2603_v38 = vpop.f32.mrb[32].mxu1 }
 0x12e   : > { %v1943_v43 = vpop.f32.mrb[33].mxu0  ;;  %v2005_v47 = vpop.f32.mrb[33].mxu1 }
 0x12f   : > { %v2607_v48 = vpop.f32.mrb[34].mxu0  ;;  %v2609_v52 = vpop.f32.mrb[34].mxu1 }
 0x130   : > { %v1944_v57 = vpop.f32.mrb[35].mxu0  ;;  %v2006_v61 = vpop.f32.mrb[35].mxu1 }
 0x135   : > { %v2613_v7 = vpop.f32.mrb[36].mxu0  ;;  %v2615_v8 = vpop.f32.mrb[36].mxu1 }
 0x136   : > { %v1947_v22 = vpop.f32.mrb[37].mxu0  ;;  %v2009_v32 = vpop.f32.mrb[37].mxu1 }
 0x137   : > { %v2619_v33 = vpop.f32.mrb[38].mxu0  ;;  %v2621_v43 = vpop.f32.mrb[38].mxu1 }
 0x138   : > { %v1948_v42 = vpop.f32.mrb[39].mxu0  ;;  %v2010_v53 = vpop.f32.mrb[39].mxu1 }
 0x13d   : > { %v2625_v57 = vpop.f32.mrb[40].mxu0  ;;  %v2627_v61 = vpop.f32.mrb[40].mxu1 }
 0x13e   : > { %v1951_v17 = vpop.f32.mrb[41].mxu0  ;;  %v2013_v18 = vpop.f32.mrb[41].mxu1 }
 0x13f   : > { %v2631_v22 = vpop.f32.mrb[42].mxu0  ;;  %v2633_v32 = vpop.f32.mrb[42].mxu1 }
 0x140   : > { %v1952_v56 = vpop.f32.mrb[43].mxu0  ;;  %v2014_v47 = vpop.f32.mrb[43].mxu1 }
 0x145   : > { %v2637_v42 = vpop.f32.mrb[44].mxu0  ;;  %v2639_v53 = vpop.f32.mrb[44].mxu1 }
 0x146   : > { %v1955_v46 = vpop.f32.mrb[45].mxu0  ;;  %v2017_v28 = vpop.f32.mrb[45].mxu1 }
 0x147   : > { %v2643_v17 = vpop.f32.mrb[46].mxu0  ;;  %v2645_v18 = vpop.f32.mrb[46].mxu1 }
 0x148   : > { %v1956_v36 = vpop.f32.mrb[47].mxu0  ;;  %v2018_v3 = vpop.f32.mrb[47].mxu1 }
 0x14d   : > { %v2649_v56 = vpop.f32.mrb[48].mxu0  ;;  %v2651_v47 = vpop.f32.mrb[48].mxu1 }
 0x14e   : > { %v1959_v26 = vpop.f32.mrb[49].mxu0  ;;  %v2021_v51 = vpop.f32.mrb[49].mxu1 }
 0x14f   : > { %v474_v46 = vpop.f32.mrb[50].mxu0  ;;  %v738_v28 = vpop.f32.mrb[50].mxu1 }
 0x150   : > { %v1960_v21 = vpop.f32.mrb[51].mxu0  ;;  %v2022_v16 = vpop.f32.mrb[51].mxu1 }
 0x151   : > { %v2822_v21 = vmax.f32 %v2511_v63, %v2513_v0 }
 0x155   : > { %v928_v11 = vpop.f32.mrb[52].mxu0  ;;  %v1217_v6 = vpop.f32.mrb[52].mxu1 }
 0x156   : > { %v1030_v36 = vmax.f32 %v741_v60, %v928_v11  ;;  %v2035_v3 = vpop.f32.mrb[53].mxu0  ;;  %v2097_v41 = vpop.f32.mrb[53].mxu1 }
 0x157   : > { %v931_v26 = vpop.f32.mrb[54].mxu0  ;;  %v1220_v51 = vpop.f32.mrb[54].mxu1 }
 0x158   : > { %v1319_v46 = vmax.f32 %v1030_v36, %v1217_v6  ;;  %v1031_v16 = vmax.f32 %v2822_v21, %v931_v26  ;;  %v2036_v28 = vpop.f32.mrb[55].mxu0  ;;  %v2098_v31 = vpop.f32.mrb[55].mxu1 }
 0x159   : > { %v2823_v31 = vmax.f32 %v2517_v4, %v2519_v5  ;;  %v2824_v28 = vmax.f32 %v2523_v9, %v2525_v10  ;;  %v2825_v9 = vmax.f32 %v2529_v14, %v2531_v15 }
 0x15a   : > { %v1350_v58 = vadd.f32 %v2661_v1, %v1319_v46  ;;  %v1320_v59 = vmax.f32 %v1031_v16, %v1220_v51 }
 0x15c   : > { %v1375_v60 = vmax.f32 %v1350_v58, 0.0  ;;  %v1351_v11 = vadd.f32 %v2661_v1, %v1320_v59 }
 0x15d   : > { %v936_v6 = vpop.f32.mrb[56].mxu0  ;;  %v1225_v63 = vpop.f32.mrb[56].mxu1 }
 0x15e   : > { %v1802_v0 = vpack.c.bf16 %v1375_v60, %v1375_v60  ;;  %v1376_v41 = vmax.f32 %v1351_v11, 0.0  ;;  %v1032_v36 = vmax.f32 %v2823_v31, %v936_v6  ;;  %v2039_v3 = vpop.f32.mrb[57].mxu0  ;;  %v2101_v26 = vpop.f32.mrb[57].mxu1 }
 0x15f   : > { %v939_v51 = vpop.f32.mrb[58].mxu0  ;;  %v1228_v46 = vpop.f32.mrb[58].mxu1 }
 0x160   : > { %1502 = vst.msk [vmem:[%s2672_s6] sm:$0xf] %vm1501_vm2, %v1802_v0  ;;  %v1803_v21 = vpack.c.bf16 %v1376_v41, %v1376_v41  ;;  %v1321_v16 = vmax.f32 %v1032_v36, %v1225_v63  ;;  %v1033_v58 = vmax.f32 %v2824_v28, %v939_v51  ;;  %v2040_v59 = vpop.f32.mrb[59].mxu0  ;;  %v2102_v60 = vpop.f32.mrb[59].mxu1 }
 0x162   : > { %1503 = vst.msk [vmem:[%s2672_s6 + $0x4] sm:$0xf] %vm1501_vm2, %v1803_v21  ;;  %v1352_v4 = vadd.f32 %v2661_v1, %v1321_v16  ;;  %v1322_v5 = vmax.f32 %v1033_v58, %v1228_v46  ;;  %v2826_v16 = vmax.f32 %v2535_v19, %v2537_v20  ;;  %v2827_v19 = vmax.f32 %v2541_v24, %v2543_v25 }
 0x164   : > { %v1377_v11 = vmax.f32 %v1352_v4, 0.0  ;;  %v1353_v6 = vadd.f32 %v2661_v1, %v1322_v5 }
 0x165   : > { %v944_v31 = vpop.f32.mrb[60].mxu0  ;;  %v1233_v0 = vpop.f32.mrb[60].mxu1 }
 0x166   : > { %v1804_v41 = vpack.c.bf16 %v1377_v11, %v1377_v11  ;;  %v1378_v63 = vmax.f32 %v1353_v6, 0.0  ;;  %v1034_v10 = vmax.f32 %v2825_v9, %v944_v31  ;;  %v2043_v36 = vpop.f32.mrb[61].mxu0  ;;  %v2105_v3 = vpop.f32.mrb[61].mxu1 }
 0x167   : > { %v947_v26 = vpop.f32.mrb[62].mxu0  ;;  %v1236_v51 = vpop.f32.mrb[62].mxu1  ;;  %v2828_v3 = vmax.f32 %v2547_v29, %v2549_v30  ;;  %v2829_v29 = vmax.f32 %v2553_v34, %v2555_v35 }
 0x168   : > { %1504 = vst.msk [vmem:[%s2672_s6 + $0x8] sm:$0xf] %vm1501_vm2, %v1804_v41  ;;  %v1805_v21 = vpack.c.bf16 %v1378_v63, %v1378_v63  ;;  %v1323_v46 = vmax.f32 %v1034_v10, %v1233_v0  ;;  %v1035_v28 = vmax.f32 %v2826_v16, %v947_v26  ;;  %v2044_v58 = vpop.f32.mrb[63].mxu0  ;;  %v2106_v59 = vpop.f32.mrb[63].mxu1 }
 0x16a   : > { %1505 = vst.msk [vmem:[%s2672_s6 + $0xc] sm:$0xf] %vm1501_vm2, %v1805_v21  ;;  %v1354_v14 = vadd.f32 %v2661_v1, %v1323_v46  ;;  %v1324_v15 = vmax.f32 %v1035_v28, %v1236_v51 }
 0x16c   : > { %v1379_v60 = vmax.f32 %v1354_v14, 0.0  ;;  %v1355_v4 = vadd.f32 %v2661_v1, %v1324_v15 }
 0x16d   : > { %v952_v5 = vpop.f32.mrb[64].mxu0  ;;  %v1241_v11 = vpop.f32.mrb[64].mxu1 }
 0x16e   : > { %v1806_v6 = vpack.c.bf16 %v1379_v60, %v1379_v60  ;;  %v1380_v31 = vmax.f32 %v1355_v4, 0.0  ;;  %v1036_v20 = vmax.f32 %v2827_v19, %v952_v5  ;;  %v2047_v0 = vpop.f32.mrb[65].mxu0  ;;  %v2109_v41 = vpop.f32.mrb[65].mxu1 }
 0x16f   : > { %v955_v63 = vpop.f32.mrb[66].mxu0  ;;  %v1244_v9 = vpop.f32.mrb[66].mxu1 }
 0x170   : > { %1506 = vst.msk [vmem:[%s2672_s6 + $0x10] sm:$0xf] %vm1501_vm2, %v1806_v6  ;;  %v1807_v10 = vpack.c.bf16 %v1380_v31, %v1380_v31  ;;  %v1325_v36 = vmax.f32 %v1036_v20, %v1241_v11  ;;  %v1037_v26 = vmax.f32 %v2828_v3, %v955_v63  ;;  %v2048_v51 = vpop.f32.mrb[67].mxu0  ;;  %v2110_v21 = vpop.f32.mrb[67].mxu1  ;;  %v2830_v31 = vmax.f32 %v2559_v39, %v2561_v40 }
 0x171   : > { %v2831_v39 = vmax.f32 %v2565_v44, %v2567_v45 }
 0x172   : > { %1507 = vst.msk [vmem:[%s2672_s6 + $0x14] sm:$0xf] %vm1501_vm2, %v1807_v10  ;;  %v1356_v24 = vadd.f32 %v2661_v1, %v1325_v36  ;;  %v1326_v25 = vmax.f32 %v1037_v26, %v1244_v9 }
 0x174   : > { %v1381_v46 = vmax.f32 %v1356_v24, 0.0  ;;  %v1357_v16 = vadd.f32 %v2661_v1, %v1326_v25 }
 0x175   : > { %v960_v28 = vpop.f32.mrb[68].mxu0  ;;  %v1249_v58 = vpop.f32.mrb[68].mxu1 }
 0x176   : > { %v1808_v59 = vpack.c.bf16 %v1381_v46, %v1381_v46  ;;  %v1382_v14 = vmax.f32 %v1357_v16, 0.0  ;;  %v1038_v30 = vmax.f32 %v2829_v29, %v960_v28  ;;  %v2051_v15 = vpop.f32.mrb[69].mxu0  ;;  %v2113_v60 = vpop.f32.mrb[69].mxu1  ;;  %v2832_v16 = vmax.f32 %v2571_v49, %v2573_v50 }
 0x177   : > { %v963_v4 = vpop.f32.mrb[70].mxu0  ;;  %v1252_v5 = vpop.f32.mrb[70].mxu1  ;;  %v2833_v49 = vmax.f32 %v2577_v54, %v2579_v55 }
 0x178   : > { %1508 = vst.msk [vmem:[%s2672_s6 + $0x18] sm:$0xf] %vm1501_vm2, %v1808_v59  ;;  %v1809_v11 = vpack.c.bf16 %v1382_v14, %v1382_v14  ;;  %v1327_v6 = vmax.f32 %v1038_v30, %v1249_v58  ;;  %v1039_v19 = vmax.f32 %v2830_v31, %v963_v4  ;;  %v2052_v20 = vpop.f32.mrb[71].mxu0  ;;  %v2114_v0 = vpop.f32.mrb[71].mxu1 }
 0x179   : > { %v2834_v0 = vmax.f32 %v2583_v62, %v2585_v2  ;;  %v2835_v62 = vmax.f32 %v2589_v12, %v2591_v13 }
 0x17a   : > { %1509 = vst.msk [vmem:[%s2672_s6 + $0x1c] sm:$0xf] %vm1501_vm2, %v1809_v11  ;;  %v1358_v34 = vadd.f32 %v2661_v1, %v1327_v6  ;;  %v1328_v35 = vmax.f32 %v1039_v19, %v1252_v5 }
 0x17c   : > { %v1383_v41 = vmax.f32 %v1358_v34, 0.0  ;;  %v1359_v63 = vadd.f32 %v2661_v1, %v1328_v35 }
 0x17d   : > { %v968_v9 = vpop.f32.mrb[72].mxu0  ;;  %v1257_v10 = vpop.f32.mrb[72].mxu1 }
 0x17e   : > { %v1810_v36 = vpack.c.bf16 %v1383_v41, %v1383_v41  ;;  %v1384_v3 = vmax.f32 %v1359_v63, 0.0  ;;  %v1040_v40 = vmax.f32 %v2831_v39, %v968_v9  ;;  %v2055_v26 = vpop.f32.mrb[73].mxu0  ;;  %v2117_v51 = vpop.f32.mrb[73].mxu1 }
 0x17f   : > { %v971_v21 = vpop.f32.mrb[74].mxu0  ;;  %v1260_v24 = vpop.f32.mrb[74].mxu1 }
 0x180   : > { %1510 = vst.msk [vmem:[%s2672_s6 + $0x20] sm:$0xf] %vm1501_vm2, %v1810_v36  ;;  %v1811_v25 = vpack.c.bf16 %v1384_v3, %v1384_v3  ;;  %v1329_v46 = vmax.f32 %v1040_v40, %v1257_v10  ;;  %v1041_v28 = vmax.f32 %v2832_v16, %v971_v21  ;;  %v2056_v58 = vpop.f32.mrb[75].mxu0  ;;  %v2118_v59 = vpop.f32.mrb[75].mxu1 }
 0x182   : > { %1511 = vst.msk [vmem:[%s2672_s6 + $0x24] sm:$0xf] %vm1501_vm2, %v1811_v25  ;;  %v1360_v44 = vadd.f32 %v2661_v1, %v1329_v46  ;;  %v1330_v45 = vmax.f32 %v1041_v28, %v1260_v24  ;;  %v2836_v46 = vmax.f32 %v2595_v23, %v2597_v27  ;;  %v2837_v23 = vmax.f32 %v2601_v37, %v2603_v38 }
 0x184   : > { %v1385_v14 = vmax.f32 %v1360_v44, 0.0  ;;  %v1361_v29 = vadd.f32 %v2661_v1, %v1330_v45 }
 0x185   : > { %v976_v30 = vpop.f32.mrb[76].mxu0  ;;  %v1265_v15 = vpop.f32.mrb[76].mxu1 }
 0x186   : > { %v1812_v60 = vpack.c.bf16 %v1385_v14, %v1385_v14  ;;  %v1386_v4 = vmax.f32 %v1361_v29, 0.0  ;;  %v1042_v50 = vmax.f32 %v2833_v49, %v976_v30  ;;  %v2059_v5 = vpop.f32.mrb[77].mxu0  ;;  %v2121_v11 = vpop.f32.mrb[77].mxu1 }
 0x187   : > { %v979_v6 = vpop.f32.mrb[78].mxu0  ;;  %v1268_v31 = vpop.f32.mrb[78].mxu1  ;;  %v2838_v11 = vmax.f32 %v2607_v48, %v2609_v52  ;;  %v2839_v48 = vmax.f32 %v2613_v7, %v2615_v8 }
 0x188   : > { %1512 = vst.msk [vmem:[%s2672_s6 + $0x28] sm:$0xf] %vm1501_vm2, %v1812_v60  ;;  %v1813_v19 = vpack.c.bf16 %v1386_v4, %v1386_v4  ;;  %v1331_v20 = vmax.f32 %v1042_v50, %v1265_v15  ;;  %v1043_v34 = vmax.f32 %v2834_v0, %v979_v6  ;;  %v2060_v35 = vpop.f32.mrb[79].mxu0  ;;  %v2122_v41 = vpop.f32.mrb[79].mxu1 }
 0x18a   : > { %1513 = vst.msk [vmem:[%s2672_s6 + $0x2c] sm:$0xf] %vm1501_vm2, %v1813_v19  ;;  %v1362_v54 = vadd.f32 %v2661_v1, %v1331_v20  ;;  %v1332_v55 = vmax.f32 %v1043_v34, %v1268_v31 }
 0x18c   : > { %v1387_v63 = vmax.f32 %v1362_v54, 0.0  ;;  %v1363_v9 = vadd.f32 %v2661_v1, %v1332_v55 }
 0x18d   : > { %v984_v10 = vpop.f32.mrb[80].mxu0  ;;  %v1273_v36 = vpop.f32.mrb[80].mxu1 }
 0x18e   : > { %v1814_v3 = vpack.c.bf16 %v1387_v63, %v1387_v63  ;;  %v1388_v39 = vmax.f32 %v1363_v9, 0.0  ;;  %v1044_v2 = vmax.f32 %v2835_v62, %v984_v10  ;;  %v2063_v40 = vpop.f32.mrb[81].mxu0  ;;  %v2125_v26 = vpop.f32.mrb[81].mxu1 }
 0x18f   : > { %v987_v51 = vpop.f32.mrb[82].mxu0  ;;  %v1276_v21 = vpop.f32.mrb[82].mxu1 }
 0x190   : > { %1514 = vst.msk [vmem:[%s2672_s6 + $0x30] sm:$0xf] %vm1501_vm2, %v1814_v3  ;;  %v1815_v24 = vpack.c.bf16 %v1388_v39, %v1388_v39  ;;  %v1333_v25 = vmax.f32 %v1044_v2, %v1273_v36  ;;  %v1045_v16 = vmax.f32 %v2836_v46, %v987_v51  ;;  %v2064_v28 = vpop.f32.mrb[83].mxu0  ;;  %v2126_v58 = vpop.f32.mrb[83].mxu1  ;;  %v2840_v39 = vmax.f32 %v2619_v33, %v2621_v43 }
 0x191   : > { %v2841_v33 = vmax.f32 %v2625_v57, %v2627_v61 }
 0x192   : > { %1515 = vst.msk [vmem:[%s2672_s6 + $0x34] sm:$0xf] %vm1501_vm2, %v1815_v24  ;;  %v1364_v12 = vadd.f32 %v2661_v1, %v1333_v25  ;;  %v1334_v13 = vmax.f32 %v1045_v16, %v1276_v21 }
 0x194   : > { %v1389_v59 = vmax.f32 %v1364_v12, 0.0  ;;  %v1365_v44 = vadd.f32 %v2661_v1, %v1334_v13 }
 0x195   : > { %v992_v45 = vpop.f32.mrb[84].mxu0  ;;  %v1281_v14 = vpop.f32.mrb[84].mxu1 }
 0x196   : > { %v1816_v29 = vpack.c.bf16 %v1389_v59, %v1389_v59  ;;  %v1390_v30 = vmax.f32 %v1365_v44, 0.0  ;;  %v1046_v27 = vmax.f32 %v2837_v23, %v992_v45  ;;  %v2067_v15 = vpop.f32.mrb[85].mxu0  ;;  %v2129_v60 = vpop.f32.mrb[85].mxu1  ;;  %v2842_v44 = vmax.f32 %v2631_v22, %v2633_v32 }
 0x197   : > { %v995_v4 = vpop.f32.mrb[86].mxu0  ;;  %v1284_v49 = vpop.f32.mrb[86].mxu1  ;;  %v2843_v22 = vmax.f32 %v2637_v42, %v2639_v53 }
 0x198   : > { %1516 = vst.msk [vmem:[%s2672_s6 + $0x38] sm:$0xf] %vm1501_vm2, %v1816_v29  ;;  %v1817_v50 = vpack.c.bf16 %v1390_v30, %v1390_v30  ;;  %v1335_v5 = vmax.f32 %v1046_v27, %v1281_v14  ;;  %v1047_v6 = vmax.f32 %v2838_v11, %v995_v4  ;;  %v2068_v31 = vpop.f32.mrb[87].mxu0  ;;  %v2130_v19 = vpop.f32.mrb[87].mxu1 }
 0x199   : > { %v2844_v19 = vmax.f32 %v2643_v17, %v2645_v18  ;;  %v2845_v17 = vmax.f32 %v2649_v56, %v2651_v47 }
 0x19a   : > { %1517 = vst.msk [vmem:[%s2672_s6 + $0x3c] sm:$0xf] %vm1501_vm2, %v1817_v50  ;;  %v1366_v37 = vadd.f32 %v2661_v1, %v1335_v5  ;;  %v1336_v38 = vmax.f32 %v1047_v6, %v1284_v49 }
 0x19c   : > { %v1391_v20 = vmax.f32 %v1366_v37, 0.0  ;;  %v1367_v0 = vadd.f32 %v2661_v1, %v1336_v38 }
 0x19d   : > { %v1000_v34 = vpop.f32.mrb[88].mxu0  ;;  %v1289_v35 = vpop.f32.mrb[88].mxu1 }
 0x19e   : > { %v1818_v41 = vpack.c.bf16 %v1391_v20, %v1391_v20  ;;  %v1392_v54 = vmax.f32 %v1367_v0, 0.0  ;;  %v1048_v52 = vmax.f32 %v2839_v48, %v1000_v34  ;;  %v2071_v55 = vpop.f32.mrb[89].mxu0  ;;  %v2133_v63 = vpop.f32.mrb[89].mxu1 }
 0x19f   : > { %v1003_v9 = vpop.f32.mrb[90].mxu0  ;;  %v1292_v10 = vpop.f32.mrb[90].mxu1 }
 0x1a0   : > { %1518 = vst.msk [vmem:[%s2672_s6 + $0x40] sm:$0xf] %vm1501_vm2, %v1818_v41  ;;  %v1819_v36 = vpack.c.bf16 %v1392_v54, %v1392_v54  ;;  %v1337_v3 = vmax.f32 %v1048_v52, %v1289_v35  ;;  %v1049_v62 = vmax.f32 %v2840_v39, %v1003_v9  ;;  %v2072_v2 = vpop.f32.mrb[91].mxu0  ;;  %v2134_v40 = vpop.f32.mrb[91].mxu1 }
 0x1a2   : > { %1519 = vst.msk [vmem:[%s2672_s6 + $0x44] sm:$0xf] %vm1501_vm2, %v1819_v36  ;;  %v1368_v7 = vadd.f32 %v2661_v1, %v1337_v3  ;;  %v1338_v8 = vmax.f32 %v1049_v62, %v1292_v10 }
 0x1a4   : > { %v1393_v26 = vmax.f32 %v1368_v7, 0.0  ;;  %v1369_v51 = vadd.f32 %v2661_v1, %v1338_v8 }
 0x1a5   : > { %v1008_v21 = vpop.f32.mrb[92].mxu0  ;;  %v1297_v24 = vpop.f32.mrb[92].mxu1 }
 0x1a6   : > { %v1820_v25 = vpack.c.bf16 %v1393_v26, %v1393_v26  ;;  %v1394_v46 = vmax.f32 %v1369_v51, 0.0  ;;  %v1050_v43 = vmax.f32 %v2841_v33, %v1008_v21  ;;  %v2075_v16 = vpop.f32.mrb[93].mxu0  ;;  %v2137_v28 = vpop.f32.mrb[93].mxu1 }
 0x1a7   : > { %v1011_v58 = vpop.f32.mrb[94].mxu0  ;;  %v1300_v12 = vpop.f32.mrb[94].mxu1 }
 0x1a8   : > { %1520 = vst.msk [vmem:[%s2672_s6 + $0x48] sm:$0xf] %vm1501_vm2, %v1820_v25  ;;  %v1821_v13 = vpack.c.bf16 %v1394_v46, %v1394_v46  ;;  %v1339_v59 = vmax.f32 %v1050_v43, %v1297_v24  ;;  %v1051_v45 = vmax.f32 %v2842_v44, %v1011_v58  ;;  %v2076_v14 = vpop.f32.mrb[95].mxu0  ;;  %v2138_v29 = vpop.f32.mrb[95].mxu1 }
 0x1aa   : > { %1521 = vst.msk [vmem:[%s2672_s6 + $0x4c] sm:$0xf] %vm1501_vm2, %v1821_v13  ;;  %v1370_v57 = vadd.f32 %v2661_v1, %v1339_v59  ;;  %v1340_v61 = vmax.f32 %v1051_v45, %v1300_v12 }
 0x1ac   : > { %v1395_v30 = vmax.f32 %v1370_v57, 0.0  ;;  %v1371_v23 = vadd.f32 %v2661_v1, %v1340_v61 }
 0x1ad   : > { %v1016_v27 = vpop.f32.mrb[96].mxu0  ;;  %v1305_v15 = vpop.f32.mrb[96].mxu1 }
 0x1ae   : > { %v1822_v60 = vpack.c.bf16 %v1395_v30, %v1395_v30  ;;  %v1396_v4 = vmax.f32 %v1371_v23, 0.0  ;;  %v1052_v32 = vmax.f32 %v2843_v22, %v1016_v27  ;;  %v2079_v49 = vpop.f32.mrb[97].mxu0  ;;  %v2141_v50 = vpop.f32.mrb[97].mxu1 }
 0x1af   : > { %v1019_v5 = vpop.f32.mrb[98].mxu0  ;;  %v1308_v11 = vpop.f32.mrb[98].mxu1 }
 0x1b0   : > { %1522 = vst.msk [vmem:[%s2672_s6 + $0x50] sm:$0xf] %vm1501_vm2, %v1822_v60  ;;  %v1823_v6 = vpack.c.bf16 %v1396_v4, %v1396_v4  ;;  %v1341_v31 = vmax.f32 %v1052_v32, %v1305_v15  ;;  %v1053_v37 = vmax.f32 %v2844_v19, %v1019_v5  ;;  %v2080_v38 = vpop.f32.mrb[99].mxu0  ;;  %v2142_v20 = vpop.f32.mrb[99].mxu1 }
 0x1b2   : > { %1523 = vst.msk [vmem:[%s2672_s6 + $0x54] sm:$0xf] %vm1501_vm2, %v1823_v6  ;;  %v1372_v42 = vadd.f32 %v2661_v1, %v1341_v31  ;;  %v1342_v53 = vmax.f32 %v1053_v37, %v1308_v11 }
 0x1b4   : > { %v1397_v0 = vmax.f32 %v1372_v42, 0.0  ;;  %v1373_v34 = vadd.f32 %v2661_v1, %v1342_v53 }
 0x1b5   : > { %v1024_v35 = vpop.f32.mrb[100].mxu0  ;;  %v1313_v41 = vpop.f32.mrb[100].mxu1 }
 0x1b6   : > { %v1824_v54 = vpack.c.bf16 %v1397_v0, %v1397_v0  ;;  %v1398_v48 = vmax.f32 %v1373_v34, 0.0  ;;  %v1054_v18 = vmax.f32 %v2845_v17, %v1024_v35  ;;  %v2083_v52 = vpop.f32.mrb[101].mxu0  ;;  %v2145_v55 = vpop.f32.mrb[101].mxu1 }
 0x1b7   : > { %v1027_v63 = vpop.f32.mrb[102].mxu0  ;;  %v1316_v9 = vpop.f32.mrb[102].mxu1 }
 0x1b8   : > { %1524 = vst.msk [vmem:[%s2672_s6 + $0x58] sm:$0xf] %vm1501_vm2, %v1824_v54  ;;  %v1825_v10 = vpack.c.bf16 %v1398_v48, %v1398_v48  ;;  %v1343_v36 = vmax.f32 %v1054_v18, %v1313_v41  ;;  %v2084_v3 = vpop.f32.mrb[103].mxu0  ;;  %v2146_v39 = vpop.f32.mrb[103].mxu1 }
 0x1ba   : > { %1525 = vst.msk [vmem:[%s2672_s6 + $0x5c] sm:$0xf] %vm1501_vm2, %v1825_v10  ;;  %v1374_v62 = vadd.f32 %v2661_v1, %v1343_v36 }
 0x1bc   : > { %v1399_v2 = vmax.f32 %v1374_v62, 0.0 }
 0x1be   : > { %v1826_v40 = vpack.c.bf16 %v1399_v2, %v1399_v2 }
 0x1c0   : > { %1527 = vst.msk [vmem:[%s2672_s6 + $0x60] sm:$0x3] %vm1526_vm3, %v1826_v40 }
 0x1c1 PF: > { %s13_s12 = sadd.s32 1, %s2222_s12  }
 0x1c2   : > { %p10_p4 = scmp.ge.s32.totalorder %s13_s12, 4  }
 0x1c4   :  { %12 = sbr.rel (!%p10_p4) target bundleno = 1 (0x1), region = 65 }

// kernel: net_forward.3
= control target key start
LH: loop header
LB: loop body
LE: loop exit
PB: predicated region body
PF: predicated region fallthrough
CT: control target
= control target key end

     0   :  { %14 = vsyncpa [#allocation3], 0  ;;  %s6818_s0 = inlined_call_operand.vmem [shape: bf16[2,4,25,160], index: 0, kind: input, shape index: {}]   ;;  %s6819_s1 = inlined_call_operand.vmem [shape: bf16[160,128], index: 1, kind: input, shape index: {}]   ;;  %s6820_s2 = inlined_call_operand.vmem [shape: f32[1,128], index: 2, kind: input, shape index: {}]   ;;  %s6821_s3 = inlined_call_operand.vmem [shape: bf16[25,128,128], index: 3, kind: input, shape index: {}]   ;;  %s6822_s4 = inlined_call_operand.vmem [shape: f32[1,128], index: 4, kind: input, shape index: {}]   ;;  %s6823_s5 = inlined_call_operand.vmem [shape: bf16[128,128], index: 5, kind: input, shape index: {}]   ;;  %s6824_s6 = inlined_call_operand.vmem [shape: f32[1,128], index: 6, kind: input, shape index: {}]   ;;  %s6825_s7 = inlined_call_operand.vmem [shape: bf16[128,128], index: 7, kind: input, shape index: {}]   ;;  %s6826_s8 = inlined_call_operand.vmem [shape: f32[1,128], index: 8, kind: input, shape index: {}]   ;;  %s6827_s9 = inlined_call_operand.hbm [shape: f32[2,1,128], index: 9, kind: output, shape index: {}]  }
   0x1   :  { %16 = vsyncpa [#allocation3 + $0x1], 0  ;;  %s5587_s30 = smov 0   ;;  %s5589_s10 = smov 0  }
   0x2   :  { %s5591_s11 = smov 0   ;;  %s5593_s12 = smov 0  }
   0x3 LB: > { %s5608_s13 = sadd.s32 4294967295, %s5531_s12   ;;  %s3737_s14 = sadd.s32 4294967294, %s5531_s12   ;;  %s5531_s12 = sphi %s5593_s12, %s6833_s12   ;;  %s5527_s11 = sphi %s5591_s11, %s6832_s11   ;;  %s5523_s10 = sphi %s5589_s10, %s6831_s10   ;;  %s5519_s30 = sphi %s5587_s30, %s6830_s30  }
   0x4   : > { %s5612_s15 = sadd.s32 1, %s5531_s12   ;;  %s223_s16 = sadd.s32 1, %s5527_s11 }
   0x5   : > { %s220_s17 = ssub.s32 %s5531_s12, %s5612_s15  ;;  %p233_p0 = scmp.ne.s32.totalorder %s5527_s11, %s5523_s10 }
   0x6   : > { %p221_p1 = scmp.eq.s32.totalorder %s220_s17, 0  ;;  %p234_p2 = scmp.eq.s32.totalorder %s5608_s13, 1 }
   0x7   : > { %p239_p3 = scmp.ne.s32.totalorder %s5523_s10, %s5519_s30  ;;  %p240_p4 = scmp.eq.s32.totalorder %s3737_s14, 1 }
   0x8   : > { %s5623_s18 = scalar_select %p221_p1, %s5527_s11, %s223_s16  }
   0x9   : > { %p5625_p5 = por %p234_p2, %p233_p0  ;;  %p5629_p6 = por %p240_p4, %p239_p3 }
   0xa   : > { %p3740_p7 = scmp.ge.s32.totalorder %s5531_s12, 1  ;;  %p290_p8 = scmp.lt.s32.totalorder %s5531_s12, 3 }
   0xc   : > { %p291_p9 = pnand %p3740_p7, %p290_p8 }
   0xd   : > { %v5638_v0 = vld [vmem:[%s6819_s1] sm:$0xff] (!%p291_p9)   ;;  %v5533_v1 = vmov (!%p291_p9), 0   ;;  %p325_p10 = scmp.lt.s32.totalorder (!%p291_p9), %s5608_s13, 1  ;;  %v5648_v2 = vld [vmem:[%s6819_s1 + $0x8] sm:$0xff] (!%p291_p9)   ;;  %v5658_v3 = vld [vmem:[%s6819_s1 + $0x10] sm:$0xff] (!%p291_p9)   ;;  %vm433_vm0 = vcmask (!%p291_p9), 261120  }
   0xe   : > { %294 = sbr.rel (%p291_p9) target bundleno = 1368 (0x558), region = 56  ;;  %440 = vmatprep.subr.bf16.mxu0 (!%p291_p9), %v5533_v1  ;;  %518 = vmatprep.subr.bf16.mxu1 (!%p291_p9), %v5533_v1  ;;  %v5672_v4 = vld [vmem:[%s6819_s1 + $0x18] sm:$0xff] (!%p291_p9)   ;;  %v5684_v7 = vld [vmem:[%s6819_s1 + $0x20] sm:$0xff] (!%p291_p9)   ;;  %v5694_v8 = vld [vmem:[%s6819_s1 + $0x28] sm:$0xff] (!%p291_p9)   ;;  %v5534_v29 = vmov (!%p291_p9), 0.0   ;;  %vm5535_vm1 = vmmov (!%p291_p9), 0  }
   0xf   : > { %441 = vmatpush1.bf16.msra.mxu0 (!%p291_p9), %v5638_v0  ;;  %519 = vmatpush1.bf16.msra.mxu1 (!%p291_p9), %v5638_v0  ;;  %v5701_v9 = vld [vmem:[%s6819_s1 + $0x30] sm:$0xff] (!%p291_p9)   ;;  %v5710_v10 = vld [vmem:[%s6819_s1 + $0x38] sm:$0xff] (!%p291_p9)   ;;  %v5227_v11 = vld [vmem:[%s6819_s1 + $0x40] sm:$0xff] (!%p291_p9)   ;;  %s4390_s17 = sshll.u32 (!%p291_p9), %s5608_s13, 4  ;;  %s5536_s27 = smov (!%p291_p9), [#allocation2]  }
  0x10   : > { %442 = vmatprep.subr.bf16.mxu0 (!%p291_p9), %v5533_v1  ;;  %520 = vmatprep.subr.bf16.mxu1 (!%p291_p9), %v5533_v1  ;;  %v5726_v12 = vld [vmem:[%s6819_s1 + $0x48] sm:$0xff] (!%p291_p9)   ;;  %v5253_v27 = vld [vmem:[%s6821_s3] sm:$0xff] (!%p291_p9)   ;;  %v5257_v32 = vld [vmem:[%s6821_s3 + $0x10] sm:$0xff] (!%p291_p9)   ;;  %s5473_s28 = sshll.u32 (!%p291_p9), %s5536_s27, 4  ;;  %s5474_s28 = int_to_ptr.vmem [resolvable:$false] %s5473_s28 }
  0x11   : > { %v5254_v28 = vld [vmem:[%s6821_s3 + $0x40] sm:$0xff] (!%p291_p9)   ;;  %v5255_v30 = vld [vmem:[%s6821_s3 + $0x8] sm:$0xff] (!%p291_p9)   ;;  %v5258_v33 = vld [vmem:[%s6821_s3 + $0x50] sm:$0xff] (!%p291_p9)   ;;  %s5475_s29 = scalar_lea.vmem (!%p291_p9), %s5474_s28, 32 }
  0x12   : > { %v5256_v31 = vld [vmem:[%s6821_s3 + $0x48] sm:$0xff] (!%p291_p9)   ;;  %v5259_v34 = vld [vmem:[%s6821_s3 + $0x18] sm:$0xff] (!%p291_p9)   ;;  %v5261_v36 = vld [vmem:[%s6821_s3 + $0x20] sm:$0xff] (!%p291_p9)  }
  0x13   : > { %443 = vmatpush1.bf16.msra.mxu0 (!%p291_p9), %v5648_v2  ;;  %521 = vmatpush1.bf16.msra.mxu1 (!%p291_p9), %v5648_v2  ;;  %v5260_v35 = vld [vmem:[%s6821_s3 + $0x58] sm:$0xff] (!%p291_p9)   ;;  %v5262_v37 = vld [vmem:[%s6821_s3 + $0x60] sm:$0xff] (!%p291_p9)   ;;  %v5263_v38 = vld [vmem:[%s6821_s3 + $0x28] sm:$0xff] (!%p291_p9)  }
  0x14   : > { %444 = vmatprep.subr.bf16.mxu0 (!%p291_p9), %v5533_v1  ;;  %522 = vmatprep.subr.bf16.mxu1 (!%p291_p9), %v5533_v1  ;;  %v5264_v39 = vld [vmem:[%s6821_s3 + $0x68] sm:$0xff] (!%p291_p9)   ;;  %v5265_v40 = vld [vmem:[%s6821_s3 + $0x30] sm:$0xff] (!%p291_p9)   ;;  %v5267_v42 = vld [vmem:[%s6821_s3 + $0x38] sm:$0xff] (!%p291_p9)  }
  0x15   : > { %s326_s25 = scalar_select %p325_p10, %s5608_s13, 1  ;;  %v5266_v41 = vld [vmem:[%s6821_s3 + $0x70] sm:$0xff]   ;;  %v5268_v43 = vld [vmem:[%s6821_s3 + $0x78] sm:$0xff]  }
  0x17   : > { %s4393_s26 = sshll.u32 %s326_s25, 7  ;;  %445 = vmatpush1.bf16.msra.mxu0 %v5658_v3  ;;  %523 = vmatpush1.bf16.msra.mxu1 %v5658_v3  ;;  %s6776_s25 = scalar_lea.hbm %s6827_s9, %s4390_s17 }
  0x18   : > { %s5665_s16 = scalar_lea.vmem %s6818_s0, %s4393_s26  ;;  %446 = vmatprep.subr.bf16.mxu0 %v5533_v1  ;;  %524 = vmatprep.subr.bf16.mxu1 %v5533_v1 }
  0x19   : > { %v5231_v5 = vld [vmem:[%s5665_s16 + $0x4] ss:$8 sps:$4 sm:$0xff]   ;;  %v5229_v13 = vld [vmem:[%s5665_s16] ss:$8 sps:$4 sm:$0xff]  }
  0x1a   : > { %v5234_v6 = vld [vmem:[%s5665_s16 + $0x24] ss:$8 sps:$4 sm:$0xff]   ;;  %3757 = vmatprep.mubr.msk.bf16.mxu0 %vm433_vm0, %v5231_v5  ;;  %v5232_v14 = vld [vmem:[%s5665_s16 + $0x20] ss:$8 sps:$4 sm:$0xff]  }
  0x1b   : > { %447 = vmatpush1.bf16.msra.mxu0 %v5672_v4  ;;  %525 = vmatpush1.bf16.msra.mxu1 %v5672_v4  ;;  %v5235_v15 = vld [vmem:[%s5665_s16 + $0x14] ss:$8 sps:$4 sm:$0x1f]   ;;  %v5237_v17 = vld [vmem:[%s5665_s16 + $0x10] ss:$8 sps:$4 sm:$0x1f]  }
  0x1c   : > { %448 = vmatprep.subr.bf16.mxu0 %v5533_v1  ;;  %526 = vmatprep.subr.bf16.mxu1 %v5533_v1  ;;  %v5238_v16 = vld [vmem:[%s5665_s16 + $0x34] ss:$8 sps:$4 sm:$0x1f]   ;;  %v5240_v18 = vld [vmem:[%s5665_s16 + $0x30] ss:$8 sps:$4 sm:$0x1f]  }
  0x1d   : > { %3767 = vmatprep.mubr.msk.bf16.mxu1 %vm433_vm0, %v5234_v6  ;;  %v5243_v19 = vld [vmem:[%s5665_s16 + $0x44] ss:$8 sps:$4 sm:$0xff]   ;;  %v5241_v21 = vld [vmem:[%s5665_s16 + $0x40] ss:$8 sps:$4 sm:$0xff]  }
  0x1e   : > { %v5246_v20 = vld [vmem:[%s5665_s16 + $0x64] ss:$8 sps:$4 sm:$0xff]   ;;  %v5244_v22 = vld [vmem:[%s5665_s16 + $0x60] ss:$8 sps:$4 sm:$0xff]  }
  0x1f   : > { %449 = vmatpush1.bf16.msra.mxu0 %v5684_v7  ;;  %527 = vmatpush1.bf16.msra.mxu1 %v5684_v7  ;;  %v5247_v23 = vld [vmem:[%s5665_s16 + $0x54] ss:$8 sps:$4 sm:$0x1f]   ;;  %v5249_v25 = vld [vmem:[%s5665_s16 + $0x50] ss:$8 sps:$4 sm:$0x1f]  }
  0x20   : > { %450 = vmatprep.subr.bf16.mxu0 %v5533_v1  ;;  %528 = vmatprep.subr.bf16.mxu1 %v5533_v1  ;;  %v5250_v24 = vld [vmem:[%s5665_s16 + $0x74] ss:$8 sps:$4 sm:$0x1f]   ;;  %v5252_v26 = vld [vmem:[%s5665_s16 + $0x70] ss:$8 sps:$4 sm:$0x1f]  }
  0x21   : > { %v3789_v5 = vld [vmem:[%s6820_s2] ss:$0 sm:$0xff]  ;;  %s323_s16 = sand.u32 1, %s5523_s10  }
  0x22   : > { %s324_s21 = scalar_lea.vmem [#allocation2], %s323_s16  ;;  %s3670_s26 = scalar_lea.sflag [#allocation3], %s323_s16 }
  0x23   : > { %451 = vmatpush1.bf16.msra.mxu0 %v5694_v8  ;;  %529 = vmatpush1.bf16.msra.mxu1 %v5694_v8  ;;  %s3682_s22 = sshll.u32 %s324_s21, 4  ;;  %s6778_s22 = int_to_ptr.vmem [resolvable:$true] %s3682_s22 }
  0x24   : > { %452 = vmatprep.subr.bf16.mxu0 %v5533_v1  ;;  %530 = vmatprep.subr.bf16.mxu1 %v5533_v1  ;;  %s5469_s13 = scalar_lea.vmem %s6778_s22, 16  ;;  %p5476_p0 = scmp.lt.s32.totalorder %s6778_s22, %s5474_s28 }
  0x25   : > { %p5470_p11 = scmp.ne.s32.totalorder %s6778_s22, %s5469_s13  ;;  %p5477_p1 = scmp.lt.s32.totalorder %s5475_s29, %s5469_s13 }
  0x27   : > { %453 = vmatpush1.bf16.msra.mxu0 %v5701_v9  ;;  %531 = vmatpush1.bf16.msra.mxu1 %v5701_v9  ;;  %p5471_p12 = pnand %p5470_p11, %p5625_p5  ;;  %p5478_p2 = por %p5477_p1, %p5476_p0 }
  0x28   : > { %454 = vmatprep.subr.bf16.mxu0 %v5533_v1  ;;  %532 = vmatprep.subr.bf16.mxu1 %v5533_v1 }
  0x29   : > { %p5472_p13 = pneg %p5471_p12 }
  0x2b   : > { %455 = vmatpush1.bf16.msra.mxu0 %v5710_v10  ;;  %533 = vmatpush1.bf16.msra.mxu1 %v5710_v10  ;;  %p5479_p3 = pnand %p5478_p2, %p5472_p13 }
  0x2c   : > { %456 = vmatprep.subr.bf16.mxu0 %v5533_v1  ;;  %534 = vmatprep.subr.bf16.mxu1 %v5533_v1 }
  0x2f   : > { %457 = vmatpush1.bf16.msra.mxu0 %v5227_v11  ;;  %535 = vmatpush1.bf16.msra.mxu1 %v5227_v11 }
  0x30   : > { %458 = vmatprep.subr.bf16.mxu0 %v5533_v1  ;;  %536 = vmatprep.subr.bf16.mxu1 %v5533_v1 }
  0x33   : > { %459 = vmatpush1.bf16.msra.mxu0 %v5726_v12  ;;  %537 = vmatpush1.bf16.msra.mxu1 %v5726_v12 }
  0x34   : > { %600 = vmatprep.subr.bf16.mxu0 %v5533_v1  ;;  %682 = vmatprep.subr.bf16.mxu1 %v5533_v1 }
  0x36   : > { %473 = vmatmul.mubr.bf16.vlgmr.msra.gmra.mrb[0].mxu0 %v5229_v13  ;;  %551 = vmatmul.mubr.bf16.vlgmr.msra.gmra.mrb[0].mxu1 %v5232_v14 }
  0x37   : > { %601 = vmatpush1.bf16.msra.mxu0 %v5638_v0  ;;  %683 = vmatpush1.bf16.msra.mxu1 %v5638_v0 }
  0x38   : > { %602 = vmatprep.subr.bf16.mxu0 %v5533_v1  ;;  %684 = vmatprep.subr.bf16.mxu1 %v5533_v1 }
  0x39   : > { %3758 = vmatprep.mubr.msk.bf16.mxu0 %vm433_vm0, %v5235_v15  ;;  %3768 = vmatprep.mubr.msk.bf16.mxu1 %vm433_vm0, %v5238_v16 }
  0x3b   : > { %603 = vmatpush1.bf16.msra.mxu0 %v5648_v2  ;;  %685 = vmatpush1.bf16.msra.mxu1 %v5648_v2 }
  0x3c   : > { %604 = vmatprep.subr.bf16.mxu0 %v5533_v1  ;;  %686 = vmatprep.subr.bf16.mxu1 %v5533_v1 }
  0x3e   : > { %481 = vmatmul.mubr.bf16.gmra.mrb[4].mxu0 %v5237_v17  ;;  %559 = vmatmul.mubr.bf16.gmra.mrb[4].mxu1 %v5240_v18  ;;  %v5269_v18 = vld [vmem:[%s6821_s3 + $0xc0] sm:$0xff]  }
  0x3f   : > { %605 = vmatpush1.bf16.msra.mxu0 %v5658_v3  ;;  %687 = vmatpush1.bf16.msra.mxu1 %v5658_v3 }
  0x40   : > { %606 = vmatprep.subr.bf16.mxu0 %v5533_v1  ;;  %688 = vmatprep.subr.bf16.mxu1 %v5533_v1 }
  0x41   : > { %3777 = vmatprep.mubr.msk.bf16.mxu0 %vm433_vm0, %v5243_v19  ;;  %3787 = vmatprep.mubr.msk.bf16.mxu1 %vm433_vm0, %v5246_v20 }
  0x43   : > { %607 = vmatpush1.bf16.msra.mxu0 %v5672_v4  ;;  %689 = vmatpush1.bf16.msra.mxu1 %v5672_v4 }
  0x44   : > { %608 = vmatprep.subr.bf16.mxu0 %v5533_v1  ;;  %690 = vmatprep.subr.bf16.mxu1 %v5533_v1 }
  0x47   : > { %609 = vmatpush1.bf16.msra.mxu0 %v5684_v7  ;;  %691 = vmatpush1.bf16.msra.mxu1 %v5684_v7 }
  0x48   : > { %610 = vmatprep.subr.bf16.mxu0 %v5533_v1  ;;  %692 = vmatprep.subr.bf16.mxu1 %v5533_v1 }
  0x4b   : > { %611 = vmatpush1.bf16.msra.mxu0 %v5694_v8  ;;  %693 = vmatpush1.bf16.msra.mxu1 %v5694_v8 }
  0x4c   : > { %612 = vmatprep.subr.bf16.mxu0 %v5533_v1  ;;  %694 = vmatprep.subr.bf16.mxu1 %v5533_v1 }
  0x4f   : > { %613 = vmatpush1.bf16.msra.mxu0 %v5701_v9  ;;  %695 = vmatpush1.bf16.msra.mxu1 %v5701_v9 }
  0x50   : > { %614 = vmatprep.subr.bf16.mxu0 %v5533_v1  ;;  %696 = vmatprep.subr.bf16.mxu1 %v5533_v1 }
  0x53   : > { %615 = vmatpush1.bf16.msra.mxu0 %v5710_v10  ;;  %697 = vmatpush1.bf16.msra.mxu1 %v5710_v10 }
  0x54   : > { %616 = vmatprep.subr.bf16.mxu0 %v5533_v1  ;;  %698 = vmatprep.subr.bf16.mxu1 %v5533_v1 }
  0x57   : > { %617 = vmatpush1.bf16.msra.mxu0 %v5227_v11  ;;  %699 = vmatpush1.bf16.msra.mxu1 %v5227_v11 }
  0x58   : > { %618 = vmatprep.subr.bf16.mxu0 %v5533_v1  ;;  %700 = vmatprep.subr.bf16.mxu1 %v5533_v1 }
  0x5b   : > { %619 = vmatpush1.bf16.msra.mxu0 %v5726_v12  ;;  %701 = vmatpush1.bf16.msra.mxu1 %v5726_v12 }
  0x5c   : > { %4657 = vmatprep.subr.bf16.mxu1 %v5534_v29  ;;  %4637 = vmatprep.subr.bf16.mxu0 %v5534_v29 }
  0x5e   : > { %633 = vmatmul.mubr.bf16.vlgmr.msra.gmra.mrb[8].mxu0 %v5241_v21  ;;  %715 = vmatmul.mubr.bf16.vlgmr.msra.gmra.mrb[8].mxu1 %v5244_v22 }
  0x5f   : > { %3778 = vmatprep.mubr.msk.bf16.mxu0 %vm433_vm0, %v5247_v23  ;;  %3788 = vmatprep.mubr.msk.bf16.mxu1 %vm433_vm0, %v5250_v24 }
  0x60   : > { %4658 = vmatpush3.bf16.msra.mxu1 %v5253_v27  ;;  %4638 = vmatpush3.bf16.msra.mxu0 %v5254_v28 }
  0x61   : > { %4659 = vmatprep.subr.bf16.mxu1 %v5534_v29  ;;  %4639 = vmatprep.subr.bf16.mxu0 %v5534_v29 }
  0x64   : > { %4660 = vmatpush3.bf16.msra.mxu1 %v5255_v30  ;;  %4640 = vmatpush3.bf16.msra.mxu0 %v5256_v31 }
  0x65   : > { %4661 = vmatprep.subr.bf16.mxu1 %v5534_v29  ;;  %4641 = vmatprep.subr.bf16.mxu0 %v5534_v29 }
  0x66   : > { %641 = vmatmul.mubr.bf16.gmra.mrb[12].mxu0 %v5249_v25  ;;  %723 = vmatmul.mubr.bf16.gmra.mrb[12].mxu1 %v5252_v26  ;;  %v5270_v25 = vld [vmem:[%s6821_s3 + $0x80] sm:$0xff]  }
  0x67   : > { %4673 = vmatprep.mubr.msk.bf16.mxu1 %vm5535_vm1, %v5534_v29  ;;  %4653 = vmatprep.mubr.msk.bf16.mxu0 %vm5535_vm1, %v5534_v29 }
  0x68   : > { %4662 = vmatpush3.bf16.msra.mxu1 %v5257_v32  ;;  %4642 = vmatpush3.bf16.msra.mxu0 %v5258_v33  ;;  %v5271_v32 = vld [vmem:[%s6821_s3 + $0xc8] sm:$0xff]  }
  0x69   : > { %4663 = vmatprep.subr.bf16.mxu1 %v5534_v29  ;;  %4643 = vmatprep.subr.bf16.mxu0 %v5534_v29 }
  0x6c   : > { %4664 = vmatpush3.bf16.msra.mxu1 %v5259_v34  ;;  %4644 = vmatpush3.bf16.msra.mxu0 %v5260_v35  ;;  %v5272_v35 = vld [vmem:[%s6821_s3 + $0x88] sm:$0xff]  }
  0x6d   : > { %4665 = vmatprep.subr.bf16.mxu1 %v5534_v29  ;;  %4645 = vmatprep.subr.bf16.mxu0 %v5534_v29 }
  0x70   : > { %4666 = vmatpush3.bf16.msra.mxu1 %v5261_v36  ;;  %4646 = vmatpush3.bf16.msra.mxu0 %v5262_v37  ;;  %v5273_v37 = vld [vmem:[%s6821_s3 + $0xd0] sm:$0xff]  }
  0x71   : > { %4667 = vmatprep.subr.bf16.mxu1 %v5534_v29  ;;  %4647 = vmatprep.subr.bf16.mxu0 %v5534_v29 }
  0x74   : > { %4668 = vmatpush3.bf16.msra.mxu1 %v5263_v38  ;;  %4648 = vmatpush3.bf16.msra.mxu0 %v5264_v39  ;;  %v5274_v38 = vld [vmem:[%s6821_s3 + $0x90] sm:$0xff]   ;;  %v5275_v39 = vld [vmem:[%s6821_s3 + $0xd8] sm:$0xff]  }
  0x75   : > { %4669 = vmatprep.subr.bf16.mxu1 %v5534_v29  ;;  %4649 = vmatprep.subr.bf16.mxu0 %v5534_v29 }
  0x78   : > { %4670 = vmatpush3.bf16.msra.mxu1 %v5265_v40  ;;  %4650 = vmatpush3.bf16.msra.mxu0 %v5266_v41  ;;  %v5276_v40 = vld [vmem:[%s6821_s3 + $0x98] sm:$0xff]   ;;  %v5277_v41 = vld [vmem:[%s6821_s3 + $0xe0] sm:$0xff]  }
  0x79   : > { %4671 = vmatprep.subr.bf16.mxu1 %v5534_v29  ;;  %4651 = vmatprep.subr.bf16.mxu0 %v5534_v29 }
  0x7c   : > { %4672 = vmatpush3.bf16.msra.mxu1 %v5267_v42  ;;  %4652 = vmatpush3.bf16.msra.mxu0 %v5268_v43  ;;  %v5278_v42 = vld [vmem:[%s6821_s3 + $0xa0] sm:$0xff]   ;;  %v5279_v43 = vld [vmem:[%s6821_s3 + $0xe8] sm:$0xff]  }
  0x7d   : > { %4697 = vmatprep.subr.bf16.mxu1 %v5534_v29  ;;  %4677 = vmatprep.subr.bf16.mxu0 %v5534_v29 }
 0x109   : > { %v474_v44 = vpop.f32.mrb[0].mxu0  ;;  %v552_v45 = vpop.f32.mrb[0].mxu1 }
 0x10a   : > { %v567_v46 = vmax.f32 %v474_v44, %v552_v45  ;;  %v476_v47 = vpop.f32.mrb[1].mxu0  ;;  %v554_v48 = vpop.f32.mrb[1].mxu1  ;;  %v5280_v44 = vld [vmem:[%s6821_s3 + $0xa8] sm:$0xff]   ;;  %v5281_v45 = vld [vmem:[%s6821_s3 + $0xf0] sm:$0xff]  }
 0x10b   : > { %v477_v49 = vpop.f32.mrb[2].mxu0  ;;  %v555_v50 = vpop.f32.mrb[2].mxu1  ;;  %v5283_v47 = vld [vmem:[%s6821_s3 + $0xf8] sm:$0xff]  }
 0x10c   : > { %v568_v51 = vmax.f32 %v477_v49, %v555_v50  ;;  %v479_v52 = vpop.f32.mrb[3].mxu0  ;;  %v557_v53 = vpop.f32.mrb[3].mxu1  ;;  %v5284_v48 = vld [vmem:[%s6821_s3 + $0xb8] sm:$0xff]   ;;  %v5285_v49 = vld [vmem:[%s6821_s3 + $0x140] sm:$0xff]  }
 0x10d   : > { %v5287_v53 = vld [vmem:[%s6821_s3 + $0x148] sm:$0xff]  }
 0x111   : > { %v482_v54 = vpop.f32.mrb[4].mxu0  ;;  %v560_v55 = vpop.f32.mrb[4].mxu1 }
 0x112   : > { %v484_v56 = vpop.f32.mrb[5].mxu0  ;;  %v569_v57 = vmax.f32 %v482_v54, %v560_v55  ;;  %v562_v58 = vpop.f32.mrb[5].mxu1  ;;  %v5288_v54 = vld [vmem:[%s6821_s3 + $0x108] sm:$0xff]   ;;  %v5289_v55 = vld [vmem:[%s6821_s3 + $0x150] sm:$0xff]  }
 0x113   : > { %v485_v59 = vpop.f32.mrb[6].mxu0  ;;  %v563_v60 = vpop.f32.mrb[6].mxu1  ;;  %v5290_v56 = vld [vmem:[%s6821_s3 + $0x110] sm:$0xff]   ;;  %v5292_v58 = vld [vmem:[%s6821_s3 + $0x118] sm:$0xff]  }
 0x114   : > { %v487_v61 = vpop.f32.mrb[7].mxu0  ;;  %v570_v62 = vmax.f32 %v485_v59, %v563_v60  ;;  %v565_v63 = vpop.f32.mrb[7].mxu1  ;;  %v5293_v59 = vld [vmem:[%s6821_s3 + $0x160] sm:$0xff]  }
 0x115   : > { %v5294_v60 = vld [vmem:[%s6821_s3 + $0x120] sm:$0xff]   ;;  %v5295_v61 = vld [vmem:[%s6821_s3 + $0x168] sm:$0xff]   ;;  %v5297_v63 = vld [vmem:[%s6821_s3 + $0x170] sm:$0xff]  }
 0x131   : > { %v634_v0 = vpop.f32.mrb[8].mxu0  ;;  %v716_v1 = vpop.f32.mrb[8].mxu1 }
 0x132   : > { %v649_v2 = vmax.f32 %v567_v46, %v634_v0  ;;  %v636_v3 = vpop.f32.mrb[9].mxu0  ;;  %v718_v4 = vpop.f32.mrb[9].mxu1  ;;  %v5282_v46 = vld [vmem:[%s6821_s3 + $0xb0] sm:$0xff]  }
 0x133   : > { %v637_v6 = vpop.f32.mrb[10].mxu0  ;;  %v719_v7 = vpop.f32.mrb[10].mxu1  ;;  %v5298_v0 = vld [vmem:[%s6821_s3 + $0x130] sm:$0xff]   ;;  %v5301_v3 = vld [vmem:[%s6821_s3 + $0x1c0] sm:$0xff]  }
 0x134   : > { %v731_v8 = vmax.f32 %v649_v2, %v716_v1  ;;  %v650_v9 = vmax.f32 %v568_v51, %v637_v6  ;;  %v639_v10 = vpop.f32.mrb[11].mxu0  ;;  %v721_v11 = vpop.f32.mrb[11].mxu1  ;;  %v5286_v51 = vld [vmem:[%s6821_s3 + $0x100] sm:$0xff]   ;;  %v5299_v1 = vld [vmem:[%s6821_s3 + $0x178] sm:$0xff]  }
 0x135   : > { %v5300_v2 = vld [vmem:[%s6821_s3 + $0x138] sm:$0xff]   ;;  %v5306_v10 = vld [vmem:[%s6821_s3 + $0x190] sm:$0xff]  }
 0x136   : > { %v742_v12 = vadd.f32 %v3789_v5, %v731_v8  ;;  %v732_v13 = vmax.f32 %v650_v9, %v719_v7  ;;  %v5303_v7 = vld [vmem:[%s6821_s3 + $0x1c8] sm:$0xff]   ;;  %v5305_v9 = vld [vmem:[%s6821_s3 + $0x1d0] sm:$0xff]   ;;  %v5307_v11 = vld [vmem:[%s6821_s3 + $0x1d8] sm:$0xff]  }
 0x137   : > { %v5304_v8 = vld [vmem:[%s6821_s3 + $0x188] sm:$0xff]  }
 0x138   : > { %v746_v14 = vmax.f32 %v742_v12, 0.0  ;;  %v5863_v15 = vadd.f32 %v3789_v5, %v732_v13  ;;  %v5308_v12 = vld [vmem:[%s6821_s3 + $0x198] sm:$0xff]   ;;  %v5309_v13 = vld [vmem:[%s6821_s3 + $0x1e0] sm:$0xff]  }
 0x139   : > { %v642_v16 = vpop.f32.mrb[12].mxu0  ;;  %v724_v17 = vpop.f32.mrb[12].mxu1 }
 0x13a   : > { %v5868_v19 = vpack.c.bf16 %v746_v14, %v746_v14  ;;  %v651_v20 = vmax.f32 %v569_v57, %v642_v16  ;;  %v644_v21 = vpop.f32.mrb[13].mxu0  ;;  %v726_v22 = vpop.f32.mrb[13].mxu1  ;;  %v5291_v57 = vld [vmem:[%s6821_s3 + $0x158] sm:$0xff]   ;;  %v5310_v14 = vld [vmem:[%s6821_s3 + $0x1a0] sm:$0xff]   ;;  %v5311_v16 = vld [vmem:[%s6821_s3 + $0x1e8] sm:$0xff]  }
 0x13b   : > { %v645_v23 = vpop.f32.mrb[14].mxu0  ;;  %v727_v24 = vpop.f32.mrb[14].mxu1  ;;  %v5315_v21 = vld [vmem:[%s6821_s3 + $0x1f8] sm:$0xff]  }
 0x13c   : > { %v652_v26 = vmax.f32 %v570_v62, %v645_v23  ;;  %v733_v27 = vmax.f32 %v651_v20, %v724_v17  ;;  %4674 = vmatmul.mubr.bf16.vlgmr.msra.gmra.mrb[16].mxu1 %v5868_v19  ;;  %v5875_v28 = vshrl.u32 %v5868_v19, 16  ;;  %v647_v30 = vpop.f32.mrb[15].mxu0  ;;  %v729_v31 = vpop.f32.mrb[15].mxu1  ;;  %v982_v52 = vrot.slane %v5868_v19, 1  ;;  %v5296_v62 = vld [vmem:[%s6821_s3 + $0x128] sm:$0xff]   ;;  %v5314_v20 = vld [vmem:[%s6821_s3 + $0x1b0] sm:$0xff]  }
 0x13d   : > { %4698 = vmatpush3.bf16.msra.mxu1 %v5269_v18  ;;  %4713 = vmatprep.mubr.msk.bf16.mxu1 %vm5535_vm1, %v5534_v29  ;;  %v1198_v6 = vrot.slane %v5868_v19, 2  ;;  %v5312_v17 = vld [vmem:[%s6821_s3 + $0x1a8] sm:$0xff]   ;;  %v5313_v18 = vld [vmem:[%s6821_s3 + $0x1f0] sm:$0xff]   ;;  %v5316_v22 = vld [vmem:[%s6821_s3 + $0x1b8] sm:$0xff]  }
 0x13e   : > { %v5882_v33 = vadd.f32 %v3789_v5, %v733_v27  ;;  %v734_v34 = vmax.f32 %v652_v26, %v727_v24  ;;  %4654 = vmatmul.mubr.bf16.vlgmr.msra.gmra.mrb[16].mxu0 %v5875_v28  ;;  %4699 = vmatprep.subr.bf16.mxu1 %v5534_v29  ;;  %v1090_v50 = vrot.slane %v5875_v28, 1  ;;  %v1306_v4 = vrot.slane %v5875_v28, 2  ;;  %v5317_v23 = vld [vmem:[%s6821_s3 + $0x240] sm:$0xff]   ;;  %v5319_v27 = vld [vmem:[%s6821_s3 + $0x248] sm:$0xff]   ;;  %v5322_v30 = vld [vmem:[%s6821_s3 + $0x210] sm:$0xff]  }
 0x13f   : > { %4678 = vmatpush3.bf16.msra.mxu0 %v5270_v25  ;;  %4693 = vmatprep.mubr.msk.bf16.mxu0 %vm5535_vm1, %v5534_v29  ;;  %v1522_v24 = vrot.slane %v5875_v28, 3  ;;  %v5318_v25 = vld [vmem:[%s6821_s3 + $0x200] sm:$0xff]   ;;  %v1414_v26 = vrot.slane %v5868_v19, 3  ;;  %v5320_v28 = vld [vmem:[%s6821_s3 + $0x208] sm:$0xff]   ;;  %v5321_v19 = vld [vmem:[%s6821_s3 + $0x250] sm:$0xff]  }
 0x140   : > { %v5891_v36 = vadd.f32 %v3789_v5, %v734_v34  ;;  %4679 = vmatprep.subr.bf16.mxu0 %v5534_v29  ;;  %v5302_v5 = vld [vmem:[%s6821_s3 + $0x180] sm:$0xff]   ;;  %v5323_v31 = vld [vmem:[%s6821_s3 + $0x258] sm:$0xff]  }
 0x141   : > { %4700 = vmatpush3.bf16.msra.mxu1 %v5271_v32  ;;  %v5324_v32 = vld [vmem:[%s6821_s3 + $0x218] sm:$0xff]   ;;  %v5325_v34 = vld [vmem:[%s6821_s3 + $0x260] sm:$0xff]  }
 0x142   : > { %4701 = vmatprep.subr.bf16.mxu1 %v5534_v29 }
 0x143   : > { %4680 = vmatpush3.bf16.msra.mxu0 %v5272_v35  ;;  %v5326_v35 = vld [vmem:[%s6821_s3 + $0x220] sm:$0xff]  }
 0x144   : > { %4681 = vmatprep.subr.bf16.mxu0 %v5534_v29 }
 0x145   : > { %4702 = vmatpush3.bf16.msra.mxu1 %v5273_v37  ;;  %v5327_v37 = vld [vmem:[%s6821_s3 + $0x268] sm:$0xff]  }
 0x146   : > { %4703 = vmatprep.subr.bf16.mxu1 %v5534_v29 }
 0x147   : > { %4682 = vmatpush3.bf16.msra.mxu0 %v5274_v38  ;;  %v5328_v38 = vld [vmem:[%s6821_s3 + $0x228] sm:$0xff]  }
 0x148   : > { %4683 = vmatprep.subr.bf16.mxu0 %v5534_v29 }
 0x149   : > { %4704 = vmatpush3.bf16.msra.mxu1 %v5275_v39  ;;  %v5329_v39 = vld [vmem:[%s6821_s3 + $0x270] sm:$0xff]  }
 0x14a   : > { %4705 = vmatprep.subr.bf16.mxu1 %v5534_v29 }
 0x14b   : > { %4684 = vmatpush3.bf16.msra.mxu0 %v5276_v40  ;;  %v747_v40 = vmax.f32 %v5863_v15, 0.0  ;;  %v5332_v15 = vld [vmem:[%s6821_s3 + $0x238] sm:$0xff]  }
 0x14c   : > { %4685 = vmatprep.subr.bf16.mxu0 %v5534_v29 }
 0x14d   : > { %4706 = vmatpush3.bf16.msra.mxu1 %v5277_v41  ;;  %v5330_v41 = vld [vmem:[%s6821_s3 + $0x230] sm:$0xff]  }
 0x14e   : > { %4707 = vmatprep.subr.bf16.mxu1 %v5534_v29 }
 0x14f   : > { %4686 = vmatpush3.bf16.msra.mxu0 %v5278_v42  ;;  %v5331_v42 = vld [vmem:[%s6821_s3 + $0x278] sm:$0xff]  }
 0x150   : > { %4687 = vmatprep.subr.bf16.mxu0 %v5534_v29 }
 0x151   : > { %4708 = vmatpush3.bf16.msra.mxu1 %v5279_v43  ;;  %v6148_v43 = vpack.c.bf16 %v747_v40, %v747_v40 }
 0x152   : > { %4709 = vmatprep.subr.bf16.mxu1 %v5534_v29 }
 0x153   : > { %4688 = vmatpush3.bf16.msra.mxu0 %v5280_v44  ;;  %v5333_v44 = vld [vmem:[%s6821_s3 + $0x2c0] sm:$0xff]  }
 0x154   : > { %4689 = vmatprep.subr.bf16.mxu0 %v5534_v29 }
 0x155   : > { %4710 = vmatpush3.bf16.msra.mxu1 %v5281_v45  ;;  %v6159_v45 = vshrl.u32 %v6148_v43, 16 }
 0x156   : > { %4711 = vmatprep.subr.bf16.mxu1 %v5534_v29 }
 0x157   : > { %4690 = vmatpush3.bf16.msra.mxu0 %v5282_v46  ;;  %v5334_v46 = vld [vmem:[%s6821_s3 + $0x280] sm:$0xff]  }
 0x158   : > { %4691 = vmatprep.subr.bf16.mxu0 %v5534_v29 }
 0x159   : > { %4712 = vmatpush3.bf16.msra.mxu1 %v5283_v47  ;;  %v5335_v47 = vld [vmem:[%s6821_s3 + $0x2c8] sm:$0xff]  }
 0x15a   : > { %4737 = vmatprep.subr.bf16.mxu1 %v5534_v29 }
 0x15b   : > { %4692 = vmatpush3.bf16.msra.mxu0 %v5284_v48  ;;  %v5336_v48 = vld [vmem:[%s6821_s3 + $0x288] sm:$0xff]  }
 0x15c   : > { %4714 = vmatmul.mubr.bf16.vlgmr.msra.gmra.mrb[20].mxu1 %v1090_v50  ;;  %4717 = vmatprep.subr.bf16.mxu0 %v5534_v29  ;;  %v5338_v50 = vld [vmem:[%s6821_s3 + $0x290] sm:$0xff]  }
 0x15d   : > { %4738 = vmatpush3.bf16.msra.mxu1 %v5285_v49  ;;  %4753 = vmatprep.mubr.msk.bf16.mxu1 %vm5535_vm1, %v5534_v29  ;;  %v5337_v49 = vld [vmem:[%s6821_s3 + $0x2d0] sm:$0xff]  }
 0x15e   : > { %4694 = vmatmul.mubr.bf16.vlgmr.msra.gmra.mrb[20].mxu0 %v982_v52  ;;  %4739 = vmatprep.subr.bf16.mxu1 %v5534_v29  ;;  %v5340_v52 = vld [vmem:[%s6821_s3 + $0x298] sm:$0xff]  }
 0x15f   : > { %4718 = vmatpush3.bf16.msra.mxu0 %v5286_v51  ;;  %4733 = vmatprep.mubr.msk.bf16.mxu0 %vm5535_vm1, %v5534_v29  ;;  %v5339_v51 = vld [vmem:[%s6821_s3 + $0x2d8] sm:$0xff]  }
 0x160   : > { %4719 = vmatprep.subr.bf16.mxu0 %v5534_v29 }
 0x161   : > { %4740 = vmatpush3.bf16.msra.mxu1 %v5287_v53  ;;  %v5341_v53 = vld [vmem:[%s6821_s3 + $0x2e0] sm:$0xff]  }
 0x162   : > { %4741 = vmatprep.subr.bf16.mxu1 %v5534_v29 }
 0x163   : > { %4720 = vmatpush3.bf16.msra.mxu0 %v5288_v54  ;;  %v5342_v54 = vld [vmem:[%s6821_s3 + $0x2a0] sm:$0xff]  }
 0x164   : > { %4721 = vmatprep.subr.bf16.mxu0 %v5534_v29 }
 0x165   : > { %4742 = vmatpush3.bf16.msra.mxu1 %v5289_v55  ;;  %v5343_v55 = vld [vmem:[%s6821_s3 + $0x2e8] sm:$0xff]  }
 0x166   : > { %4743 = vmatprep.subr.bf16.mxu1 %v5534_v29 }
 0x167   : > { %4722 = vmatpush3.bf16.msra.mxu0 %v5290_v56  ;;  %v5344_v56 = vld [vmem:[%s6821_s3 + $0x2a8] sm:$0xff]  }
 0x168   : > { %4723 = vmatprep.subr.bf16.mxu0 %v5534_v29 }
 0x169   : > { %4744 = vmatpush3.bf16.msra.mxu1 %v5291_v57  ;;  %v5345_v57 = vld [vmem:[%s6821_s3 + $0x2f0] sm:$0xff]  }
 0x16a   : > { %4745 = vmatprep.subr.bf16.mxu1 %v5534_v29 }
 0x16b   : > { %4724 = vmatpush3.bf16.msra.mxu0 %v5292_v58  ;;  %v5346_v58 = vld [vmem:[%s6821_s3 + $0x2b0] sm:$0xff]  }
 0x16c   : > { %4725 = vmatprep.subr.bf16.mxu0 %v5534_v29 }
 0x16d   : > { %4746 = vmatpush3.bf16.msra.mxu1 %v5293_v59  ;;  %v5347_v59 = vld [vmem:[%s6821_s3 + $0x2f8] sm:$0xff]  }
 0x16e   : > { %4747 = vmatprep.subr.bf16.mxu1 %v5534_v29 }
 0x16f   : > { %4726 = vmatpush3.bf16.msra.mxu0 %v5294_v60  ;;  %v5348_v60 = vld [vmem:[%s6821_s3 + $0x2b8] sm:$0xff]  }
 0x170   : > { %4727 = vmatprep.subr.bf16.mxu0 %v5534_v29 }
 0x171   : > { %4748 = vmatpush3.bf16.msra.mxu1 %v5295_v61  ;;  %v5349_v61 = vld [vmem:[%s6821_s3 + $0x340] sm:$0xff]  }
 0x172   : > { %4749 = vmatprep.subr.bf16.mxu1 %v5534_v29 }
 0x173   : > { %4728 = vmatpush3.bf16.msra.mxu0 %v5296_v62  ;;  %v1956_v62 = vrot.slane %v6159_v45, 1 }
 0x174   : > { %4729 = vmatprep.subr.bf16.mxu0 %v5534_v29 }
 0x175   : > { %4750 = vmatpush3.bf16.msra.mxu1 %v5297_v63  ;;  %v5350_v63 = vld [vmem:[%s6821_s3 + $0x300] sm:$0xff]  }
 0x176   : > { %4751 = vmatprep.subr.bf16.mxu1 %v5534_v29 }
 0x177   : > { %4730 = vmatpush3.bf16.msra.mxu0 %v5298_v0  ;;  %v1848_v0 = vrot.slane %v6148_v43, 1 }
 0x178   : > { %4731 = vmatprep.subr.bf16.mxu0 %v5534_v29 }
 0x179   : > { %4752 = vmatpush3.bf16.msra.mxu1 %v5299_v1  ;;  %v5351_v1 = vld [vmem:[%s6821_s3 + $0x348] sm:$0xff]  }
 0x17a   : > { %4777 = vmatprep.subr.bf16.mxu1 %v5534_v29 }
 0x17b   : > { %4732 = vmatpush3.bf16.msra.mxu0 %v5300_v2  ;;  %v5352_v2 = vld [vmem:[%s6821_s3 + $0x308] sm:$0xff]  }
 0x17c   : > { %4754 = vmatmul.mubr.bf16.vlgmr.msra.gmra.mrb[24].mxu1 %v1306_v4  ;;  %4757 = vmatprep.subr.bf16.mxu0 %v5534_v29  ;;  %v5354_v4 = vld [vmem:[%s6821_s3 + $0x310] sm:$0xff]  }
 0x17d   : > { %4778 = vmatpush3.bf16.msra.mxu1 %v5301_v3  ;;  %4793 = vmatprep.mubr.msk.bf16.mxu1 %vm5535_vm1, %v5534_v29  ;;  %v5353_v3 = vld [vmem:[%s6821_s3 + $0x350] sm:$0xff]  }
 0x17e   : > { %4734 = vmatmul.mubr.bf16.vlgmr.msra.gmra.mrb[24].mxu0 %v1198_v6  ;;  %4779 = vmatprep.subr.bf16.mxu1 %v5534_v29  ;;  %v5356_v6 = vld [vmem:[%s6821_s3 + $0x318] sm:$0xff]  }
 0x17f   : > { %4758 = vmatpush3.bf16.msra.mxu0 %v5302_v5  ;;  %4773 = vmatprep.mubr.msk.bf16.mxu0 %vm5535_vm1, %v5534_v29  ;;  %v5355_v5 = vld [vmem:[%s6821_s3 + $0x358] sm:$0xff]  }
 0x180   : > { %4759 = vmatprep.subr.bf16.mxu0 %v5534_v29 }
 0x181   : > { %4780 = vmatpush3.bf16.msra.mxu1 %v5303_v7  ;;  %v5357_v7 = vld [vmem:[%s6821_s3 + $0x360] sm:$0xff]  }
 0x182   : > { %4781 = vmatprep.subr.bf16.mxu1 %v5534_v29 }
 0x183   : > { %4760 = vmatpush3.bf16.msra.mxu0 %v5304_v8  ;;  %v5358_v8 = vld [vmem:[%s6821_s3 + $0x320] sm:$0xff]  }
 0x184   : > { %4761 = vmatprep.subr.bf16.mxu0 %v5534_v29 }
 0x185   : > { %4782 = vmatpush3.bf16.msra.mxu1 %v5305_v9  ;;  %v5359_v9 = vld [vmem:[%s6821_s3 + $0x368] sm:$0xff]  }
 0x186   : > { %4783 = vmatprep.subr.bf16.mxu1 %v5534_v29 }
 0x187   : > { %4762 = vmatpush3.bf16.msra.mxu0 %v5306_v10  ;;  %v5360_v10 = vld [vmem:[%s6821_s3 + $0x328] sm:$0xff]  }
 0x188   : > { %4763 = vmatprep.subr.bf16.mxu0 %v5534_v29 }
 0x189   : > { %4784 = vmatpush3.bf16.msra.mxu1 %v5307_v11  ;;  %v5361_v11 = vld [vmem:[%s6821_s3 + $0x370] sm:$0xff]  }
 0x18a   : > { %4785 = vmatprep.subr.bf16.mxu1 %v5534_v29 }
 0x18b   : > { %4764 = vmatpush3.bf16.msra.mxu0 %v5308_v12  ;;  %v5362_v12 = vld [vmem:[%s6821_s3 + $0x330] sm:$0xff]  }
 0x18c   : > { %4765 = vmatprep.subr.bf16.mxu0 %v5534_v29 }
 0x18d   : > { %4786 = vmatpush3.bf16.msra.mxu1 %v5309_v13  ;;  %v5363_v13 = vld [vmem:[%s6821_s3 + $0x378] sm:$0xff]  }
 0x18e   : > { %4787 = vmatprep.subr.bf16.mxu1 %v5534_v29 }
 0x18f   : > { %4766 = vmatpush3.bf16.msra.mxu0 %v5310_v14  ;;  %v5364_v14 = vld [vmem:[%s6821_s3 + $0x338] sm:$0xff]  }
 0x190   : > { %4767 = vmatprep.subr.bf16.mxu0 %v5534_v29 }
 0x191   : > { %4788 = vmatpush3.bf16.msra.mxu1 %v5311_v16  ;;  %v5365_v16 = vld [vmem:[%s6821_s3 + $0x3c0] sm:$0xff]  }
 0x192   : > { %4789 = vmatprep.subr.bf16.mxu1 %v5534_v29 }
 0x193   : > { %4768 = vmatpush3.bf16.msra.mxu0 %v5312_v17  ;;  %v2172_v17 = vrot.slane %v6159_v45, 2 }
 0x194   : > { %4769 = vmatprep.subr.bf16.mxu0 %v5534_v29 }
 0x195   : > { %4790 = vmatpush3.bf16.msra.mxu1 %v5313_v18  ;;  %v5366_v18 = vld [vmem:[%s6821_s3 + $0x380] sm:$0xff]  }
 0x196   : > { %4791 = vmatprep.subr.bf16.mxu1 %v5534_v29 }
 0x197   : > { %4770 = vmatpush3.bf16.msra.mxu0 %v5314_v20  ;;  %v2064_v20 = vrot.slane %v6148_v43, 2 }
 0x198   : > { %4771 = vmatprep.subr.bf16.mxu0 %v5534_v29 }
 0x199   : > { %4792 = vmatpush3.bf16.msra.mxu1 %v5315_v21  ;;  %v5367_v21 = vld [vmem:[%s6821_s3 + $0x3c8] sm:$0xff]  }
 0x19a   : > { %4817 = vmatprep.subr.bf16.mxu1 %v5534_v29 }
 0x19b   : > { %4772 = vmatpush3.bf16.msra.mxu0 %v5316_v22  ;;  %v5368_v22 = vld [vmem:[%s6821_s3 + $0x388] sm:$0xff]  }
 0x19c   : > { %4794 = vmatmul.mubr.bf16.vlgmr.msra.gmra.mrb[28].mxu1 %v1522_v24  ;;  %4797 = vmatprep.subr.bf16.mxu0 %v5534_v29  ;;  %v5370_v24 = vld [vmem:[%s6821_s3 + $0x390] sm:$0xff]  }
 0x19d   : > { %4818 = vmatpush3.bf16.msra.mxu1 %v5317_v23  ;;  %4833 = vmatprep.mubr.msk.bf16.mxu1 %vm5535_vm1, %v5534_v29  ;;  %v5369_v23 = vld [vmem:[%s6821_s3 + $0x3d0] sm:$0xff]  }
 0x19e   : > { %4774 = vmatmul.mubr.bf16.vlgmr.msra.gmra.mrb[28].mxu0 %v1414_v26  ;;  %4819 = vmatprep.subr.bf16.mxu1 %v5534_v29  ;;  %v5372_v26 = vld [vmem:[%s6821_s3 + $0x398] sm:$0xff]  }
 0x19f   : > { %4798 = vmatpush3.bf16.msra.mxu0 %v5318_v25  ;;  %4813 = vmatprep.mubr.msk.bf16.mxu0 %vm5535_vm1, %v5534_v29  ;;  %v5371_v25 = vld [vmem:[%s6821_s3 + $0x3d8] sm:$0xff]  }
 0x1a0   : > { %4799 = vmatprep.subr.bf16.mxu0 %v5534_v29 }
 0x1a1   : > { %4820 = vmatpush3.bf16.msra.mxu1 %v5319_v27  ;;  %v5373_v27 = vld [vmem:[%s6821_s3 + $0x3e0] sm:$0xff]  }
 0x1a2   : > { %4821 = vmatprep.subr.bf16.mxu1 %v5534_v29 }
 0x1a3   : > { %4800 = vmatpush3.bf16.msra.mxu0 %v5320_v28  ;;  %v5374_v28 = vld [vmem:[%s6821_s3 + $0x3a0] sm:$0xff]  }
 0x1a4   : > { %4801 = vmatprep.subr.bf16.mxu0 %v5534_v29 }
 0x1a5   : > { %4822 = vmatpush3.bf16.msra.mxu1 %v5321_v19  ;;  %v5375_v19 = vld [vmem:[%s6821_s3 + $0x3e8] sm:$0xff]  }
 0x1a6   : > { %4823 = vmatprep.subr.bf16.mxu1 %v5534_v29 }
 0x1a7   : > { %4802 = vmatpush3.bf16.msra.mxu0 %v5322_v30 }
 0x1a8   : > { %4803 = vmatprep.subr.bf16.mxu0 %v5534_v29 }
 0x1a9   : > { %4824 = vmatpush3.bf16.msra.mxu1 %v5323_v31  ;;  %v5376_v31 = vld [vmem:[%s6821_s3 + $0x3a8] sm:$0xff]  }
 0x1aa   : > { %4825 = vmatprep.subr.bf16.mxu1 %v5534_v29 }
 0x1ab   : > { %4804 = vmatpush3.bf16.msra.mxu0 %v5324_v32 }
 0x1ac   : > { %4805 = vmatprep.subr.bf16.mxu0 %v5534_v29 }
 0x1ad   : > { %4826 = vmatpush3.bf16.msra.mxu1 %v5325_v34 }
 0x1ae   : > { %4827 = vmatprep.subr.bf16.mxu1 %v5534_v29 }
 0x1af   : > { %4806 = vmatpush3.bf16.msra.mxu0 %v5326_v35 }
 0x1b0   : > { %4807 = vmatprep.subr.bf16.mxu0 %v5534_v29 }
 0x1b1   : > { %4828 = vmatpush3.bf16.msra.mxu1 %v5327_v37  ;;  %v5377_v37 = vld [vmem:[%s6821_s3 + $0x3f0] sm:$0xff]  }
 0x1b2   : > { %4829 = vmatprep.subr.bf16.mxu1 %v5534_v29 }
 0x1b3   : > { %4808 = vmatpush3.bf16.msra.mxu0 %v5328_v38 }
 0x1b4   : > { %4809 = vmatprep.subr.bf16.mxu0 %v5534_v29 }
 0x1b5   : > { %4830 = vmatpush3.bf16.msra.mxu1 %v5329_v39 }
 0x1b6   : > { %4831 = vmatprep.subr.bf16.mxu1 %v5534_v29 }
 0x1b7   : > { %4810 = vmatpush3.bf16.msra.mxu0 %v5330_v41 }
 0x1b8   : > { %4811 = vmatprep.subr.bf16.mxu0 %v5534_v29 }
 0x1b9   : > { %4832 = vmatpush3.bf16.msra.mxu1 %v5331_v42  ;;  %v5378_v42 = vld [vmem:[%s6821_s3 + $0x3b0] sm:$0xff]  }
 0x1ba   : > { %4857 = vmatprep.subr.bf16.mxu1 %v5534_v29 }
 0x1bb   : > { %4812 = vmatpush3.bf16.msra.mxu0 %v5332_v15 }
 0x1bc   : > { %4834 = vmatmul.mubr.bf16.vlgmr.msra.gmra.mrb[32].mxu1 %v6159_v45  ;;  %4837 = vmatprep.subr.bf16.mxu0 %v5534_v29 }
 0x1bd   : > { %4858 = vmatpush3.bf16.msra.mxu1 %v5333_v44  ;;  %4873 = vmatprep.mubr.msk.bf16.mxu1 %vm5535_vm1, %v5534_v29  ;;  %v5379_v44 = vld [vmem:[%s6821_s3 + $0x3f8] sm:$0xff]  }
 0x1be   : > { %4814 = vmatmul.mubr.bf16.vlgmr.msra.gmra.mrb[32].mxu0 %v6148_v43  ;;  %4859 = vmatprep.subr.bf16.mxu1 %v5534_v29 }
 0x1bf   : > { %4838 = vmatpush3.bf16.msra.mxu0 %v5334_v46  ;;  %4853 = vmatprep.mubr.msk.bf16.mxu0 %vm5535_vm1, %v5534_v29  ;;  %v5380_v46 = vld [vmem:[%s6821_s3 + $0x3b8] sm:$0xff]  }
 0x1c0   : > { %4839 = vmatprep.subr.bf16.mxu0 %v5534_v29 }
 0x1c1   : > { %4860 = vmatpush3.bf16.msra.mxu1 %v5335_v47  ;;  %v5381_v47 = vld [vmem:[%s6821_s3 + $0x440] sm:$0xff]  }
 0x1c2   : > { %4861 = vmatprep.subr.bf16.mxu1 %v5534_v29 }
 0x1c3   : > { %4840 = vmatpush3.bf16.msra.mxu0 %v5336_v48  ;;  %v2388_v48 = vrot.slane %v6159_v45, 3  ;;  %v5384_v45 = vld [vmem:[%s6821_s3 + $0x408] sm:$0xff]  }
 0x1c4   : > { %4841 = vmatprep.subr.bf16.mxu0 %v5534_v29 }
 0x1c5   : > { %4862 = vmatpush3.bf16.msra.mxu1 %v5337_v49  ;;  %v5382_v49 = vld [vmem:[%s6821_s3 + $0x400] sm:$0xff]  }
 0x1c6   : > { %4863 = vmatprep.subr.bf16.mxu1 %v5534_v29 }
 0x1c7   : > { %4842 = vmatpush3.bf16.msra.mxu0 %v5338_v50  ;;  %v2280_v50 = vrot.slane %v6148_v43, 3  ;;  %v5385_v43 = vld [vmem:[%s6821_s3 + $0x450] sm:$0xff]  }
 0x1c8   : > { %4843 = vmatprep.subr.bf16.mxu0 %v5534_v29 }
 0x1c9   : > { %4864 = vmatpush3.bf16.msra.mxu1 %v5339_v51  ;;  %v5383_v51 = vld [vmem:[%s6821_s3 + $0x448] sm:$0xff]  }
 0x1ca   : > { %4865 = vmatprep.subr.bf16.mxu1 %v5534_v29 }
 0x1cb   : > { %4844 = vmatpush3.bf16.msra.mxu0 %v5340_v52  ;;  %v5386_v52 = vld [vmem:[%s6821_s3 + $0x410] sm:$0xff]  }
 0x1cc   : > { %4845 = vmatprep.subr.bf16.mxu0 %v5534_v29 }
 0x1cd   : > { %4866 = vmatpush3.bf16.msra.mxu1 %v5341_v53  ;;  %v5387_v53 = vld [vmem:[%s6821_s3 + $0x458] sm:$0xff]  }
 0x1ce   : > { %4867 = vmatprep.subr.bf16.mxu1 %v5534_v29 }
 0x1cf   : > { %4846 = vmatpush3.bf16.msra.mxu0 %v5342_v54  ;;  %v5388_v54 = vld [vmem:[%s6821_s3 + $0x418] sm:$0xff]  }
 0x1d0   : > { %4847 = vmatprep.subr.bf16.mxu0 %v5534_v29 }
 0x1d1   : > { %4868 = vmatpush3.bf16.msra.mxu1 %v5343_v55  ;;  %v5389_v55 = vld [vmem:[%s6821_s3 + $0x460] sm:$0xff]  }
 0x1d2   : > { %4869 = vmatprep.subr.bf16.mxu1 %v5534_v29 }
 0x1d3   : > { %4848 = vmatpush3.bf16.msra.mxu0 %v5344_v56  ;;  %v5390_v56 = vld [vmem:[%s6821_s3 + $0x420] sm:$0xff]  }
 0x1d4   : > { %4849 = vmatprep.subr.bf16.mxu0 %v5534_v29 }
 0x1d5   : > { %4870 = vmatpush3.bf16.msra.mxu1 %v5345_v57  ;;  %v5391_v57 = vld [vmem:[%s6821_s3 + $0x468] sm:$0xff]  }
 0x1d6   : > { %4871 = vmatprep.subr.bf16.mxu1 %v5534_v29 }
 0x1d7   : > { %4850 = vmatpush3.bf16.msra.mxu0 %v5346_v58 }
 0x1d8   : > { %4851 = vmatprep.subr.bf16.mxu0 %v5534_v29 }
 0x1d9   : > { %4872 = vmatpush3.bf16.msra.mxu1 %v5347_v59  ;;  %v5392_v59 = vld [vmem:[%s6821_s3 + $0x428] sm:$0xff]  }
 0x1da   : > { %4897 = vmatprep.subr.bf16.mxu1 %v5534_v29 }
 0x1db   : > { %4852 = vmatpush3.bf16.msra.mxu0 %v5348_v60 }
 0x1dc   : > { %4874 = vmatmul.mubr.bf16.vlgmr.msra.gmra.mrb[36].mxu1 %v1956_v62  ;;  %4877 = vmatprep.subr.bf16.mxu0 %v5534_v29 }
 0x1dd   : > { %4898 = vmatpush3.bf16.msra.mxu1 %v5349_v61  ;;  %4913 = vmatprep.mubr.msk.bf16.mxu1 %vm5535_vm1, %v5534_v29 }
 0x1de   : > { %4854 = vmatmul.mubr.bf16.vlgmr.msra.gmra.mrb[36].mxu0 %v1848_v0  ;;  %4899 = vmatprep.subr.bf16.mxu1 %v5534_v29  ;;  %v748_v0 = vmax.f32 %v5882_v33, 0.0  ;;  %v5395_v33 = vld [vmem:[%s6821_s3 + $0x478] sm:$0xff]  }
 0x1df   : > { %4878 = vmatpush3.bf16.msra.mxu0 %v5350_v63  ;;  %4893 = vmatprep.mubr.msk.bf16.mxu0 %vm5535_vm1, %v5534_v29  ;;  %v5393_v63 = vld [vmem:[%s6821_s3 + $0x470] sm:$0xff]  }
 0x1e0   : > { %4879 = vmatprep.subr.bf16.mxu0 %v5534_v29 }
 0x1e1   : > { %4900 = vmatpush3.bf16.msra.mxu1 %v5351_v1 }
 0x1e2   : > { %4901 = vmatprep.subr.bf16.mxu1 %v5534_v29 }
 0x1e3   : > { %4880 = vmatpush3.bf16.msra.mxu0 %v5352_v2 }
 0x1e4   : > { %4881 = vmatprep.subr.bf16.mxu0 %v5534_v29 }
 0x1e5   : > { %4902 = vmatpush3.bf16.msra.mxu1 %v5353_v3 }
 0x1e6   : > { %4903 = vmatprep.subr.bf16.mxu1 %v5534_v29 }
 0x1e7   : > { %4882 = vmatpush3.bf16.msra.mxu0 %v5354_v4 }
 0x1e8   : > { %4883 = vmatprep.subr.bf16.mxu0 %v5534_v29 }
 0x1e9   : > { %4904 = vmatpush3.bf16.msra.mxu1 %v5355_v5  ;;  %v5394_v5 = vld [vmem:[%s6821_s3 + $0x430] sm:$0xff]  }
 0x1ea   : > { %4905 = vmatprep.subr.bf16.mxu1 %v5534_v29 }
 0x1eb   : > { %4884 = vmatpush3.bf16.msra.mxu0 %v5356_v6 }
 0x1ec   : > { %4885 = vmatprep.subr.bf16.mxu0 %v5534_v29 }
 0x1ed   : > { %4906 = vmatpush3.bf16.msra.mxu1 %v5357_v7 }
 0x1ee   : > { %4907 = vmatprep.subr.bf16.mxu1 %v5534_v29 }
 0x1ef   : > { %4886 = vmatpush3.bf16.msra.mxu0 %v5358_v8  ;;  %v6437_v8 = vpack.c.bf16 %v748_v0, %v748_v0 }
 0x1f0   : > { %4887 = vmatprep.subr.bf16.mxu0 %v5534_v29 }
 0x1f1   : > { %4908 = vmatpush3.bf16.msra.mxu1 %v5359_v9  ;;  %v5396_v9 = vld [vmem:[%s6821_s3 + $0x438] sm:$0xff]  }
 0x1f2   : > { %4909 = vmatprep.subr.bf16.mxu1 %v5534_v29 }
 0x1f3   : > { %4888 = vmatpush3.bf16.msra.mxu0 %v5360_v10  ;;  %v5397_v10 = vld [vmem:[%s6821_s3 + $0x4c0] sm:$0xff]  }
 0x1f4   : > { %4889 = vmatprep.subr.bf16.mxu0 %v5534_v29 }
 0x1f5   : > { %4910 = vmatpush3.bf16.msra.mxu1 %v5361_v11  ;;  %v6448_v11 = vshrl.u32 %v6437_v8, 16 }
 0x1f6   : > { %4911 = vmatprep.subr.bf16.mxu1 %v5534_v29 }
 0x1f7   : > { %4890 = vmatpush3.bf16.msra.mxu0 %v5362_v12  ;;  %v5398_v12 = vld [vmem:[%s6821_s3 + $0x480] sm:$0xff]  }
 0x1f8   : > { %4891 = vmatprep.subr.bf16.mxu0 %v5534_v29 }
 0x1f9   : > { %4912 = vmatpush3.bf16.msra.mxu1 %v5363_v13  ;;  %v5399_v13 = vld [vmem:[%s6821_s3 + $0x4c8] sm:$0xff]  }
 0x1fa   : > { %4937 = vmatprep.subr.bf16.mxu1 %v5534_v29 }
 0x1fb   : > { %4892 = vmatpush3.bf16.msra.mxu0 %v5364_v14  ;;  %v5400_v14 = vld [vmem:[%s6821_s3 + $0x488] sm:$0xff]  }
 0x1fc   : > { %4914 = vmatmul.mubr.bf16.vlgmr.msra.gmra.mrb[40].mxu1 %v2172_v17  ;;  %4917 = vmatprep.subr.bf16.mxu0 %v5534_v29  ;;  %v5402_v17 = vld [vmem:[%s6821_s3 + $0x490] sm:$0xff]  }
 0x1fd   : > { %4938 = vmatpush3.bf16.msra.mxu1 %v5365_v16  ;;  %4953 = vmatprep.mubr.msk.bf16.mxu1 %vm5535_vm1, %v5534_v29  ;;  %v5401_v16 = vld [vmem:[%s6821_s3 + $0x4d0] sm:$0xff]  }
 0x1fe   : > { %4894 = vmatmul.mubr.bf16.vlgmr.msra.gmra.mrb[40].mxu0 %v2064_v20  ;;  %4939 = vmatprep.subr.bf16.mxu1 %v5534_v29  ;;  %v5404_v20 = vld [vmem:[%s6821_s3 + $0x498] sm:$0xff]  }
 0x1ff   : > { %4918 = vmatpush3.bf16.msra.mxu0 %v5366_v18  ;;  %4933 = vmatprep.mubr.msk.bf16.mxu0 %vm5535_vm1, %v5534_v29  ;;  %v5403_v18 = vld [vmem:[%s6821_s3 + $0x4d8] sm:$0xff]  }
 0x200   : > { %4919 = vmatprep.subr.bf16.mxu0 %v5534_v29 }
 0x201   : > { %4940 = vmatpush3.bf16.msra.mxu1 %v5367_v21  ;;  %v5405_v21 = vld [vmem:[%s6821_s3 + $0x4e0] sm:$0xff]  }
 0x202   : > { %4941 = vmatprep.subr.bf16.mxu1 %v5534_v29 }
 0x203   : > { %4920 = vmatpush3.bf16.msra.mxu0 %v5368_v22  ;;  %v5406_v22 = vld [vmem:[%s6821_s3 + $0x4a0] sm:$0xff]  }
 0x204   : > { %4921 = vmatprep.subr.bf16.mxu0 %v5534_v29 }
 0x205   : > { %4942 = vmatpush3.bf16.msra.mxu1 %v5369_v23  ;;  %v5407_v23 = vld [vmem:[%s6821_s3 + $0x4e8] sm:$0xff]  }
 0x206   : > { %4943 = vmatprep.subr.bf16.mxu1 %v5534_v29 }
 0x207   : > { %4922 = vmatpush3.bf16.msra.mxu0 %v5370_v24 }
 0x208   : > { %4923 = vmatprep.subr.bf16.mxu0 %v5534_v29 }
 0x209   : > { %4944 = vmatpush3.bf16.msra.mxu1 %v5371_v25  ;;  %v5408_v25 = vld [vmem:[%s6821_s3 + $0x4a8] sm:$0xff]  }
 0x20a   : > { %4945 = vmatprep.subr.bf16.mxu1 %v5534_v29 }
 0x20b   : > { %4924 = vmatpush3.bf16.msra.mxu0 %v5372_v26 }
 0x20c   : > { %4925 = vmatprep.subr.bf16.mxu0 %v5534_v29 }
 0x20d   : > { %4946 = vmatpush3.bf16.msra.mxu1 %v5373_v27 }
 0x20e   : > { %4947 = vmatprep.subr.bf16.mxu1 %v5534_v29 }
 0x20f   : > { %4926 = vmatpush3.bf16.msra.mxu0 %v5374_v28  ;;  %v958_v30 = vpop.f32.mrb[16].mxu1 }
 0x210   : > { %v4675_v32 = vpop.f32.mrb[17].mxu1  ;;  %4927 = vmatprep.subr.bf16.mxu0 %v5534_v29 }
 0x211   : > { %4948 = vmatpush3.bf16.msra.mxu1 %v5375_v19  ;;  %v870_v34 = vpop.f32.mrb[16].mxu0  ;;  %v961_v35 = vpop.f32.mrb[18].mxu1  ;;  %v5409_v19 = vld [vmem:[%s6821_s3 + $0x4f0] sm:$0xff]  }
 0x212   : > { %v6355_v38 = vadd.f32 %v958_v30, %v870_v34  ;;  %v4655_v39 = vpop.f32.mrb[17].mxu0  ;;  %v4676_v40 = vpop.f32.mrb[19].mxu1  ;;  %4949 = vmatprep.subr.bf16.mxu1 %v5534_v29  ;;  %v5410_v35 = vld [vmem:[%s6821_s3 + $0x4b0] sm:$0xff]  }
 0x213   : > { %4928 = vmatpush3.bf16.msra.mxu0 %v5376_v31  ;;  %v873_v41 = vpop.f32.mrb[18].mxu0  ;;  %v5411_v39 = vld [vmem:[%s6821_s3 + $0x4f8] sm:$0xff]  }
 0x214   : > { %v4656_v15 = vpop.f32.mrb[19].mxu0  ;;  %4929 = vmatprep.subr.bf16.mxu0 %v5534_v29  ;;  %v5412_v40 = vld [vmem:[%s6821_s3 + $0x4b8] sm:$0xff]   ;;  %v5413_v41 = vld [vmem:[%s6821_s3 + $0x540] sm:$0xff]  }
 0x215   : > { %4950 = vmatpush3.bf16.msra.mxu1 %v5377_v37  ;;  %v5414_v15 = vld [vmem:[%s6821_s3 + $0x500] sm:$0xff]  }
 0x216   : > { %4951 = vmatprep.subr.bf16.mxu1 %v5534_v29 }
 0x217   : > { %4930 = vmatpush3.bf16.msra.mxu0 %v5378_v42  ;;  %v2822_v42 = vrot.slane %v6448_v11, 1 }
 0x218   : > { %4931 = vmatprep.subr.bf16.mxu0 %v5534_v29 }
 0x219   : > { %4952 = vmatpush3.bf16.msra.mxu1 %v5379_v44  ;;  %v2714_v44 = vrot.slane %v6437_v8, 1 }
 0x21a   : > { %4977 = vmatprep.subr.bf16.mxu1 %v5534_v29 }
 0x21b   : > { %4932 = vmatpush3.bf16.msra.mxu0 %v5380_v46  ;;  %v5415_v46 = vld [vmem:[%s6821_s3 + $0x548] sm:$0xff]  }
 0x21c   : > { %4954 = vmatmul.mubr.bf16.vlgmr.msra.gmra.mrb[44].mxu1 %v2388_v48  ;;  %4957 = vmatprep.subr.bf16.mxu0 %v5534_v29  ;;  %v5417_v48 = vld [vmem:[%s6821_s3 + $0x550] sm:$0xff]  }
 0x21d   : > { %4978 = vmatpush3.bf16.msra.mxu1 %v5381_v47  ;;  %4993 = vmatprep.mubr.msk.bf16.mxu1 %vm5535_vm1, %v5534_v29  ;;  %v5416_v47 = vld [vmem:[%s6821_s3 + $0x508] sm:$0xff]  }
 0x21e   : > { %4934 = vmatmul.mubr.bf16.vlgmr.msra.gmra.mrb[44].mxu0 %v2280_v50  ;;  %4979 = vmatprep.subr.bf16.mxu1 %v5534_v29  ;;  %v5419_v50 = vld [vmem:[%s6821_s3 + $0x558] sm:$0xff]  }
 0x21f   : > { %4958 = vmatpush3.bf16.msra.mxu0 %v5382_v49  ;;  %4973 = vmatprep.mubr.msk.bf16.mxu0 %vm5535_vm1, %v5534_v29  ;;  %v5418_v49 = vld [vmem:[%s6821_s3 + $0x510] sm:$0xff]  }
 0x220   : > { %4959 = vmatprep.subr.bf16.mxu0 %v5534_v29 }
 0x221   : > { %4980 = vmatpush3.bf16.msra.mxu1 %v5383_v51  ;;  %v5420_v51 = vld [vmem:[%s6821_s3 + $0x518] sm:$0xff]  }
 0x222   : > { %4981 = vmatprep.subr.bf16.mxu1 %v5534_v29 }
 0x223   : > { %4960 = vmatpush3.bf16.msra.mxu0 %v5384_v45  ;;  %v5421_v45 = vld [vmem:[%s6821_s3 + $0x560] sm:$0xff]  }
 0x224   : > { %4961 = vmatprep.subr.bf16.mxu0 %v5534_v29 }
 0x225   : > { %4982 = vmatpush3.bf16.msra.mxu1 %v5385_v43  ;;  %v5422_v43 = vld [vmem:[%s6821_s3 + $0x520] sm:$0xff]  }
 0x226   : > { %4983 = vmatprep.subr.bf16.mxu1 %v5534_v29 }
 0x227   : > { %4962 = vmatpush3.bf16.msra.mxu0 %v5386_v52  ;;  %v5423_v52 = vld [vmem:[%s6821_s3 + $0x568] sm:$0xff]  }
 0x228   : > { %4963 = vmatprep.subr.bf16.mxu0 %v5534_v29 }
 0x229   : > { %4984 = vmatpush3.bf16.msra.mxu1 %v5387_v53 }
 0x22a   : > { %4985 = vmatprep.subr.bf16.mxu1 %v5534_v29 }
 0x22b   : > { %4964 = vmatpush3.bf16.msra.mxu0 %v5388_v54  ;;  %v5424_v54 = vld [vmem:[%s6821_s3 + $0x528] sm:$0xff]  }
 0x22c   : > { %4965 = vmatprep.subr.bf16.mxu0 %v5534_v29 }
 0x22d   : > { %4986 = vmatpush3.bf16.msra.mxu1 %v5389_v55 }
 0x22e   : > { %4987 = vmatprep.subr.bf16.mxu1 %v5534_v29 }
 0x22f   : > { %v1174_v58 = vpop.f32.mrb[20].mxu1  ;;  %4966 = vmatpush3.bf16.msra.mxu0 %v5390_v56 }
 0x230   : > { %v4715_v60 = vpop.f32.mrb[21].mxu1  ;;  %4967 = vmatprep.subr.bf16.mxu0 %v5534_v29 }
 0x231   : > { %v1066_v61 = vpop.f32.mrb[20].mxu0  ;;  %v1177_v62 = vpop.f32.mrb[22].mxu1  ;;  %4988 = vmatpush3.bf16.msra.mxu1 %v5391_v57 }
 0x232   : > { %v1072_v1 = vadd.f32 %v1066_v61, %v6355_v38  ;;  %v4695_v2 = vpop.f32.mrb[21].mxu0  ;;  %v4716_v3 = vpop.f32.mrb[23].mxu1  ;;  %4989 = vmatprep.subr.bf16.mxu1 %v5534_v29 }
 0x233   : > { %v1069_v4 = vpop.f32.mrb[22].mxu0  ;;  %4968 = vmatpush3.bf16.msra.mxu0 %v5392_v59  ;;  %v5427_v2 = vld [vmem:[%s6821_s3 + $0x578] sm:$0xff]  }
 0x234   : > { %v4696_v6 = vpop.f32.mrb[23].mxu0  ;;  %4969 = vmatprep.subr.bf16.mxu0 %v5534_v29  ;;  %v1180_v7 = vadd.f32 %v1174_v58, %v1072_v1  ;;  %v5425_v58 = vld [vmem:[%s6821_s3 + $0x570] sm:$0xff]   ;;  %v5428_v3 = vld [vmem:[%s6821_s3 + $0x538] sm:$0xff]   ;;  %v5429_v4 = vld [vmem:[%s6821_s3 + $0x5c0] sm:$0xff]  }
 0x235   : > { %4990 = vmatpush3.bf16.msra.mxu1 %v5393_v63  ;;  %v5426_v63 = vld [vmem:[%s6821_s3 + $0x530] sm:$0xff]   ;;  %v5430_v6 = vld [vmem:[%s6821_s3 + $0x580] sm:$0xff]  }
 0x236   : > { %4991 = vmatprep.subr.bf16.mxu1 %v5534_v29 }
 0x237   : > { %4970 = vmatpush3.bf16.msra.mxu0 %v5394_v5  ;;  %v3038_v5 = vrot.slane %v6448_v11, 2 }
 0x238   : > { %4971 = vmatprep.subr.bf16.mxu0 %v5534_v29 }
 0x239   : > { %4992 = vmatpush3.bf16.msra.mxu1 %v5395_v33  ;;  %v5431_v33 = vld [vmem:[%s6821_s3 + $0x5c8] sm:$0xff]  }
 0x23a   : > { %5017 = vmatprep.subr.bf16.mxu1 %v5534_v29 }
 0x23b   : > { %4972 = vmatpush3.bf16.msra.mxu0 %v5396_v9  ;;  %v5432_v9 = vld [vmem:[%s6821_s3 + $0x588] sm:$0xff]  }
 0x23c   : > { %4994 = vmatmul.mubr.bf16.vlgmr.msra.gmra.mrb[48].mxu1 %v6448_v11  ;;  %4997 = vmatprep.subr.bf16.mxu0 %v5534_v29 }
 0x23d   : > { %5018 = vmatpush3.bf16.msra.mxu1 %v5397_v10  ;;  %5033 = vmatprep.mubr.msk.bf16.mxu1 %vm5535_vm1, %v5534_v29  ;;  %v5433_v10 = vld [vmem:[%s6821_s3 + $0x5d0] sm:$0xff]  }
 0x23e   : > { %4974 = vmatmul.mubr.bf16.vlgmr.msra.gmra.mrb[48].mxu0 %v6437_v8  ;;  %5019 = vmatprep.subr.bf16.mxu1 %v5534_v29 }
 0x23f   : > { %4998 = vmatpush3.bf16.msra.mxu0 %v5398_v12  ;;  %5013 = vmatprep.mubr.msk.bf16.mxu0 %vm5535_vm1, %v5534_v29  ;;  %v5434_v12 = vld [vmem:[%s6821_s3 + $0x590] sm:$0xff]  }
 0x240   : > { %4999 = vmatprep.subr.bf16.mxu0 %v5534_v29 }
 0x241   : > { %5020 = vmatpush3.bf16.msra.mxu1 %v5399_v13  ;;  %v5435_v13 = vld [vmem:[%s6821_s3 + $0x5d8] sm:$0xff]  }
 0x242   : > { %5021 = vmatprep.subr.bf16.mxu1 %v5534_v29 }
 0x243   : > { %5000 = vmatpush3.bf16.msra.mxu0 %v5400_v14  ;;  %v5436_v14 = vld [vmem:[%s6821_s3 + $0x598] sm:$0xff]  }
 0x244   : > { %5001 = vmatprep.subr.bf16.mxu0 %v5534_v29 }
 0x245   : > { %5022 = vmatpush3.bf16.msra.mxu1 %v5401_v16  ;;  %v5437_v16 = vld [vmem:[%s6821_s3 + $0x5e0] sm:$0xff]  }
 0x246   : > { %5023 = vmatprep.subr.bf16.mxu1 %v5534_v29 }
 0x247   : > { %5002 = vmatpush3.bf16.msra.mxu0 %v5402_v17  ;;  %v5438_v17 = vld [vmem:[%s6821_s3 + $0x5a0] sm:$0xff]  }
 0x248   : > { %5003 = vmatprep.subr.bf16.mxu0 %v5534_v29 }
 0x249   : > { %5024 = vmatpush3.bf16.msra.mxu1 %v5403_v18  ;;  %v5439_v18 = vld [vmem:[%s6821_s3 + $0x5e8] sm:$0xff]  }
 0x24a   : > { %5025 = vmatprep.subr.bf16.mxu1 %v5534_v29 }
 0x24b   : > { %5004 = vmatpush3.bf16.msra.mxu0 %v5404_v20 }
 0x24c   : > { %5005 = vmatprep.subr.bf16.mxu0 %v5534_v29 }
 0x24d   : > { %5026 = vmatpush3.bf16.msra.mxu1 %v5405_v21  ;;  %v5440_v21 = vld [vmem:[%s6821_s3 + $0x5a8] sm:$0xff]  }
 0x24e   : > { %5027 = vmatprep.subr.bf16.mxu1 %v5534_v29 }
 0x24f   : > { %v1390_v24 = vpop.f32.mrb[24].mxu1  ;;  %5006 = vmatpush3.bf16.msra.mxu0 %v5406_v22 }
 0x250   : > { %v4755_v26 = vpop.f32.mrb[25].mxu1  ;;  %5007 = vmatprep.subr.bf16.mxu0 %v5534_v29 }
 0x251   : > { %v1282_v27 = vpop.f32.mrb[24].mxu0  ;;  %v1393_v28 = vpop.f32.mrb[26].mxu1  ;;  %5028 = vmatpush3.bf16.msra.mxu1 %v5407_v23 }
 0x252   : > { %v1288_v30 = vadd.f32 %v1282_v27, %v1180_v7  ;;  %v4735_v31 = vpop.f32.mrb[25].mxu0  ;;  %v4756_v32 = vpop.f32.mrb[27].mxu1  ;;  %5029 = vmatprep.subr.bf16.mxu1 %v5534_v29  ;;  %v2930_v7 = vrot.slane %v6437_v8, 2 }
 0x253   : > { %v1285_v34 = vpop.f32.mrb[26].mxu0  ;;  %5008 = vmatpush3.bf16.msra.mxu0 %v5408_v25  ;;  %v5441_v25 = vld [vmem:[%s6821_s3 + $0x5f0] sm:$0xff]  }
 0x254   : > { %v4736_v37 = vpop.f32.mrb[27].mxu0  ;;  %5009 = vmatprep.subr.bf16.mxu0 %v5534_v29  ;;  %v1396_v38 = vadd.f32 %v1390_v24, %v1288_v30  ;;  %v5442_v30 = vld [vmem:[%s6821_s3 + $0x5b0] sm:$0xff]   ;;  %v5443_v34 = vld [vmem:[%s6821_s3 + $0x5f8] sm:$0xff]  }
 0x255   : > { %5030 = vmatpush3.bf16.msra.mxu1 %v5409_v19  ;;  %v3254_v37 = vrot.slane %v6448_v11, 3  ;;  %v5446_v11 = vld [vmem:[%s6821_s3 + $0x608] sm:$0xff]  }
 0x256   : > { %5031 = vmatprep.subr.bf16.mxu1 %v5534_v29 }
 0x257   : > { %5010 = vmatpush3.bf16.msra.mxu0 %v5410_v35  ;;  %v5444_v35 = vld [vmem:[%s6821_s3 + $0x5b8] sm:$0xff]  }
 0x258   : > { %5011 = vmatprep.subr.bf16.mxu0 %v5534_v29 }
 0x259   : > { %5032 = vmatpush3.bf16.msra.mxu1 %v5411_v39  ;;  %v3146_v39 = vrot.slane %v6437_v8, 3  ;;  %v5447_v8 = vld [vmem:[%s6821_s3 + $0x610] sm:$0xff]  }
 0x25a   : > { %5057 = vmatprep.subr.bf16.mxu1 %v5534_v29 }
 0x25b   : > { %5012 = vmatpush3.bf16.msra.mxu0 %v5412_v40  ;;  %v5448_v40 = vld [vmem:[%s6821_s3 + $0x618] sm:$0xff]  }
 0x25c   : > { %5034 = vmatmul.mubr.bf16.vlgmr.msra.gmra.mrb[52].mxu1 %v2822_v42  ;;  %5037 = vmatprep.subr.bf16.mxu0 %v5534_v29 }
 0x25d   : > { %5058 = vmatpush3.bf16.msra.mxu1 %v5413_v41  ;;  %5073 = vmatprep.mubr.msk.bf16.mxu1 %vm5535_vm1, %v5534_v29  ;;  %v5449_v41 = vld [vmem:[%s6821_s3 + $0x620] sm:$0xff]  }
 0x25e   : > { %5014 = vmatmul.mubr.bf16.vlgmr.msra.gmra.mrb[52].mxu0 %v2714_v44  ;;  %5059 = vmatprep.subr.bf16.mxu1 %v5534_v29 }
 0x25f   : > { %5038 = vmatpush3.bf16.msra.mxu0 %v5414_v15  ;;  %5053 = vmatprep.mubr.msk.bf16.mxu0 %vm5535_vm1, %v5534_v29  ;;  %v5450_v15 = vld [vmem:[%s6821_s3 + $0x628] sm:$0xff]  }
 0x260   : > { %5039 = vmatprep.subr.bf16.mxu0 %v5534_v29 }
 0x261   : > { %5060 = vmatpush3.bf16.msra.mxu1 %v5415_v46 }
 0x262   : > { %5061 = vmatprep.subr.bf16.mxu1 %v5534_v29 }
 0x263   : > { %5040 = vmatpush3.bf16.msra.mxu0 %v5416_v47 }
 0x264   : > { %5041 = vmatprep.subr.bf16.mxu0 %v5534_v29 }
 0x265   : > { %5062 = vmatpush3.bf16.msra.mxu1 %v5417_v48 }
 0x266   : > { %5063 = vmatprep.subr.bf16.mxu1 %v5534_v29 }
 0x267   : > { %5042 = vmatpush3.bf16.msra.mxu0 %v5418_v49 }
 0x268   : > { %5043 = vmatprep.subr.bf16.mxu0 %v5534_v29 }
 0x269   : > { %5064 = vmatpush3.bf16.msra.mxu1 %v5419_v50 }
 0x26a   : > { %5065 = vmatprep.subr.bf16.mxu1 %v5534_v29 }
 0x26b   : > { %5044 = vmatpush3.bf16.msra.mxu0 %v5420_v51 }
 0x26c   : > { %5045 = vmatprep.subr.bf16.mxu0 %v5534_v29 }
 0x26d   : > { %5066 = vmatpush3.bf16.msra.mxu1 %v5421_v45  ;;  %v5451_v45 = vld [vmem:[%s6821_s3 + $0x630] sm:$0xff]  }
 0x26e   : > { %5067 = vmatprep.subr.bf16.mxu1 %v5534_v29 }
 0x26f   : > { %v1606_v53 = vpop.f32.mrb[28].mxu1  ;;  %5046 = vmatpush3.bf16.msra.mxu0 %v5422_v43 }
 0x270   : > { %v4795_v55 = vpop.f32.mrb[29].mxu1  ;;  %5047 = vmatprep.subr.bf16.mxu0 %v5534_v29 }
 0x271   : > { %v1498_v56 = vpop.f32.mrb[28].mxu0  ;;  %v1609_v57 = vpop.f32.mrb[30].mxu1  ;;  %5068 = vmatpush3.bf16.msra.mxu1 %v5423_v52 }
 0x272   : > { %v1504_v59 = vadd.f32 %v1498_v56, %v1396_v38  ;;  %v4775_v60 = vpop.f32.mrb[29].mxu0  ;;  %v4796_v61 = vpop.f32.mrb[31].mxu1  ;;  %5069 = vmatprep.subr.bf16.mxu1 %v5534_v29  ;;  %v5445_v38 = vld [vmem:[%s6821_s3 + $0x600] sm:$0xff]  }
 0x273   : > { %v1501_v62 = vpop.f32.mrb[30].mxu0  ;;  %5048 = vmatpush3.bf16.msra.mxu0 %v5424_v54  ;;  %v749_v54 = vmax.f32 %v5891_v36, 0.0 }
 0x274   : > { %v4776_v0 = vpop.f32.mrb[31].mxu0  ;;  %5049 = vmatprep.subr.bf16.mxu0 %v5534_v29  ;;  %v1612_v1 = vadd.f32 %v1606_v53, %v1504_v59  ;;  %v5452_v53 = vld [vmem:[%s6821_s3 + $0x638] sm:$0xff]  }
 0x275   : > { %5070 = vmatpush3.bf16.msra.mxu1 %v5425_v58  ;;  %v3345_v55 = vpack.c.bf16 %v749_v54, %v749_v54 }
 0x276   : > { %5071 = vmatprep.subr.bf16.mxu1 %v5534_v29 }
 0x277   : > { %5050 = vmatpush3.bf16.msra.mxu0 %v5426_v63 }
 0x278   : > { %5051 = vmatprep.subr.bf16.mxu0 %v5534_v29 }
 0x279   : > { %5072 = vmatpush3.bf16.msra.mxu1 %v5427_v2 }
 0x27a   : > { %5097 = vmatprep.subr.bf16.mxu1 %v5534_v29 }
 0x27b   : > { %5052 = vmatpush3.bf16.msra.mxu0 %v5428_v3 }
 0x27c   : > { %5074 = vmatmul.mubr.bf16.vlgmr.msra.gmra.mrb[56].mxu1 %v3038_v5  ;;  %5077 = vmatprep.subr.bf16.mxu0 %v5534_v29 }
 0x27d   : > { %5098 = vmatpush3.bf16.msra.mxu1 %v5429_v4  ;;  %5113 = vmatprep.mubr.msk.bf16.mxu1 %vm5535_vm1, %v5534_v29 }
 0x27e   : > { %5054 = vmatmul.mubr.bf16.vlgmr.msra.gmra.mrb[56].mxu0 %v2930_v7  ;;  %5099 = vmatprep.subr.bf16.mxu1 %v5534_v29 }
 0x27f   : > { %5078 = vmatpush3.bf16.msra.mxu0 %v5430_v6  ;;  %5093 = vmatprep.mubr.msk.bf16.mxu0 %vm5535_vm1, %v5534_v29 }
 0x280   : > { %5079 = vmatprep.subr.bf16.mxu0 %v5534_v29 }
 0x281   : > { %5100 = vmatpush3.bf16.msra.mxu1 %v5431_v33 }
 0x282   : > { %5101 = vmatprep.subr.bf16.mxu1 %v5534_v29 }
 0x283   : > { %5080 = vmatpush3.bf16.msra.mxu0 %v5432_v9 }
 0x284   : > { %5081 = vmatprep.subr.bf16.mxu0 %v5534_v29 }
 0x285   : > { %5102 = vmatpush3.bf16.msra.mxu1 %v5433_v10 }
 0x286   : > { %5103 = vmatprep.subr.bf16.mxu1 %v5534_v29 }
 0x287   : > { %5082 = vmatpush3.bf16.msra.mxu0 %v5434_v12  ;;  %v5453_v12 = vld [vmem:[%s6823_s5] sm:$0xff]  }
 0x288   : > { %5083 = vmatprep.subr.bf16.mxu0 %v5534_v29 }
 0x289   : > { %5104 = vmatpush3.bf16.msra.mxu1 %v5435_v13  ;;  %v5454_v13 = vld [vmem:[%s6823_s5 + $0x8] sm:$0xff]  }
 0x28a   : > { %5105 = vmatprep.subr.bf16.mxu1 %v5534_v29 }
 0x28b   : > { %5084 = vmatpush3.bf16.msra.mxu0 %v5436_v14  ;;  %v5455_v14 = vld [vmem:[%s6823_s5 + $0x10] sm:$0xff]  }
 0x28c   : > { %5085 = vmatprep.subr.bf16.mxu0 %v5534_v29 }
 0x28d   : > { %5106 = vmatpush3.bf16.msra.mxu1 %v5437_v16  ;;  %v5456_v16 = vld [vmem:[%s6823_s5 + $0x18] sm:$0xff]  }
 0x28e   : > { %5107 = vmatprep.subr.bf16.mxu1 %v5534_v29 }
 0x28f   : > { %v1823_v20 = vpop.f32.mrb[32].mxu1  ;;  %5086 = vmatpush3.bf16.msra.mxu0 %v5438_v17  ;;  %v5457_v17 = vld [vmem:[%s6823_s5 + $0x20] sm:$0xff]  }
 0x290   : > { %v4835_v22 = vpop.f32.mrb[33].mxu1  ;;  %5087 = vmatprep.subr.bf16.mxu0 %v5534_v29 }
 0x291   : > { %v1713_v23 = vpop.f32.mrb[32].mxu0  ;;  %v1826_v24 = vpop.f32.mrb[34].mxu1  ;;  %5108 = vmatpush3.bf16.msra.mxu1 %v5439_v18  ;;  %v5458_v18 = vld [vmem:[%s6823_s5 + $0x28] sm:$0xff]  }
 0x292   : > { %v1719_v26 = vadd.f32 %v1713_v23, %v1612_v1  ;;  %v4815_v27 = vpop.f32.mrb[33].mxu0  ;;  %v4836_v28 = vpop.f32.mrb[35].mxu1  ;;  %5109 = vmatprep.subr.bf16.mxu1 %v5534_v29 }
 0x293   : > { %v1716_v19 = vpop.f32.mrb[34].mxu0  ;;  %5088 = vmatpush3.bf16.msra.mxu0 %v5440_v21  ;;  %v5459_v27 = vld [vmem:[%s6823_s5 + $0x30] sm:$0xff]  }
 0x294   : > { %v4816_v31 = vpop.f32.mrb[35].mxu0  ;;  %5089 = vmatprep.subr.bf16.mxu0 %v5534_v29  ;;  %v1829_v32 = vadd.f32 %v1823_v20, %v1719_v26 }
 0x295   : > { %5110 = vmatpush3.bf16.msra.mxu1 %v5441_v25  ;;  %v5460_v31 = vld [vmem:[%s6823_s5 + $0x38] sm:$0xff]  }
 0x296   : > { %5111 = vmatprep.subr.bf16.mxu1 %v5534_v29 }
 0x297   : > { %5090 = vmatpush3.bf16.msra.mxu0 %v5442_v30 }
 0x298   : > { %5091 = vmatprep.subr.bf16.mxu0 %v5534_v29 }
 0x299   : > { %5112 = vmatpush3.bf16.msra.mxu1 %v5443_v34  ;;  %v5462_v34 = vld [vmem:[%s6825_s7 + $0x8] sm:$0xff]  }
 0x29a   : > { %5137 = vmatprep.subr.bf16.mxu1 %v5534_v29 }
 0x29b   : > { %5092 = vmatpush3.bf16.msra.mxu0 %v5444_v35  ;;  %v5463_v35 = vld [vmem:[%s6825_s7 + $0x10] sm:$0xff]  }
 0x29c   : > { %5114 = vmatmul.mubr.bf16.vlgmr.msra.gmra.mrb[60].mxu1 %v3254_v37  ;;  %5117 = vmatprep.subr.bf16.mxu0 %v5534_v29  ;;  %v5464_v37 = vld [vmem:[%s6825_s7 + $0x18] sm:$0xff]  }
 0x29d   : > { %5153 = vmatprep.mubr.msk.bf16.mxu1 %vm5535_vm1, %v5534_v29  ;;  %5138 = vmatpush3.bf16.msra.mxu1 %v5453_v12  ;;  %v5467_v12 = vld [vmem:[%s6825_s7 + $0x30] sm:$0xff]  }
 0x29e   : > { %5094 = vmatmul.mubr.bf16.vlgmr.msra.gmra.mrb[60].mxu0 %v3146_v39  ;;  %5139 = vmatprep.subr.bf16.mxu1 %v5534_v29  ;;  %v5466_v39 = vld [vmem:[%s6825_s7 + $0x28] sm:$0xff]  }
 0x29f   : > { %5118 = vmatpush3.bf16.msra.mxu0 %v5445_v38  ;;  %5133 = vmatprep.mubr.msk.bf16.mxu0 %vm5535_vm1, %v5534_v29  ;;  %v5465_v38 = vld [vmem:[%s6825_s7 + $0x20] sm:$0xff]  }
 0x2a0   : > { %5119 = vmatprep.subr.bf16.mxu0 %v5534_v29 }
 0x2a1   : > { %5140 = vmatpush3.bf16.msra.mxu1 %v5454_v13  ;;  %v5468_v13 = vld [vmem:[%s6825_s7 + $0x38] sm:$0xff]  }
 0x2a2   : > { %5141 = vmatprep.subr.bf16.mxu1 %v5534_v29 }
 0x2a3   : > { %5120 = vmatpush3.bf16.msra.mxu0 %v5446_v11 }
 0x2a4   : > { %5121 = vmatprep.subr.bf16.mxu0 %v5534_v29 }
 0x2a5   : > { %5142 = vmatpush3.bf16.msra.mxu1 %v5455_v14  ;;  %v3472_v14 = vld [vmem:[%s6824_s6] sm:$0x1] }
 0x2a6   : > { %5143 = vmatprep.subr.bf16.mxu1 %v5534_v29 }
 0x2a7   : > { %5122 = vmatpush3.bf16.msra.mxu0 %v5447_v8 }
 0x2a8   : > { %5123 = vmatprep.subr.bf16.mxu0 %v5534_v29 }
 0x2a9   : > { %5144 = vmatpush3.bf16.msra.mxu1 %v5456_v16 }
 0x2aa   : > { %5145 = vmatprep.subr.bf16.mxu1 %v5534_v29 }
 0x2ab   : > { %5124 = vmatpush3.bf16.msra.mxu0 %v5448_v40 }
 0x2ac   : > { %5125 = vmatprep.subr.bf16.mxu0 %v5534_v29 }
 0x2ad   : > { %5146 = vmatpush3.bf16.msra.mxu1 %v5457_v17 }
 0x2ae   : > { %5147 = vmatprep.subr.bf16.mxu1 %v5534_v29 }
 0x2af   : > { %v2040_v42 = vpop.f32.mrb[36].mxu1  ;;  %5126 = vmatpush3.bf16.msra.mxu0 %v5449_v41 }
 0x2b0   : > { %v4875_v44 = vpop.f32.mrb[37].mxu1  ;;  %5127 = vmatprep.subr.bf16.mxu0 %v5534_v29 }
 0x2b1   : > { %v1932_v46 = vpop.f32.mrb[36].mxu0  ;;  %v2043_v47 = vpop.f32.mrb[38].mxu1  ;;  %5148 = vmatpush3.bf16.msra.mxu1 %v5458_v18 }
 0x2b2   : > { %v1938_v48 = vadd.f32 %v1932_v46, %v1829_v32  ;;  %v4855_v49 = vpop.f32.mrb[37].mxu0  ;;  %v4876_v50 = vpop.f32.mrb[39].mxu1  ;;  %5149 = vmatprep.subr.bf16.mxu1 %v5534_v29  ;;  %v5461_v32 = vld [vmem:[%s6825_s7] sm:$0xff]  }
 0x2b3   : > { %v1935_v51 = vpop.f32.mrb[38].mxu0  ;;  %5128 = vmatpush3.bf16.msra.mxu0 %v5450_v15 }
 0x2b4   : > { %v4856_v43 = vpop.f32.mrb[39].mxu0  ;;  %5129 = vmatprep.subr.bf16.mxu0 %v5534_v29  ;;  %v2046_v52 = vadd.f32 %v2040_v42, %v1938_v48 }
 0x2b5   : > { %5150 = vmatpush3.bf16.msra.mxu1 %v5459_v27 }
 0x2b6   : > { %5151 = vmatprep.subr.bf16.mxu1 %v5534_v29 }
 0x2b7   : > { %5130 = vmatpush3.bf16.msra.mxu0 %v5451_v45 }
 0x2b8   : > { %5131 = vmatprep.subr.bf16.mxu0 %v5534_v29 }
 0x2b9   : > { %5152 = vmatpush3.bf16.msra.mxu1 %v5460_v31 }
 0x2bb   : > { %5132 = vmatpush3.bf16.msra.mxu0 %v5452_v53 }
 0x2bc   : > { %5157 = vmatprep.subr.bf16.mxu0 %v5534_v29 }
 0x2be   : > { %5134 = vmatmul.mubr.bf16.vlgmr.msra.gmra.mrb[64].mxu0 %v3345_v55 }
 0x2bf   : > { %5173 = vmatprep.mubr.msk.bf16.mxu0 %vm5535_vm1, %v5534_v29  ;;  %5158 = vmatpush3.bf16.msra.mxu0 %v5461_v32 }
 0x2c0   : > { %5159 = vmatprep.subr.bf16.mxu0 %v5534_v29 }
 0x2c3   : > { %5160 = vmatpush3.bf16.msra.mxu0 %v5462_v34 }
 0x2c4   : > { %5161 = vmatprep.subr.bf16.mxu0 %v5534_v29 }
 0x2c7   : > { %5162 = vmatpush3.bf16.msra.mxu0 %v5463_v35 }
 0x2c8   : > { %5163 = vmatprep.subr.bf16.mxu0 %v5534_v29 }
 0x2cb   : > { %5164 = vmatpush3.bf16.msra.mxu0 %v5464_v37 }
 0x2cc   : > { %5165 = vmatprep.subr.bf16.mxu0 %v5534_v29 }
 0x2cf   : > { %v2256_v56 = vpop.f32.mrb[40].mxu1  ;;  %5166 = vmatpush3.bf16.msra.mxu0 %v5465_v38 }
 0x2d0   : > { %v4915_v57 = vpop.f32.mrb[41].mxu1  ;;  %5167 = vmatprep.subr.bf16.mxu0 %v5534_v29 }
 0x2d1   : > { %v2148_v58 = vpop.f32.mrb[40].mxu0  ;;  %v2259_v59 = vpop.f32.mrb[42].mxu1 }
 0x2d2   : > { %v2154_v60 = vadd.f32 %v2148_v58, %v2046_v52  ;;  %v4895_v61 = vpop.f32.mrb[41].mxu0  ;;  %v4916_v62 = vpop.f32.mrb[43].mxu1 }
 0x2d3   : > { %v2151_v63 = vpop.f32.mrb[42].mxu0  ;;  %5168 = vmatpush3.bf16.msra.mxu0 %v5466_v39 }
 0x2d4   : > { %v4896_v0 = vpop.f32.mrb[43].mxu0  ;;  %v2262_v36 = vadd.f32 %v2256_v56, %v2154_v60  ;;  %5169 = vmatprep.subr.bf16.mxu0 %v5534_v29 }
 0x2d7   : > { %5170 = vmatpush3.bf16.msra.mxu0 %v5467_v12 }
 0x2d8   : > { %5171 = vmatprep.subr.bf16.mxu0 %v5534_v29  ;;  %v3579_v29 = vld [vmem:[%s6826_s8] sm:$0x1] }
 0x2db   : > { %5172 = vmatpush3.bf16.msra.mxu0 %v5468_v13 }
 0x2ef   : > { %v2472_v1 = vpop.f32.mrb[44].mxu1 }
 0x2f0   : > { %v4955_v2 = vpop.f32.mrb[45].mxu1 }
 0x2f1   : > { %v2364_v3 = vpop.f32.mrb[44].mxu0  ;;  %v2475_v4 = vpop.f32.mrb[46].mxu1 }
 0x2f2   : > { %v2370_v5 = vadd.f32 %v2364_v3, %v2262_v36  ;;  %v4935_v6 = vpop.f32.mrb[45].mxu0  ;;  %v4956_v7 = vpop.f32.mrb[47].mxu1  ;;  %v3452_v3 = vld [vmem:[%s6822_s4] sm:$0x1] }
 0x2f3   : > { %v2367_v33 = vpop.f32.mrb[46].mxu0 }
 0x2f4   : > { %v4936_v9 = vpop.f32.mrb[47].mxu0  ;;  %v2478_v10 = vadd.f32 %v2472_v1, %v2370_v5 }
 0x30f   : > { %v2689_v20 = vpop.f32.mrb[48].mxu1 }
 0x310   : > { %v4995_v21 = vpop.f32.mrb[49].mxu1 }
 0x311   : > { %v2579_v22 = vpop.f32.mrb[48].mxu0  ;;  %v2692_v23 = vpop.f32.mrb[50].mxu1 }
 0x312   : > { %v2585_v24 = vadd.f32 %v2579_v22, %v2478_v10  ;;  %v4975_v25 = vpop.f32.mrb[49].mxu0  ;;  %v4996_v26 = vpop.f32.mrb[51].mxu1 }
 0x313   : > { %v2582_v28 = vpop.f32.mrb[50].mxu0 }
 0x314   : > { %v4976_v19 = vpop.f32.mrb[51].mxu0  ;;  %v2695_v30 = vadd.f32 %v2689_v20, %v2585_v24 }
 0x32f   : > { %v2906_v11 = vpop.f32.mrb[52].mxu1 }
 0x330   : > { %v5035_v8 = vpop.f32.mrb[53].mxu1 }
 0x331   : > { %v2798_v40 = vpop.f32.mrb[52].mxu0  ;;  %v2909_v41 = vpop.f32.mrb[54].mxu1 }
 0x332   : > { %v2804_v42 = vadd.f32 %v2798_v40, %v2695_v30  ;;  %v5015_v15 = vpop.f32.mrb[53].mxu0  ;;  %v5036_v44 = vpop.f32.mrb[55].mxu1 }
 0x333   : > { %v2801_v46 = vpop.f32.mrb[54].mxu0 }
 0x334   : > { %v5016_v47 = vpop.f32.mrb[55].mxu0  ;;  %v2912_v48 = vadd.f32 %v2906_v11, %v2804_v42 }
 0x34f   : > { %v3122_v49 = vpop.f32.mrb[56].mxu1 }
 0x350   : > { %v5075_v50 = vpop.f32.mrb[57].mxu1 }
 0x351   : > { %v3014_v51 = vpop.f32.mrb[56].mxu0  ;;  %v3125_v45 = vpop.f32.mrb[58].mxu1 }
 0x352   : > { %v3020_v43 = vadd.f32 %v3014_v51, %v2912_v48  ;;  %v5055_v52 = vpop.f32.mrb[57].mxu0  ;;  %v5076_v53 = vpop.f32.mrb[59].mxu1 }
 0x353   : > { %v3017_v54 = vpop.f32.mrb[58].mxu0 }
 0x354   : > { %v5056_v55 = vpop.f32.mrb[59].mxu0  ;;  %v3128_v56 = vadd.f32 %v3122_v49, %v3020_v43 }
 0x36f   : > { %v3338_v57 = vpop.f32.mrb[60].mxu1 }
 0x370   : > { %v5115_v58 = vpop.f32.mrb[61].mxu1 }
 0x371   : > { %v3230_v59 = vpop.f32.mrb[60].mxu0  ;;  %v3341_v60 = vpop.f32.mrb[62].mxu1 }
 0x372   : > { %v3236_v61 = vadd.f32 %v3230_v59, %v3128_v56  ;;  %v5095_v62 = vpop.f32.mrb[61].mxu0  ;;  %v5116_v63 = vpop.f32.mrb[63].mxu1 }
 0x373   : > { %v3233_v0 = vpop.f32.mrb[62].mxu0 }
 0x374   : > { %v5096_v36 = vpop.f32.mrb[63].mxu0  ;;  %v3344_v1 = vadd.f32 %v3338_v57, %v3236_v61 }
 0x391   : > { %v3445_v2 = vpop.f32.mrb[64].mxu0 }
 0x392   : > { %v3451_v4 = vadd.f32 %v3445_v2, %v3344_v1  ;;  %v5135_v5 = vpop.f32.mrb[65].mxu0 }
 0x393   : > { %v3448_v6 = vpop.f32.mrb[66].mxu0 }
 0x394   : > { %v3453_v7 = vadd.f32 %v3452_v3, %v3451_v4  ;;  %v5136_v33 = vpop.f32.mrb[67].mxu0 }
 0x396   : > { %v3454_v9 = vmax.f32 %v3453_v7, 0.0 }
 0x398   : > { %v3455_v10 = vpack.c.bf16 %v3454_v9, %v3454_v9 }
 0x39a   : > { %5154 = vmatmul.mubr.bf16.vlgmr.msra.gmra.mrb[64].mxu1 %v3455_v10 }
 0x46d   : > { %v3555_v16 = vpop.f32.mrb[64].mxu1 }
 0x46e   : > { %v3556_v17 = vadd.f32 %v3555_v16, %v3472_v14  ;;  %v5155_v18 = vpop.f32.mrb[65].mxu1 }
 0x46f   : > { %v3558_v20 = vpop.f32.mrb[66].mxu1 }
 0x470   : > { %v3561_v21 = vmax.f32 %v3556_v17, 0.0  ;;  %v5156_v22 = vpop.f32.mrb[67].mxu1 }
 0x472   : > { %v3562_v23 = vpack.c.bf16 %v3561_v21, %v3561_v21 }
 0x474   : > { %5174 = vmatmul.mubr.bf16.vlgmr.msra.gmra.mrb[68].mxu0 %v3562_v23 }
 0x547   : > { %v3662_v24 = vpop.f32.mrb[68].mxu0 }
 0x548   : > { %v3663_v25 = vadd.f32 %v3662_v24, %v3579_v29  ;;  %v5175_v26 = vpop.f32.mrb[69].mxu0 }
 0x549   : > { %v3665_v27 = vpop.f32.mrb[70].mxu0 }
 0x54a   : > { %3668 = vst [vmem:[%s324_s21] sm:$0x1] %v3663_v25  ;;  %v5176_v28 = vpop.f32.mrb[71].mxu0 }
 0x54b   : > { %5482 = shalt.err (!%p5479_p3)
}
 0x54c   : > { %s5483_s16 = scalar_lea.hbm %s6776_s25, 16  ;;  %s5487_s21 = scalar_lea.hbm %s6827_s9, 32 }
 0x54d   : > { %p5484_p4 = scmp.ne.s32.totalorder %s6776_s25, %s5483_s16  ;;  %p5488_p9 = scmp.lt.u32.totalorder %s6776_s25, %s6827_s9 }
 0x54e   : > { %p5489_p10 = scmp.lt.u32.totalorder %s5487_s21, %s5483_s16  ;;  %p5491_p12 = scmp.lt.u32.totalorder %s5483_s16, %s6776_s25 }
 0x54f   : > { %p5485_p7 = pnand %p5484_p4, %p5625_p5 }
 0x550   : > { %p5490_p11 = por %p5489_p10, %p5488_p9 }
 0x551   : > { %p5486_p8 = pneg %p5485_p7 }
 0x552   : > { %p5492_p13 = por %p5491_p12, %p5490_p11 }
 0x554   : > { %p5493_p0 = pnand %p5492_p13, %p5486_p8 }
 0x556   : > { %5496 = shalt.err (!%p5493_p0)
}
 0x557   : > { %5177 = dma.vmem_to_hbm [thread:$0]  (%p5625_p5), %s6778_s22, 16, %s6776_s25, %s3670_s26  }
 0x558 PF: > { %p5183_p1 = scmp.ge.s32.totalorder %s5531_s12, 2  ;;  %s3694_s13 = sand.u32 1, %s5519_s30  }
 0x559   : > { %s3695_s27 = scalar_lea.sflag [#allocation3], %s3694_s13 }
 0x55a   : > { %p5180_p2 = pnand %p5183_p1, %p5629_p6 }
 0x55c   : > { %5514 = dma.done.wait (!%p5180_p2), %s3695_s27, 16  }
 0x55d   : > { %5516 = vsyncadd (!%p5180_p2), %s3695_s27, 4294967280  ;;  %p19_p3 = scmp.ge.s32.totalorder %s5612_s15, 4   ;;  %s6830_s30 = smov %s5523_s10 }
 0x55e   : > { %s6831_s10 = smov %s5527_s11  ;;  %s6832_s11 = smov %s5623_s18 }
 0x55f   : > { %s6833_s12 = smov %s5612_s15  ;;  %21 = sbr.rel (!%p19_p3) target bundleno = 3 (0x3), region = 118 }
 0x566   :  { %3699 = vsyncpa [#allocation3], 1 }
 0x567   :  { %3701 = vsyncpa [#allocation3 + $0x1], 1 }

</bundles_post_ra>
